<compile_context>
chip_gen: v7x
topology: tpu7x:2x2x1
jax: 0.10.0
libtpu: 0.0.40
codegen_flags: <defaults>
</compile_context>

<pallas_src>
import functools

import jax
import jax.numpy as jnp
from jax import lax
from jax.experimental import pallas as pl
from jax.experimental.pallas import tpu as pltpu


def _round_up(x, m):
    return (x + m - 1) // m * m


def _vmem_budget_bytes():
    """~65% of physical VMEM (leaves headroom for Mosaic internal scratch)."""
    try:
        cap = int(pltpu.get_tpu_info().vmem_capacity_bytes)
    except Exception:
        cap = 64 * 1024 * 1024  # conservative fallback (v7x-sized)
    return int(cap * 0.65)


def _resident_spec(shape, index_map, single_buffer):
    """BlockSpec for an operand whose block never changes across the grid.

    With single_buffer=True the block gets ONE VMEM buffer instead of the
    default two (it is only ever fetched once), halving its VMEM footprint.
    """
    if single_buffer:
        return pl.BlockSpec(shape, index_map, pipeline_mode=pl.Buffered(1))
    return pl.BlockSpec(shape, index_map)


def _pick_row_tile(n_rows, unit, cap):
    """Largest multiple of `unit` that divides n_rows and is <= cap (>= unit)."""
    cap = max(unit, min(cap, n_rows))
    best = unit
    for cand in range(unit, cap + 1, unit):
        if n_rows % cand == 0:
            best = cand
    return best


# ---------------------------------------------------------------------------
# Kernel 1: hoisted input projection  ReLU(word_emb) @ W_ih + (b_ih + b_hh)
# over ALL (step, batch) rows at once (one big MXU matmul instead of T tiny
# ones inside the serial loop).
# ---------------------------------------------------------------------------
def input_proj_kernel(x_ref, w_ref, b_ref, o_ref):
    x = jnp.maximum(x_ref[...], 0)                         # fused ReLU (bf16)
    o_ref[...] = (
        jnp.dot(x, w_ref[...], preferred_element_type=jnp.float32) + b_ref[...]
    )


def input_proj_call(x_rows, w_ih, b_gates, tile_rows, vmem_limit, single_buffer):
    M, E = x_rows.shape
    G = w_ih.shape[1]
    return pl.pallas_call(
        input_proj_kernel,
        grid=(M // tile_rows,),
        in_specs=[
            pl.BlockSpec((tile_rows, E), lambda i: (i, 0)),
            _resident_spec((E, G), lambda i: (0, 0), single_buffer),
            _resident_spec((1, G), lambda i: (0, 0), single_buffer),
        ],
        out_specs=pl.BlockSpec((tile_rows, G), lambda i: (i, 0)),
        out_shape=jax.ShapeDtypeStruct((M, G), jnp.float32),
        compiler_params=pltpu.CompilerParams(
            dimension_semantics=("parallel",),
            vmem_limit_bytes=vmem_limit,
        ),
    )(x_rows, w_ih, b_gates)


# ---------------------------------------------------------------------------
# Kernel 2: LSTM recurrence.  grid = (batch_tiles [parallel], time_blocks
# [arbitrary]); Tc steps per grid iteration via an unrolled fori_loop.
# Only h_prev @ W_hh happens per step (input gates are precomputed).
# h_out[r] = h_{r+1}  -> directly consumable by the classifier.
# ---------------------------------------------------------------------------
def lstm_recurrence_kernel(gfc_ref, gx_ref, whh_ref, h_out_ref, h_sc, c_sc,
                           *, steps):
    H = whh_ref.shape[0]
    tb = pl.program_id(1)

    def cell(gates, c_prev):
        i_g = jax.nn.sigmoid(gates[:, 0 * H:1 * H])
        f_g = jax.nn.sigmoid(gates[:, 1 * H:2 * H])
        g_g = jnp.tanh(gates[:, 2 * H:3 * H])
        o_g = jax.nn.sigmoid(gates[:, 3 * H:4 * H])
        c_new = f_g * c_prev + i_g * g_g
        h_new = o_g * jnp.tanh(c_new)
        return h_new, c_new

    @pl.when(tb == 0)
    def _():
        # Step 0: input = fc_embed projection; h_prev = c_prev = 0, so the
        # h @ W_hh term vanishes and the f*c_prev term is zero.
        h0, c0 = cell(gfc_ref[...], jnp.zeros_like(c_sc))
        h_sc[...] = h0.astype(h_sc.dtype)   # h kept in bf16 (feeds the MXU)
        c_sc[...] = c0                      # c kept in f32

    def step(j, carry):
        gates = gx_ref[j] + jnp.dot(
            h_sc[...], whh_ref[...], preferred_element_type=jnp.float32
        )
        h_new, c_new = cell(gates, c_sc[...])
        h_bf = h_new.astype(h_out_ref.dtype)
        h_sc[...] = h_bf
        c_sc[...] = c_new
        h_out_ref[j] = h_bf
        return carry

    lax.fori_loop(0, steps, step, 0, unroll=True)


def lstm_recurrence_call(gates_fc, gates_x, w_hh, Tc, n_btiles, vmem_limit,
                         single_buffer):
    T1p, Bp, G = gates_x.shape
    H = w_hh.shape[0]
    tbB = Bp // n_btiles
    n_tblk = T1p // Tc
    kernel = functools.partial(lstm_recurrence_kernel, steps=Tc)
    return pl.pallas_call(
        kernel,
        grid=(n_btiles, n_tblk),
        in_specs=[
            pl.BlockSpec((tbB, G), lambda bi, tb: (bi, 0)),      # fc gates
            pl.BlockSpec((Tc, tbB, G), lambda bi, tb: (tb, bi, 0)),  # word gates
            _resident_spec((H, G), lambda bi, tb: (0, 0), single_buffer),
        ],
        out_specs=pl.BlockSpec((Tc, tbB, H), lambda bi, tb: (tb, bi, 0)),
        out_shape=jax.ShapeDtypeStruct((T1p, Bp, H), jnp.bfloat16),
        scratch_shapes=[
            pltpu.VMEM((tbB, H), jnp.bfloat16),   # h state, persists across tb
            pltpu.VMEM((tbB, H), jnp.float32),    # c state
        ],
        compiler_params=pltpu.CompilerParams(
            dimension_semantics=("parallel", "arbitrary"),
            vmem_limit_bytes=vmem_limit,
        ),
    )(gates_fc, gates_x, w_hh)


# ---------------------------------------------------------------------------
# Kernel 3: batched classifier + log_softmax over the (T-1)*B real rows.
# Vocab is pre-padded to a multiple of 128 lanes (padded biases are -1e30 so
# they contribute nothing to the softmax denominator).
# ---------------------------------------------------------------------------
def classifier_kernel(h_ref, wc_ref, bc_ref, lp_ref):
    logits = (
        jnp.dot(h_ref[...], wc_ref[...], preferred_element_type=jnp.float32)
        + bc_ref[...]
    )
    m = jnp.max(logits, axis=-1, keepdims=True)
    lse = m + jnp.log(jnp.sum(jnp.exp(logits - m), axis=-1, keepdims=True))
    lp_ref[...] = logits - lse


def classifier_call(h_rows, w_c, b_c, n_rows, tile_rows, vmem_limit,
                    single_buffer):
    H = h_rows.shape[1]
    Vp = w_c.shape[1]
    # TODO(synk): for very large H*Vp (resident bf16 weight approaching the
    # VMEM budget, e.g. big vocabularies on v7x's 64 MiB VMEM) add a second
    # grid axis tiling Vp with a two-pass log_softmax instead of keeping the
    # whole vocab resident.
    return pl.pallas_call(
        classifier_kernel,
        grid=(n_rows // tile_rows,),
        in_specs=[
            pl.BlockSpec((tile_rows, H), lambda i: (i, 0)),
            _resident_spec((H, Vp), lambda i: (0, 0), single_buffer),
            _resident_spec((1, Vp), lambda i: (0, 0), single_buffer),
        ],
        out_specs=pl.BlockSpec((tile_rows, Vp), lambda i: (i, 0)),
        out_shape=jax.ShapeDtypeStruct((n_rows, Vp), jnp.float32),
        compiler_params=pltpu.CompilerParams(
            dimension_semantics=("parallel",),
            vmem_limit_bytes=vmem_limit,
        ),
    )(h_rows, w_c, b_c)


# ---------------------------------------------------------------------------
# forward_xe (eval mode: Dropout = identity, ss_prob = 0)
# ---------------------------------------------------------------------------
@functools.partial(jax.jit, static_argnames=("vocab_size", "single_buffer"))
def forward_xe(params, fc_feats, captions, *, vocab_size, single_buffer=True):
    B = fc_feats.shape[0]
    T = captions.shape[1]
    E, G = params["w_ih"].shape
    H = params["w_hh"].shape[0]
    assert G == 4 * H and H % 128 == 0, "hidden size must be a multiple of 128"

    vmem_budget = _vmem_budget_bytes()

    # batch padded to a sublane multiple
    Bp = _round_up(B, 8)
    if Bp != B:
        fc_feats = jnp.pad(fc_feats, ((0, Bp - B), (0, 0)))
        captions = jnp.pad(captions, ((0, Bp - B), (0, 0)))

    T_out = T - 1                              # number of classified steps
    n_tblk = -(-T_out // 8)                    # balanced time blocking (Tc <= 8)
    Tc = -(-T_out // n_tblk)
    T1p = n_tblk * Tc                          # padded word-step count

    # --- step-0 (fc_embed) gates: tiny, plain XLA (no Pallas launch, no concat)
    fc_emb = jnp.maximum(fc_feats @ params["w_fc"] + params["b_fc"], 0.0)
    gates_fc = (
        jnp.dot(fc_emb.astype(jnp.bfloat16), params["w_ih"],
                preferred_element_type=jnp.float32)
        + params["b_gates"]
    )                                                           # (Bp, 4H) f32

    # --- word embeddings for steps 1..T-1, time padded to T1p with pad tokens
    tok = captions[:, :T_out]
    if T1p != T_out:
        tok = jnp.pad(tok, ((0, 0), (0, T1p - T_out)))
    emb = jnp.take(params["emb_table"], tok.T, axis=0)          # (T1p, Bp, E)

    # --- hoisted input projection: ONE batched MXU matmul over all rows
    M_proj = T1p * Bp
    tile_p = _pick_row_tile(M_proj, Bp, 512)
    gates_w = input_proj_call(emb.reshape(M_proj, E), params["w_ih"],
                              params["b_gates"], tile_p, vmem_budget,
                              single_buffer)
    gates_w = gates_w.reshape(T1p, Bp, G)                       # (T1p, Bp, 4H)

    # --- recurrence: only h_prev @ W_hh per step; batch tiles -> v7x megacore
    n_btiles = 2 if Bp % 16 == 0 else 1
    h_all = lstm_recurrence_call(gates_fc, gates_w, params["w_hh"], Tc,
                                 n_btiles, vmem_budget, single_buffer)
    # h_all[r] = h_{r+1}; consumed below with a free reshape (no slice copy)

    # --- classifier + log_softmax over exactly the (T-1)*Bp real rows
    Vp = params["w_c"].shape[1]
    M_cls = T_out * Bp
    resident = 2 * (H * Vp * 2 + Vp * 4)          # worst-case resident weight
    per_row = 2 * (Vp * 4 + H * 2)                # double-buffered in/out tiles
    cap = max(Bp, (vmem_budget - resident - (2 << 20)) // per_row)
    tile_c = _pick_row_tile(M_cls, Bp, min(512, cap))
    lp = classifier_call(h_all.reshape(T1p * Bp, H), params["w_c"],
                         params["b_c"], M_cls, tile_c, vmem_budget,
                         single_buffer)                          # (M_cls, Vp)

    lp = lp.reshape(T_out, Bp, Vp)[:, :B, :vocab_size]
    return lp.transpose(1, 0, 2)                                 # (B, T-1, V)


# ---------------------------------------------------------------------------
# deterministic parameter init (shapes follow Decoder.__init__)
# ---------------------------------------------------------------------------
def init_params(key, vocab_size, emb_dim, fc_feat_dim, hid_dim, pad_id):
    ks = jax.random.split(key, 9)

    def u(k, shape, fan):
        bound = 1.0 / jnp.sqrt(fan)
        return jax.random.uniform(k, shape, jnp.float32, -bound, bound)

    v_pad = _round_up(vocab_size, 128)

    emb_table = u(ks[0], (vocab_size, emb_dim), emb_dim)
    emb_table = emb_table.at[pad_id].set(0.0)          # padding_idx row = 0

    # PyTorch LSTMCell has two bias vectors; keep their summed statistics.
    b_ih = u(ks[5], (1, 4 * hid_dim), hid_dim)
    b_hh = u(ks[6], (1, 4 * hid_dim), hid_dim)

    w_c = u(ks[7], (hid_dim, vocab_size), hid_dim)
    b_c = u(ks[8], (1, vocab_size), hid_dim)
    # lane-dense classifier output: pad vocab to a multiple of 128; padded
    # columns get zero weights and a hugely negative bias (kept in f32).
    w_c = jnp.pad(w_c, ((0, 0), (0, v_pad - vocab_size)))
    b_c = jnp.pad(b_c, ((0, 0), (0, v_pad - vocab_size)), constant_values=-1e30)

    return {
        "emb_table": emb_table.astype(jnp.bfloat16),
        "w_fc": u(ks[1], (fc_feat_dim, emb_dim), fc_feat_dim),
        "b_fc": u(ks[2], (1, emb_dim), fc_feat_dim),
        "w_ih": u(ks[3], (emb_dim, 4 * hid_dim), hid_dim).astype(jnp.bfloat16),
        "w_hh": u(ks[4], (hid_dim, 4 * hid_dim), hid_dim).astype(jnp.bfloat16),
        "b_gates": b_ih + b_hh,
        "w_c": w_c.astype(jnp.bfloat16),
        "b_c": b_c,
    }


# TODO(synk): forward_rl / sample() (multinomial sampling, beam search with
# data-dependent Python control flow) are not expressible as a static Pallas
# grid and are intentionally not implemented here.

if __name__ == "__main__":
    idx2word = ["<PAD>", "<UNK>", "<SOS>", "<EOS>"] + [f"w{i}" for i in range(12)]
    settings = dict(emb_dim=32, fc_feat_dim=64, rnn_hid_dim=128, dropout_p=0.5)

    vocab_size = len(idx2word)          # 16
    pad_id = idx2word.index("<PAD>")
    B, T = 4, 8

    key = jax.random.PRNGKey(0)
    kp, kf, kc = jax.random.split(key, 3)
    params = init_params(kp, vocab_size, settings["emb_dim"],
                         settings["fc_feat_dim"], settings["rnn_hid_dim"], pad_id)

    fc_feats = jax.random.normal(kf, (B, settings["fc_feat_dim"]), jnp.float32)
    captions = jax.random.randint(kc, (B, T), 0, vocab_size, dtype=jnp.int32)

    def run(single_buffer):
        out = forward_xe(params, fc_feats, captions, vocab_size=vocab_size,
                         single_buffer=single_buffer)
        out = jax.block_until_ready(out)
        assert out.shape == (B, T - 1, vocab_size), out.shape
        assert bool(jnp.all(jnp.isfinite(out)))
        row_sums = jnp.sum(jnp.exp(out), axis=-1)   # log_softmax rows sum to 1
        assert bool(jnp.all(jnp.abs(row_sums - 1.0) < 1e-3)), row_sums
        return out

    try:
        outputs = run(single_buffer=True)
    except Exception:
        # pl.Buffered(1) (single-buffered resident weights) not supported by
        # this jax/libtpu build -> fall back to default double buffering.
        outputs = run(single_buffer=False)

    print("KERNEL_OK")
</pallas_src>

<mosaic_0001>
module attributes {stable_mosaic.version = 11 : i64} {
  func.func @classifier_kernel(%arg0: i32, %arg1: memref<56x128xbf16, #tpu.memory_space<vmem>>, %arg2: memref<128x128xbf16, #tpu.memory_space<vmem>>, %arg3: memref<1x128xf32, #tpu.memory_space<vmem>>, %arg4: memref<56x128xf32, #tpu.memory_space<vmem>>) attributes {dimension_semantics = [#tpu.dimension_semantics<parallel>], iteration_bounds = array<i64: 1>, scalar_prefetch = 0 : i64, scratch_operands = 0 : i64, tpu.core_type = #tpu.core_type<tc>, window_params = [{transform_indices = @transform_0, window_bounds = array<i64: 56, 128>}, {pipeline_mode = #tpu.pipeline_mode<synchronous>, transform_indices = @transform_1, window_bounds = array<i64: 128, 128>}, {pipeline_mode = #tpu.pipeline_mode<synchronous>, transform_indices = @transform_2, window_bounds = array<i64: 1, 128>}, {transform_indices = @transform_3, window_bounds = array<i64: 56, 128>}]} {
    %c0 = arith.constant 0 : index
    %c0_0 = arith.constant 0 : index
    %0 = vector.load %arg1[%c0, %c0_0] : memref<56x128xbf16, #tpu.memory_space<vmem>>, vector<56x128xbf16>
    %c0_1 = arith.constant 0 : index
    %c0_2 = arith.constant 0 : index
    %1 = vector.load %arg2[%c0_1, %c0_2] : memref<128x128xbf16, #tpu.memory_space<vmem>>, vector<128x128xbf16>
    %cst = arith.constant dense<0.000000e+00> : vector<56x128xf32>
    %2 = tpu.matmul %0, %1, %cst {dimension_numbers = #tpu.dot_dimension_numbers<[1], [0], [0], [1], [0, 0, 1, 1], [], []>} : vector<56x128xbf16>, vector<128x128xbf16>, vector<56x128xf32> -> vector<56x128xf32>
    %c0_3 = arith.constant 0 : index
    %c0_4 = arith.constant 0 : index
    %3 = vector.load %arg3[%c0_3, %c0_4] : memref<1x128xf32, #tpu.memory_space<vmem>>, vector<1x128xf32>
    %4 = vector.broadcast %3 : vector<1x128xf32> to vector<56x128xf32>
    %5 = arith.addf %2, %4 : vector<56x128xf32>
    %cst_5 = arith.constant dense<0xFF800000> : vector<56xf32>
    %6 = vector.multi_reduction <maximumf>, %5, %cst_5 [1] : vector<56x128xf32> to vector<56xf32>
    %7 = vector.shape_cast %6 : vector<56xf32> to vector<56x1xf32>
    %8 = vector.broadcast %7 : vector<56x1xf32> to vector<56x128xf32>
    %9 = arith.subf %5, %8 : vector<56x128xf32>
    %10 = math.exp %9 : vector<56x128xf32>
    %cst_6 = arith.constant dense<0.000000e+00> : vector<56xf32>
    %11 = vector.multi_reduction <add>, %10, %cst_6 [1] : vector<56x128xf32> to vector<56xf32>
    %12 = vector.shape_cast %11 : vector<56xf32> to vector<56x1xf32>
    %13 = math.log %12 : vector<56x1xf32>
    %14 = arith.addf %7, %13 : vector<56x1xf32>
    %15 = vector.broadcast %14 : vector<56x1xf32> to vector<56x128xf32>
    %16 = arith.subf %5, %15 : vector<56x128xf32>
    %c0_7 = arith.constant 0 : index
    %c0_8 = arith.constant 0 : index
    %17 = vector.load %arg4[%c0_7, %c0_8] : memref<56x128xf32, #tpu.memory_space<vmem>>, vector<56x128xf32>
    tpu.vector_store %arg4[%c0_7, %c0_8], %16 {strides = array<i32>} : memref<56x128xf32, #tpu.memory_space<vmem>>, vector<56x128xf32>,
    return
  }
  func.func @transform_0(%arg0: i32) -> (i32, i32) {
    %c0_i32 = arith.constant 0 : i32
    %c0_i32_0 = arith.constant 0 : i32
    return %arg0, %c0_i32 : i32, i32
  }
  func.func @transform_1(%arg0: i32) -> (i32, i32) {
    %c0_i32 = arith.constant 0 : i32
    %c0_i32_0 = arith.constant 0 : i32
    %c0_i32_1 = arith.constant 0 : i32
    return %c0_i32, %c0_i32_0 : i32, i32
  }
  func.func @transform_2(%arg0: i32) -> (i32, i32) {
    %c0_i32 = arith.constant 0 : i32
    %c0_i32_0 = arith.constant 0 : i32
    %c0_i32_1 = arith.constant 0 : i32
    return %c0_i32, %c0_i32_0 : i32, i32
  }
  func.func @transform_3(%arg0: i32) -> (i32, i32) {
    %c0_i32 = arith.constant 0 : i32
    %c0_i32_0 = arith.constant 0 : i32
    return %arg0, %c0_i32 : i32, i32
  }
}

module attributes {stable_mosaic.version = 11 : i64} {
  func.func @input_proj_kernel(%arg0: i32, %arg1: memref<56x32xbf16, #tpu.memory_space<vmem>>, %arg2: memref<32x512xbf16, #tpu.memory_space<vmem>>, %arg3: memref<1x512xf32, #tpu.memory_space<vmem>>, %arg4: memref<56x512xf32, #tpu.memory_space<vmem>>) attributes {dimension_semantics = [#tpu.dimension_semantics<parallel>], iteration_bounds = array<i64: 1>, scalar_prefetch = 0 : i64, scratch_operands = 0 : i64, tpu.core_type = #tpu.core_type<tc>, window_params = [{transform_indices = @transform_0, window_bounds = array<i64: 56, 32>}, {pipeline_mode = #tpu.pipeline_mode<synchronous>, transform_indices = @transform_1, window_bounds = array<i64: 32, 512>}, {pipeline_mode = #tpu.pipeline_mode<synchronous>, transform_indices = @transform_2, window_bounds = array<i64: 1, 512>}, {transform_indices = @transform_3, window_bounds = array<i64: 56, 512>}]} {
    %c0 = arith.constant 0 : index
    %c0_0 = arith.constant 0 : index
    %0 = vector.load %arg1[%c0, %c0_0] : memref<56x32xbf16, #tpu.memory_space<vmem>>, vector<56x32xbf16>
    %cst = arith.constant 0.000000e+00 : bf16
    %1 = vector.broadcast %cst : bf16 to vector<56x32xbf16>
    %2 = arith.maximumf %0, %1 : vector<56x32xbf16>
    %c0_1 = arith.constant 0 : index
    %c0_2 = arith.constant 0 : index
    %3 = vector.load %arg2[%c0_1, %c0_2] : memref<32x512xbf16, #tpu.memory_space<vmem>>, vector<32x512xbf16>
    %cst_3 = arith.constant dense<0.000000e+00> : vector<56x512xf32>
    %4 = tpu.matmul %2, %3, %cst_3 {dimension_numbers = #tpu.dot_dimension_numbers<[1], [0], [0], [1], [0, 0, 1, 1], [], []>} : vector<56x32xbf16>, vector<32x512xbf16>, vector<56x512xf32> -> vector<56x512xf32>
    %c0_4 = arith.constant 0 : index
    %c0_5 = arith.constant 0 : index
    %5 = vector.load %arg3[%c0_4, %c0_5] : memref<1x512xf32, #tpu.memory_space<vmem>>, vector<1x512xf32>
    %6 = vector.broadcast %5 : vector<1x512xf32> to vector<56x512xf32>
    %7 = arith.addf %4, %6 : vector<56x512xf32>
    %c0_6 = arith.constant 0 : index
    %c0_7 = arith.constant 0 : index
    %8 = vector.load %arg4[%c0_6, %c0_7] : memref<56x512xf32, #tpu.memory_space<vmem>>, vector<56x512xf32>
    tpu.vector_store %arg4[%c0_6, %c0_7], %7 {strides = array<i32>} : memref<56x512xf32, #tpu.memory_space<vmem>>, vector<56x512xf32>,
    return
  }
  func.func @transform_0(%arg0: i32) -> (i32, i32) {
    %c0_i32 = arith.constant 0 : i32
    %c0_i32_0 = arith.constant 0 : i32
    return %arg0, %c0_i32 : i32, i32
  }
  func.func @transform_1(%arg0: i32) -> (i32, i32) {
    %c0_i32 = arith.constant 0 : i32
    %c0_i32_0 = arith.constant 0 : i32
    %c0_i32_1 = arith.constant 0 : i32
    return %c0_i32, %c0_i32_0 : i32, i32
  }
  func.func @transform_2(%arg0: i32) -> (i32, i32) {
    %c0_i32 = arith.constant 0 : i32
    %c0_i32_0 = arith.constant 0 : i32
    %c0_i32_1 = arith.constant 0 : i32
    return %c0_i32, %c0_i32_0 : i32, i32
  }
  func.func @transform_3(%arg0: i32) -> (i32, i32) {
    %c0_i32 = arith.constant 0 : i32
    %c0_i32_0 = arith.constant 0 : i32
    return %arg0, %c0_i32 : i32, i32
  }
}

module attributes {stable_mosaic.version = 11 : i64} {
  func.func @lstm_recurrence_kernel(%arg0: i32, %arg1: i32, %arg2: memref<8x512xf32, #tpu.memory_space<vmem>>, %arg3: memref<7x8x512xf32, #tpu.memory_space<vmem>>, %arg4: memref<128x512xbf16, #tpu.memory_space<vmem>>, %arg5: memref<7x8x128xbf16, #tpu.memory_space<vmem>>, %arg6: memref<8x128xbf16, #tpu.memory_space<vmem>>, %arg7: memref<8x128xf32, #tpu.memory_space<vmem>>) attributes {dimension_semantics = [#tpu.dimension_semantics<parallel>, #tpu.dimension_semantics<arbitrary>], iteration_bounds = array<i64: 1, 1>, scalar_prefetch = 0 : i64, scratch_operands = 2 : i64, tpu.core_type = #tpu.core_type<tc>, window_params = [{transform_indices = @transform_0, window_bounds = array<i64: 8, 512>}, {transform_indices = @transform_1, window_bounds = array<i64: 7, 8, 512>}, {pipeline_mode = #tpu.pipeline_mode<synchronous>, transform_indices = @transform_2, window_bounds = array<i64: 128, 512>}, {transform_indices = @transform_3, window_bounds = array<i64: 7, 8, 128>}]} {
    %c0_i32 = arith.constant 0 : i32
    %0 = arith.cmpi eq, %arg1, %c0_i32 : i32
    %1 = arith.extui %0 : i1 to i32
    %c0_i32_0 = arith.constant 0 : i32
    %2 = arith.cmpi ne, %1, %c0_i32_0 : i32
    scf.if %2 {
      %c0_126 = arith.constant 0 : index
      %c0_127 = arith.constant 0 : index
      %283 = vector.load %arg2[%c0_126, %c0_127] : memref<8x512xf32, #tpu.memory_space<vmem>>, vector<8x512xf32>
      %cst_128 = arith.constant 0.000000e+00 : f32
      %284 = vector.broadcast %cst_128 : f32 to vector<8x128xf32>
      %285 = vector.extract_strided_slice %283 {offsets = [0, 0], sizes = [8, 128], strides = [1, 1]} : vector<8x512xf32> to vector<8x128xf32>
      %286 = arith.negf %285 : vector<8x128xf32>
      %287 = math.exp %286 : vector<8x128xf32>
      %cst_129 = arith.constant 1.000000e+00 : f32
      %288 = vector.broadcast %cst_129 : f32 to vector<8x128xf32>
      %289 = arith.addf %288, %287 : vector<8x128xf32>
      %290 = arith.divf %288, %289 : vector<8x128xf32>
      %291 = vector.extract_strided_slice %283 {offsets = [0, 128], sizes = [8, 128], strides = [1, 1]} : vector<8x512xf32> to vector<8x128xf32>
      %292 = arith.negf %291 : vector<8x128xf32>
      %293 = math.exp %292 : vector<8x128xf32>
      %cst_130 = arith.constant 1.000000e+00 : f32
      %294 = vector.broadcast %cst_130 : f32 to vector<8x128xf32>
      %295 = arith.addf %294, %293 : vector<8x128xf32>
      %296 = arith.divf %294, %295 : vector<8x128xf32>
      %297 = vector.extract_strided_slice %283 {offsets = [0, 256], sizes = [8, 128], strides = [1, 1]} : vector<8x512xf32> to vector<8x128xf32>
      %298 = math.tanh %297 : vector<8x128xf32>
      %299 = vector.extract_strided_slice %283 {offsets = [0, 384], sizes = [8, 128], strides = [1, 1]} : vector<8x512xf32> to vector<8x128xf32>
      %300 = arith.negf %299 : vector<8x128xf32>
      %301 = math.exp %300 : vector<8x128xf32>
      %cst_131 = arith.constant 1.000000e+00 : f32
      %302 = vector.broadcast %cst_131 : f32 to vector<8x128xf32>
      %303 = arith.addf %302, %301 : vector<8x128xf32>
      %304 = arith.divf %302, %303 : vector<8x128xf32>
      %305 = arith.mulf %296, %284 : vector<8x128xf32>
      %306 = arith.mulf %290, %298 : vector<8x128xf32>
      %307 = arith.addf %305, %306 : vector<8x128xf32>
      %308 = math.tanh %307 : vector<8x128xf32>
      %309 = arith.mulf %304, %308 : vector<8x128xf32>
      %310 = arith.truncf %309 : vector<8x128xf32> to vector<8x128xbf16>
      %c0_132 = arith.constant 0 : index
      %c0_133 = arith.constant 0 : index
      %311 = vector.load %arg6[%c0_132, %c0_133] : memref<8x128xbf16, #tpu.memory_space<vmem>>, vector<8x128xbf16>
      tpu.vector_store %arg6[%c0_132, %c0_133], %310 {strides = array<i32>} : memref<8x128xbf16, #tpu.memory_space<vmem>>, vector<8x128xbf16>,
      %c0_134 = arith.constant 0 : index
      %c0_135 = arith.constant 0 : index
      %312 = vector.load %arg7[%c0_134, %c0_135] : memref<8x128xf32, #tpu.memory_space<vmem>>, vector<8x128xf32>
      tpu.vector_store %arg7[%c0_134, %c0_135], %307 {strides = array<i32>} : memref<8x128xf32, #tpu.memory_space<vmem>>, vector<8x128xf32>,
    } else {
    }
    %c0_i32_1 = arith.constant 0 : i32
    %3 = arith.index_cast %c0_i32_1 : i32 to index
    %c0 = arith.constant 0 : index
    %c0_2 = arith.constant 0 : index
    %4 = vector.load %arg3[%3, %c0, %c0_2] : memref<7x8x512xf32, #tpu.memory_space<vmem>>, vector<1x8x512xf32>
    %5 = vector.shape_cast %4 : vector<1x8x512xf32> to vector<8x512xf32>
    %c0_3 = arith.constant 0 : index
    %c0_4 = arith.constant 0 : index
    %6 = vector.load %arg6[%c0_3, %c0_4] : memref<8x128xbf16, #tpu.memory_space<vmem>>, vector<8x128xbf16>
    %c0_5 = arith.constant 0 : index
    %c0_6 = arith.constant 0 : index
    %7 = vector.load %arg4[%c0_5, %c0_6] : memref<128x512xbf16, #tpu.memory_space<vmem>>, vector<128x512xbf16>
    %cst = arith.constant dense<0.000000e+00> : vector<8x512xf32>
    %8 = tpu.matmul %6, %7, %cst {dimension_numbers = #tpu.dot_dimension_numbers<[1], [0], [0], [1], [0, 0, 1, 1], [], []>} : vector<8x128xbf16>, vector<128x512xbf16>, vector<8x512xf32> -> vector<8x512xf32>
    %9 = arith.addf %5, %8 : vector<8x512xf32>
    %c0_7 = arith.constant 0 : index
    %c0_8 = arith.constant 0 : index
    %10 = vector.load %arg7[%c0_7, %c0_8] : memref<8x128xf32, #tpu.memory_space<vmem>>, vector<8x128xf32>
    %11 = vector.extract_strided_slice %9 {offsets = [0, 0], sizes = [8, 128], strides = [1, 1]} : vector<8x512xf32> to vector<8x128xf32>
    %12 = arith.negf %11 : vector<8x128xf32>
    %13 = math.exp %12 : vector<8x128xf32>
    %cst_9 = arith.constant 1.000000e+00 : f32
    %14 = vector.broadcast %cst_9 : f32 to vector<8x128xf32>
    %15 = arith.addf %14, %13 : vector<8x128xf32>
    %16 = arith.divf %14, %15 : vector<8x128xf32>
    %17 = vector.extract_strided_slice %9 {offsets = [0, 128], sizes = [8, 128], strides = [1, 1]} : vector<8x512xf32> to vector<8x128xf32>
    %18 = arith.negf %17 : vector<8x128xf32>
    %19 = math.exp %18 : vector<8x128xf32>
    %cst_10 = arith.constant 1.000000e+00 : f32
    %20 = vector.broadcast %cst_10 : f32 to vector<8x128xf32>
    %21 = arith.addf %20, %19 : vector<8x128xf32>
    %22 = arith.divf %20, %21 : vector<8x128xf32>
    %23 = vector.extract_strided_slice %9 {offsets = [0, 256], sizes = [8, 128], strides = [1, 1]} : vector<8x512xf32> to vector<8x128xf32>
    %24 = math.tanh %23 : vector<8x128xf32>
    %25 = vector.extract_strided_slice %9 {offsets = [0, 384], sizes = [8, 128], strides = [1, 1]} : vector<8x512xf32> to vector<8x128xf32>
    %26 = arith.negf %25 : vector<8x128xf32>
    %27 = math.exp %26 : vector<8x128xf32>
    %cst_11 = arith.constant 1.000000e+00 : f32
    %28 = vector.broadcast %cst_11 : f32 to vector<8x128xf32>
    %29 = arith.addf %28, %27 : vector<8x128xf32>
    %30 = arith.divf %28, %29 : vector<8x128xf32>
    %31 = arith.mulf %22, %10 : vector<8x128xf32>
    %32 = arith.mulf %16, %24 : vector<8x128xf32>
    %33 = arith.addf %31, %32 : vector<8x128xf32>
    %34 = math.tanh %33 : vector<8x128xf32>
    %35 = arith.mulf %30, %34 : vector<8x128xf32>
    %36 = arith.truncf %35 : vector<8x128xf32> to vector<8x128xbf16>
    %c0_12 = arith.constant 0 : index
    %c0_13 = arith.constant 0 : index
    %37 = vector.load %arg6[%c0_12, %c0_13] : memref<8x128xbf16, #tpu.memory_space<vmem>>, vector<8x128xbf16>
    tpu.vector_store %arg6[%c0_12, %c0_13], %36 {strides = array<i32>} : memref<8x128xbf16, #tpu.memory_space<vmem>>, vector<8x128xbf16>,
    %c0_14 = arith.constant 0 : index
    %c0_15 = arith.constant 0 : index
    %38 = vector.load %arg7[%c0_14, %c0_15] : memref<8x128xf32, #tpu.memory_space<vmem>>, vector<8x128xf32>
    tpu.vector_store %arg7[%c0_14, %c0_15], %33 {strides = array<i32>} : memref<8x128xf32, #tpu.memory_space<vmem>>, vector<8x128xf32>,
    %39 = arith.index_cast %c0_i32_1 : i32 to index
    %c0_16 = arith.constant 0 : index
    %c0_17 = arith.constant 0 : index
    %40 = vector.load %arg5[%39, %c0_16, %c0_17] : memref<7x8x128xbf16, #tpu.memory_space<vmem>>, vector<1x8x128xbf16>
    %41 = vector.shape_cast %40 : vector<1x8x128xbf16> to vector<8x128xbf16>
    %42 = vector.shape_cast %36 : vector<8x128xbf16> to vector<1x8x128xbf16>
    tpu.vector_store %arg5[%39, %c0_16, %c0_17], %42 {strides = array<i32>} : memref<7x8x128xbf16, #tpu.memory_space<vmem>>, vector<1x8x128xbf16>,
    %c1_i32 = arith.constant 1 : i32
    %43 = arith.index_cast %c1_i32 : i32 to index
    %c0_18 = arith.constant 0 : index
    %c0_19 = arith.constant 0 : index
    %44 = vector.load %arg3[%43, %c0_18, %c0_19] : memref<7x8x512xf32, #tpu.memory_space<vmem>>, vector<1x8x512xf32>
    %45 = vector.shape_cast %44 : vector<1x8x512xf32> to vector<8x512xf32>
    %c0_20 = arith.constant 0 : index
    %c0_21 = arith.constant 0 : index
    %46 = vector.load %arg6[%c0_20, %c0_21] : memref<8x128xbf16, #tpu.memory_space<vmem>>, vector<8x128xbf16>
    %c0_22 = arith.constant 0 : index
    %c0_23 = arith.constant 0 : index
    %47 = vector.load %arg4[%c0_22, %c0_23] : memref<128x512xbf16, #tpu.memory_space<vmem>>, vector<128x512xbf16>
    %cst_24 = arith.constant dense<0.000000e+00> : vector<8x512xf32>
    %48 = tpu.matmul %46, %47, %cst_24 {dimension_numbers = #tpu.dot_dimension_numbers<[1], [0], [0], [1], [0, 0, 1, 1], [], []>} : vector<8x128xbf16>, vector<128x512xbf16>, vector<8x512xf32> -> vector<8x512xf32>
    %49 = arith.addf %45, %48 : vector<8x512xf32>
    %c0_25 = arith.constant 0 : index
    %c0_26 = arith.constant 0 : index
    %50 = vector.load %arg7[%c0_25, %c0_26] : memref<8x128xf32, #tpu.memory_space<vmem>>, vector<8x128xf32>
    %51 = vector.extract_strided_slice %49 {offsets = [0, 0], sizes = [8, 128], strides = [1, 1]} : vector<8x512xf32> to vector<8x128xf32>
    %52 = arith.negf %51 : vector<8x128xf32>
    %53 = math.exp %52 : vector<8x128xf32>
    %cst_27 = arith.constant 1.000000e+00 : f32
    %54 = vector.broadcast %cst_27 : f32 to vector<8x128xf32>
    %55 = arith.addf %54, %53 : vector<8x128xf32>
    %56 = arith.divf %54, %55 : vector<8x128xf32>
    %57 = vector.extract_strided_slice %49 {offsets = [0, 128], sizes = [8, 128], strides = [1, 1]} : vector<8x512xf32> to vector<8x128xf32>
    %58 = arith.negf %57 : vector<8x128xf32>
    %59 = math.exp %58 : vector<8x128xf32>
    %cst_28 = arith.constant 1.000000e+00 : f32
    %60 = vector.broadcast %cst_28 : f32 to vector<8x128xf32>
    %61 = arith.addf %60, %59 : vector<8x128xf32>
    %62 = arith.divf %60, %61 : vector<8x128xf32>
    %63 = vector.extract_strided_slice %49 {offsets = [0, 256], sizes = [8, 128], strides = [1, 1]} : vector<8x512xf32> to vector<8x128xf32>
    %64 = math.tanh %63 : vector<8x128xf32>
    %65 = vector.extract_strided_slice %49 {offsets = [0, 384], sizes = [8, 128], strides = [1, 1]} : vector<8x512xf32> to vector<8x128xf32>
    %66 = arith.negf %65 : vector<8x128xf32>
    %67 = math.exp %66 : vector<8x128xf32>
    %cst_29 = arith.constant 1.000000e+00 : f32
    %68 = vector.broadcast %cst_29 : f32 to vector<8x128xf32>
    %69 = arith.addf %68, %67 : vector<8x128xf32>
    %70 = arith.divf %68, %69 : vector<8x128xf32>
    %71 = arith.mulf %62, %50 : vector<8x128xf32>
    %72 = arith.mulf %56, %64 : vector<8x128xf32>
    %73 = arith.addf %71, %72 : vector<8x128xf32>
    %74 = math.tanh %73 : vector<8x128xf32>
    %75 = arith.mulf %70, %74 : vector<8x128xf32>
    %76 = arith.truncf %75 : vector<8x128xf32> to vector<8x128xbf16>
    %c0_30 = arith.constant 0 : index
    %c0_31 = arith.constant 0 : index
    %77 = vector.load %arg6[%c0_30, %c0_31] : memref<8x128xbf16, #tpu.memory_space<vmem>>, vector<8x128xbf16>
    tpu.vector_store %arg6[%c0_30, %c0_31], %76 {strides = array<i32>} : memref<8x128xbf16, #tpu.memory_space<vmem>>, vector<8x128xbf16>,
    %c0_32 = arith.constant 0 : index
    %c0_33 = arith.constant 0 : index
    %78 = vector.load %arg7[%c0_32, %c0_33] : memref<8x128xf32, #tpu.memory_space<vmem>>, vector<8x128xf32>
    tpu.vector_store %arg7[%c0_32, %c0_33], %73 {strides = array<i32>} : memref<8x128xf32, #tpu.memory_space<vmem>>, vector<8x128xf32>,
    %79 = arith.index_cast %c1_i32 : i32 to index
    %c0_34 = arith.constant 0 : index
    %c0_35 = arith.constant 0 : index
    %80 = vector.load %arg5[%79, %c0_34, %c0_35] : memref<7x8x128xbf16, #tpu.memory_space<vmem>>, vector<1x8x128xbf16>
    %81 = vector.shape_cast %80 : vector<1x8x128xbf16> to vector<8x128xbf16>
    %82 = vector.shape_cast %76 : vector<8x128xbf16> to vector<1x8x128xbf16>
    tpu.vector_store %arg5[%79, %c0_34, %c0_35], %82 {strides = array<i32>} : memref<7x8x128xbf16, #tpu.memory_space<vmem>>, vector<1x8x128xbf16>,
    %c2_i32 = arith.constant 2 : i32
    %83 = arith.index_cast %c2_i32 : i32 to index
    %c0_36 = arith.constant 0 : index
    %c0_37 = arith.constant 0 : index
    %84 = vector.load %arg3[%83, %c0_36, %c0_37] : memref<7x8x512xf32, #tpu.memory_space<vmem>>, vector<1x8x512xf32>
    %85 = vector.shape_cast %84 : vector<1x8x512xf32> to vector<8x512xf32>
    %c0_38 = arith.constant 0 : index
    %c0_39 = arith.constant 0 : index
    %86 = vector.load %arg6[%c0_38, %c0_39] : memref<8x128xbf16, #tpu.memory_space<vmem>>, vector<8x128xbf16>
    %c0_40 = arith.constant 0 : index
    %c0_41 = arith.constant 0 : index
    %87 = vector.load %arg4[%c0_40, %c0_41] : memref<128x512xbf16, #tpu.memory_space<vmem>>, vector<128x512xbf16>
    %cst_42 = arith.constant dense<0.000000e+00> : vector<8x512xf32>
    %88 = tpu.matmul %86, %87, %cst_42 {dimension_numbers = #tpu.dot_dimension_numbers<[1], [0], [0], [1], [0, 0, 1, 1], [], []>} : vector<8x128xbf16>, vector<128x512xbf16>, vector<8x512xf32> -> vector<8x512xf32>
    %89 = arith.addf %85, %88 : vector<8x512xf32>
    %c0_43 = arith.constant 0 : index
    %c0_44 = arith.constant 0 : index
    %90 = vector.load %arg7[%c0_43, %c0_44] : memref<8x128xf32, #tpu.memory_space<vmem>>, vector<8x128xf32>
    %91 = vector.extract_strided_slice %89 {offsets = [0, 0], sizes = [8, 128], strides = [1, 1]} : vector<8x512xf32> to vector<8x128xf32>
    %92 = arith.negf %91 : vector<8x128xf32>
    %93 = math.exp %92 : vector<8x128xf32>
    %cst_45 = arith.constant 1.000000e+00 : f32
    %94 = vector.broadcast %cst_45 : f32 to vector<8x128xf32>
    %95 = arith.addf %94, %93 : vector<8x128xf32>
    %96 = arith.divf %94, %95 : vector<8x128xf32>
    %97 = vector.extract_strided_slice %89 {offsets = [0, 128], sizes = [8, 128], strides = [1, 1]} : vector<8x512xf32> to vector<8x128xf32>
    %98 = arith.negf %97 : vector<8x128xf32>
    %99 = math.exp %98 : vector<8x128xf32>
    %cst_46 = arith.constant 1.000000e+00 : f32
    %100 = vector.broadcast %cst_46 : f32 to vector<8x128xf32>
    %101 = arith.addf %100, %99 : vector<8x128xf32>
    %102 = arith.divf %100, %101 : vector<8x128xf32>
    %103 = vector.extract_strided_slice %89 {offsets = [0, 256], sizes = [8, 128], strides = [1, 1]} : vector<8x512xf32> to vector<8x128xf32>
    %104 = math.tanh %103 : vector<8x128xf32>
    %105 = vector.extract_strided_slice %89 {offsets = [0, 384], sizes = [8, 128], strides = [1, 1]} : vector<8x512xf32> to vector<8x128xf32>
    %106 = arith.negf %105 : vector<8x128xf32>
    %107 = math.exp %106 : vector<8x128xf32>
    %cst_47 = arith.constant 1.000000e+00 : f32
    %108 = vector.broadcast %cst_47 : f32 to vector<8x128xf32>
    %109 = arith.addf %108, %107 : vector<8x128xf32>
    %110 = arith.divf %108, %109 : vector<8x128xf32>
    %111 = arith.mulf %102, %90 : vector<8x128xf32>
    %112 = arith.mulf %96, %104 : vector<8x128xf32>
    %113 = arith.addf %111, %112 : vector<8x128xf32>
    %114 = math.tanh %113 : vector<8x128xf32>
    %115 = arith.mulf %110, %114 : vector<8x128xf32>
    %116 = arith.truncf %115 : vector<8x128xf32> to vector<8x128xbf16>
    %c0_48 = arith.constant 0 : index
    %c0_49 = arith.constant 0 : index
    %117 = vector.load %arg6[%c0_48, %c0_49] : memref<8x128xbf16, #tpu.memory_space<vmem>>, vector<8x128xbf16>
    tpu.vector_store %arg6[%c0_48, %c0_49], %116 {strides = array<i32>} : memref<8x128xbf16, #tpu.memory_space<vmem>>, vector<8x128xbf16>,
    %c0_50 = arith.constant 0 : index
    %c0_51 = arith.constant 0 : index
    %118 = vector.load %arg7[%c0_50, %c0_51] : memref<8x128xf32, #tpu.memory_space<vmem>>, vector<8x128xf32>
    tpu.vector_store %arg7[%c0_50, %c0_51], %113 {strides = array<i32>} : memref<8x128xf32, #tpu.memory_space<vmem>>, vector<8x128xf32>,
    %119 = arith.index_cast %c2_i32 : i32 to index
    %c0_52 = arith.constant 0 : index
    %c0_53 = arith.constant 0 : index
    %120 = vector.load %arg5[%119, %c0_52, %c0_53] : memref<7x8x128xbf16, #tpu.memory_space<vmem>>, vector<1x8x128xbf16>
    %121 = vector.shape_cast %120 : vector<1x8x128xbf16> to vector<8x128xbf16>
    %122 = vector.shape_cast %116 : vector<8x128xbf16> to vector<1x8x128xbf16>
    tpu.vector_store %arg5[%119, %c0_52, %c0_53], %122 {strides = array<i32>} : memref<7x8x128xbf16, #tpu.memory_space<vmem>>, vector<1x8x128xbf16>,
    %c3_i32 = arith.constant 3 : i32
    %123 = arith.index_cast %c3_i32 : i32 to index
    %c0_54 = arith.constant 0 : index
    %c0_55 = arith.constant 0 : index
    %124 = vector.load %arg3[%123, %c0_54, %c0_55] : memref<7x8x512xf32, #tpu.memory_space<vmem>>, vector<1x8x512xf32>
    %125 = vector.shape_cast %124 : vector<1x8x512xf32> to vector<8x512xf32>
    %c0_56 = arith.constant 0 : index
    %c0_57 = arith.constant 0 : index
    %126 = vector.load %arg6[%c0_56, %c0_57] : memref<8x128xbf16, #tpu.memory_space<vmem>>, vector<8x128xbf16>
    %c0_58 = arith.constant 0 : index
    %c0_59 = arith.constant 0 : index
    %127 = vector.load %arg4[%c0_58, %c0_59] : memref<128x512xbf16, #tpu.memory_space<vmem>>, vector<128x512xbf16>
    %cst_60 = arith.constant dense<0.000000e+00> : vector<8x512xf32>
    %128 = tpu.matmul %126, %127, %cst_60 {dimension_numbers = #tpu.dot_dimension_numbers<[1], [0], [0], [1], [0, 0, 1, 1], [], []>} : vector<8x128xbf16>, vector<128x512xbf16>, vector<8x512xf32> -> vector<8x512xf32>
    %129 = arith.addf %125, %128 : vector<8x512xf32>
    %c0_61 = arith.constant 0 : index
    %c0_62 = arith.constant 0 : index
    %130 = vector.load %arg7[%c0_61, %c0_62] : memref<8x128xf32, #tpu.memory_space<vmem>>, vector<8x128xf32>
    %131 = vector.extract_strided_slice %129 {offsets = [0, 0], sizes = [8, 128], strides = [1, 1]} : vector<8x512xf32> to vector<8x128xf32>
    %132 = arith.negf %131 : vector<8x128xf32>
    %133 = math.exp %132 : vector<8x128xf32>
    %cst_63 = arith.constant 1.000000e+00 : f32
    %134 = vector.broadcast %cst_63 : f32 to vector<8x128xf32>
    %135 = arith.addf %134, %133 : vector<8x128xf32>
    %136 = arith.divf %134, %135 : vector<8x128xf32>
    %137 = vector.extract_strided_slice %129 {offsets = [0, 128], sizes = [8, 128], strides = [1, 1]} : vector<8x512xf32> to vector<8x128xf32>
    %138 = arith.negf %137 : vector<8x128xf32>
    %139 = math.exp %138 : vector<8x128xf32>
    %cst_64 = arith.constant 1.000000e+00 : f32
    %140 = vector.broadcast %cst_64 : f32 to vector<8x128xf32>
    %141 = arith.addf %140, %139 : vector<8x128xf32>
    %142 = arith.divf %140, %141 : vector<8x128xf32>
    %143 = vector.extract_strided_slice %129 {offsets = [0, 256], sizes = [8, 128], strides = [1, 1]} : vector<8x512xf32> to vector<8x128xf32>
    %144 = math.tanh %143 : vector<8x128xf32>
    %145 = vector.extract_strided_slice %129 {offsets = [0, 384], sizes = [8, 128], strides = [1, 1]} : vector<8x512xf32> to vector<8x128xf32>
    %146 = arith.negf %145 : vector<8x128xf32>
    %147 = math.exp %146 : vector<8x128xf32>
    %cst_65 = arith.constant 1.000000e+00 : f32
    %148 = vector.broadcast %cst_65 : f32 to vector<8x128xf32>
    %149 = arith.addf %148, %147 : vector<8x128xf32>
    %150 = arith.divf %148, %149 : vector<8x128xf32>
    %151 = arith.mulf %142, %130 : vector<8x128xf32>
    %152 = arith.mulf %136, %144 : vector<8x128xf32>
    %153 = arith.addf %151, %152 : vector<8x128xf32>
    %154 = math.tanh %153 : vector<8x128xf32>
    %155 = arith.mulf %150, %154 : vector<8x128xf32>
    %156 = arith.truncf %155 : vector<8x128xf32> to vector<8x128xbf16>
    %c0_66 = arith.constant 0 : index
    %c0_67 = arith.constant 0 : index
    %157 = vector.load %arg6[%c0_66, %c0_67] : memref<8x128xbf16, #tpu.memory_space<vmem>>, vector<8x128xbf16>
    tpu.vector_store %arg6[%c0_66, %c0_67], %156 {strides = array<i32>} : memref<8x128xbf16, #tpu.memory_space<vmem>>, vector<8x128xbf16>,
    %c0_68 = arith.constant 0 : index
    %c0_69 = arith.constant 0 : index
    %158 = vector.load %arg7[%c0_68, %c0_69] : memref<8x128xf32, #tpu.memory_space<vmem>>, vector<8x128xf32>
    tpu.vector_store %arg7[%c0_68, %c0_69], %153 {strides = array<i32>} : memref<8x128xf32, #tpu.memory_space<vmem>>, vector<8x128xf32>,
    %159 = arith.index_cast %c3_i32 : i32 to index
    %c0_70 = arith.constant 0 : index
    %c0_71 = arith.constant 0 : index
    %160 = vector.load %arg5[%159, %c0_70, %c0_71] : memref<7x8x128xbf16, #tpu.memory_space<vmem>>, vector<1x8x128xbf16>
    %161 = vector.shape_cast %160 : vector<1x8x128xbf16> to vector<8x128xbf16>
    %162 = vector.shape_cast %156 : vector<8x128xbf16> to vector<1x8x128xbf16>
    tpu.vector_store %arg5[%159, %c0_70, %c0_71], %162 {strides = array<i32>} : memref<7x8x128xbf16, #tpu.memory_space<vmem>>, vector<1x8x128xbf16>,
    %c4_i32 = arith.constant 4 : i32
    %163 = arith.index_cast %c4_i32 : i32 to index
    %c0_72 = arith.constant 0 : index
    %c0_73 = arith.constant 0 : index
    %164 = vector.load %arg3[%163, %c0_72, %c0_73] : memref<7x8x512xf32, #tpu.memory_space<vmem>>, vector<1x8x512xf32>
    %165 = vector.shape_cast %164 : vector<1x8x512xf32> to vector<8x512xf32>
    %c0_74 = arith.constant 0 : index
    %c0_75 = arith.constant 0 : index
    %166 = vector.load %arg6[%c0_74, %c0_75] : memref<8x128xbf16, #tpu.memory_space<vmem>>, vector<8x128xbf16>
    %c0_76 = arith.constant 0 : index
    %c0_77 = arith.constant 0 : index
    %167 = vector.load %arg4[%c0_76, %c0_77] : memref<128x512xbf16, #tpu.memory_space<vmem>>, vector<128x512xbf16>
    %cst_78 = arith.constant dense<0.000000e+00> : vector<8x512xf32>
    %168 = tpu.matmul %166, %167, %cst_78 {dimension_numbers = #tpu.dot_dimension_numbers<[1], [0], [0], [1], [0, 0, 1, 1], [], []>} : vector<8x128xbf16>, vector<128x512xbf16>, vector<8x512xf32> -> vector<8x512xf32>
    %169 = arith.addf %165, %168 : vector<8x512xf32>
    %c0_79 = arith.constant 0 : index
    %c0_80 = arith.constant 0 : index
    %170 = vector.load %arg7[%c0_79, %c0_80] : memref<8x128xf32, #tpu.memory_space<vmem>>, vector<8x128xf32>
    %171 = vector.extract_strided_slice %169 {offsets = [0, 0], sizes = [8, 128], strides = [1, 1]} : vector<8x512xf32> to vector<8x128xf32>
    %172 = arith.negf %171 : vector<8x128xf32>
    %173 = math.exp %172 : vector<8x128xf32>
    %cst_81 = arith.constant 1.000000e+00 : f32
    %174 = vector.broadcast %cst_81 : f32 to vector<8x128xf32>
    %175 = arith.addf %174, %173 : vector<8x128xf32>
    %176 = arith.divf %174, %175 : vector<8x128xf32>
    %177 = vector.extract_strided_slice %169 {offsets = [0, 128], sizes = [8, 128], strides = [1, 1]} : vector<8x512xf32> to vector<8x128xf32>
    %178 = arith.negf %177 : vector<8x128xf32>
    %179 = math.exp %178 : vector<8x128xf32>
    %cst_82 = arith.constant 1.000000e+00 : f32
    %180 = vector.broadcast %cst_82 : f32 to vector<8x128xf32>
    %181 = arith.addf %180, %179 : vector<8x128xf32>
    %182 = arith.divf %180, %181 : vector<8x128xf32>
    %183 = vector.extract_strided_slice %169 {offsets = [0, 256], sizes = [8, 128], strides = [1, 1]} : vector<8x512xf32> to vector<8x128xf32>
    %184 = math.tanh %183 : vector<8x128xf32>
    %185 = vector.extract_strided_slice %169 {offsets = [0, 384], sizes = [8, 128], strides = [1, 1]} : vector<8x512xf32> to vector<8x128xf32>
    %186 = arith.negf %185 : vector<8x128xf32>
    %187 = math.exp %186 : vector<8x128xf32>
    %cst_83 = arith.constant 1.000000e+00 : f32
    %188 = vector.broadcast %cst_83 : f32 to vector<8x128xf32>
    %189 = arith.addf %188, %187 : vector<8x128xf32>
    %190 = arith.divf %188, %189 : vector<8x128xf32>
    %191 = arith.mulf %182, %170 : vector<8x128xf32>
    %192 = arith.mulf %176, %184 : vector<8x128xf32>
    %193 = arith.addf %191, %192 : vector<8x128xf32>
    %194 = math.tanh %193 : vector<8x128xf32>
    %195 = arith.mulf %190, %194 : vector<8x128xf32>
    %196 = arith.truncf %195 : vector<8x128xf32> to vector<8x128xbf16>
    %c0_84 = arith.constant 0 : index
    %c0_85 = arith.constant 0 : index
    %197 = vector.load %arg6[%c0_84, %c0_85] : memref<8x128xbf16, #tpu.memory_space<vmem>>, vector<8x128xbf16>
    tpu.vector_store %arg6[%c0_84, %c0_85], %196 {strides = array<i32>} : memref<8x128xbf16, #tpu.memory_space<vmem>>, vector<8x128xbf16>,
    %c0_86 = arith.constant 0 : index
    %c0_87 = arith.constant 0 : index
    %198 = vector.load %arg7[%c0_86, %c0_87] : memref<8x128xf32, #tpu.memory_space<vmem>>, vector<8x128xf32>
    tpu.vector_store %arg7[%c0_86, %c0_87], %193 {strides = array<i32>} : memref<8x128xf32, #tpu.memory_space<vmem>>, vector<8x128xf32>,
    %199 = arith.index_cast %c4_i32 : i32 to index
    %c0_88 = arith.constant 0 : index
    %c0_89 = arith.constant 0 : index
    %200 = vector.load %arg5[%199, %c0_88, %c0_89] : memref<7x8x128xbf16, #tpu.memory_space<vmem>>, vector<1x8x128xbf16>
    %201 = vector.shape_cast %200 : vector<1x8x128xbf16> to vector<8x128xbf16>
    %202 = vector.shape_cast %196 : vector<8x128xbf16> to vector<1x8x128xbf16>
    tpu.vector_store %arg5[%199, %c0_88, %c0_89], %202 {strides = array<i32>} : memref<7x8x128xbf16, #tpu.memory_space<vmem>>, vector<1x8x128xbf16>,
    %c5_i32 = arith.constant 5 : i32
    %203 = arith.index_cast %c5_i32 : i32 to index
    %c0_90 = arith.constant 0 : index
    %c0_91 = arith.constant 0 : index
    %204 = vector.load %arg3[%203, %c0_90, %c0_91] : memref<7x8x512xf32, #tpu.memory_space<vmem>>, vector<1x8x512xf32>
    %205 = vector.shape_cast %204 : vector<1x8x512xf32> to vector<8x512xf32>
    %c0_92 = arith.constant 0 : index
    %c0_93 = arith.constant 0 : index
    %206 = vector.load %arg6[%c0_92, %c0_93] : memref<8x128xbf16, #tpu.memory_space<vmem>>, vector<8x128xbf16>
    %c0_94 = arith.constant 0 : index
    %c0_95 = arith.constant 0 : index
    %207 = vector.load %arg4[%c0_94, %c0_95] : memref<128x512xbf16, #tpu.memory_space<vmem>>, vector<128x512xbf16>
    %cst_96 = arith.constant dense<0.000000e+00> : vector<8x512xf32>
    %208 = tpu.matmul %206, %207, %cst_96 {dimension_numbers = #tpu.dot_dimension_numbers<[1], [0], [0], [1], [0, 0, 1, 1], [], []>} : vector<8x128xbf16>, vector<128x512xbf16>, vector<8x512xf32> -> vector<8x512xf32>
    %209 = arith.addf %205, %208 : vector<8x512xf32>
    %c0_97 = arith.constant 0 : index
    %c0_98 = arith.constant 0 : index
    %210 = vector.load %arg7[%c0_97, %c0_98] : memref<8x128xf32, #tpu.memory_space<vmem>>, vector<8x128xf32>
    %211 = vector.extract_strided_slice %209 {offsets = [0, 0], sizes = [8, 128], strides = [1, 1]} : vector<8x512xf32> to vector<8x128xf32>
    %212 = arith.negf %211 : vector<8x128xf32>
    %213 = math.exp %212 : vector<8x128xf32>
    %cst_99 = arith.constant 1.000000e+00 : f32
    %214 = vector.broadcast %cst_99 : f32 to vector<8x128xf32>
    %215 = arith.addf %214, %213 : vector<8x128xf32>
    %216 = arith.divf %214, %215 : vector<8x128xf32>
    %217 = vector.extract_strided_slice %209 {offsets = [0, 128], sizes = [8, 128], strides = [1, 1]} : vector<8x512xf32> to vector<8x128xf32>
    %218 = arith.negf %217 : vector<8x128xf32>
    %219 = math.exp %218 : vector<8x128xf32>
    %cst_100 = arith.constant 1.000000e+00 : f32
    %220 = vector.broadcast %cst_100 : f32 to vector<8x128xf32>
    %221 = arith.addf %220, %219 : vector<8x128xf32>
    %222 = arith.divf %220, %221 : vector<8x128xf32>
    %223 = vector.extract_strided_slice %209 {offsets = [0, 256], sizes = [8, 128], strides = [1, 1]} : vector<8x512xf32> to vector<8x128xf32>
    %224 = math.tanh %223 : vector<8x128xf32>
    %225 = vector.extract_strided_slice %209 {offsets = [0, 384], sizes = [8, 128], strides = [1, 1]} : vector<8x512xf32> to vector<8x128xf32>
    %226 = arith.negf %225 : vector<8x128xf32>
    %227 = math.exp %226 : vector<8x128xf32>
    %cst_101 = arith.constant 1.000000e+00 : f32
    %228 = vector.broadcast %cst_101 : f32 to vector<8x128xf32>
    %229 = arith.addf %228, %227 : vector<8x128xf32>
    %230 = arith.divf %228, %229 : vector<8x128xf32>
    %231 = arith.mulf %222, %210 : vector<8x128xf32>
    %232 = arith.mulf %216, %224 : vector<8x128xf32>
    %233 = arith.addf %231, %232 : vector<8x128xf32>
    %234 = math.tanh %233 : vector<8x128xf32>
    %235 = arith.mulf %230, %234 : vector<8x128xf32>
    %236 = arith.truncf %235 : vector<8x128xf32> to vector<8x128xbf16>
    %c0_102 = arith.constant 0 : index
    %c0_103 = arith.constant 0 : index
    %237 = vector.load %arg6[%c0_102, %c0_103] : memref<8x128xbf16, #tpu.memory_space<vmem>>, vector<8x128xbf16>
    tpu.vector_store %arg6[%c0_102, %c0_103], %236 {strides = array<i32>} : memref<8x128xbf16, #tpu.memory_space<vmem>>, vector<8x128xbf16>,
    %c0_104 = arith.constant 0 : index
    %c0_105 = arith.constant 0 : index
    %238 = vector.load %arg7[%c0_104, %c0_105] : memref<8x128xf32, #tpu.memory_space<vmem>>, vector<8x128xf32>
    tpu.vector_store %arg7[%c0_104, %c0_105], %233 {strides = array<i32>} : memref<8x128xf32, #tpu.memory_space<vmem>>, vector<8x128xf32>,
    %239 = arith.index_cast %c5_i32 : i32 to index
    %c0_106 = arith.constant 0 : index
    %c0_107 = arith.constant 0 : index
    %240 = vector.load %arg5[%239, %c0_106, %c0_107] : memref<7x8x128xbf16, #tpu.memory_space<vmem>>, vector<1x8x128xbf16>
    %241 = vector.shape_cast %240 : vector<1x8x128xbf16> to vector<8x128xbf16>
    %242 = vector.shape_cast %236 : vector<8x128xbf16> to vector<1x8x128xbf16>
    tpu.vector_store %arg5[%239, %c0_106, %c0_107], %242 {strides = array<i32>} : memref<7x8x128xbf16, #tpu.memory_space<vmem>>, vector<1x8x128xbf16>,
    %c6_i32 = arith.constant 6 : i32
    %243 = arith.index_cast %c6_i32 : i32 to index
    %c0_108 = arith.constant 0 : index
    %c0_109 = arith.constant 0 : index
    %244 = vector.load %arg3[%243, %c0_108, %c0_109] : memref<7x8x512xf32, #tpu.memory_space<vmem>>, vector<1x8x512xf32>
    %245 = vector.shape_cast %244 : vector<1x8x512xf32> to vector<8x512xf32>
    %c0_110 = arith.constant 0 : index
    %c0_111 = arith.constant 0 : index
    %246 = vector.load %arg6[%c0_110, %c0_111] : memref<8x128xbf16, #tpu.memory_space<vmem>>, vector<8x128xbf16>
    %c0_112 = arith.constant 0 : index
    %c0_113 = arith.constant 0 : index
    %247 = vector.load %arg4[%c0_112, %c0_113] : memref<128x512xbf16, #tpu.memory_space<vmem>>, vector<128x512xbf16>
    %cst_114 = arith.constant dense<0.000000e+00> : vector<8x512xf32>
    %248 = tpu.matmul %246, %247, %cst_114 {dimension_numbers = #tpu.dot_dimension_numbers<[1], [0], [0], [1], [0, 0, 1, 1], [], []>} : vector<8x128xbf16>, vector<128x512xbf16>, vector<8x512xf32> -> vector<8x512xf32>
    %249 = arith.addf %245, %248 : vector<8x512xf32>
    %c0_115 = arith.constant 0 : index
    %c0_116 = arith.constant 0 : index
    %250 = vector.load %arg7[%c0_115, %c0_116] : memref<8x128xf32, #tpu.memory_space<vmem>>, vector<8x128xf32>
    %251 = vector.extract_strided_slice %249 {offsets = [0, 0], sizes = [8, 128], strides = [1, 1]} : vector<8x512xf32> to vector<8x128xf32>
    %252 = arith.negf %251 : vector<8x128xf32>
    %253 = math.exp %252 : vector<8x128xf32>
    %cst_117 = arith.constant 1.000000e+00 : f32
    %254 = vector.broadcast %cst_117 : f32 to vector<8x128xf32>
    %255 = arith.addf %254, %253 : vector<8x128xf32>
    %256 = arith.divf %254, %255 : vector<8x128xf32>
    %257 = vector.extract_strided_slice %249 {offsets = [0, 128], sizes = [8, 128], strides = [1, 1]} : vector<8x512xf32> to vector<8x128xf32>
    %258 = arith.negf %257 : vector<8x128xf32>
    %259 = math.exp %258 : vector<8x128xf32>
    %cst_118 = arith.constant 1.000000e+00 : f32
    %260 = vector.broadcast %cst_118 : f32 to vector<8x128xf32>
    %261 = arith.addf %260, %259 : vector<8x128xf32>
    %262 = arith.divf %260, %261 : vector<8x128xf32>
    %263 = vector.extract_strided_slice %249 {offsets = [0, 256], sizes = [8, 128], strides = [1, 1]} : vector<8x512xf32> to vector<8x128xf32>
    %264 = math.tanh %263 : vector<8x128xf32>
    %265 = vector.extract_strided_slice %249 {offsets = [0, 384], sizes = [8, 128], strides = [1, 1]} : vector<8x512xf32> to vector<8x128xf32>
    %266 = arith.negf %265 : vector<8x128xf32>
    %267 = math.exp %266 : vector<8x128xf32>
    %cst_119 = arith.constant 1.000000e+00 : f32
    %268 = vector.broadcast %cst_119 : f32 to vector<8x128xf32>
    %269 = arith.addf %268, %267 : vector<8x128xf32>
    %270 = arith.divf %268, %269 : vector<8x128xf32>
    %271 = arith.mulf %262, %250 : vector<8x128xf32>
    %272 = arith.mulf %256, %264 : vector<8x128xf32>
    %273 = arith.addf %271, %272 : vector<8x128xf32>
    %274 = math.tanh %273 : vector<8x128xf32>
    %275 = arith.mulf %270, %274 : vector<8x128xf32>
    %276 = arith.truncf %275 : vector<8x128xf32> to vector<8x128xbf16>
    %c0_120 = arith.constant 0 : index
    %c0_121 = arith.constant 0 : index
    %277 = vector.load %arg6[%c0_120, %c0_121] : memref<8x128xbf16, #tpu.memory_space<vmem>>, vector<8x128xbf16>
    tpu.vector_store %arg6[%c0_120, %c0_121], %276 {strides = array<i32>} : memref<8x128xbf16, #tpu.memory_space<vmem>>, vector<8x128xbf16>,
    %c0_122 = arith.constant 0 : index
    %c0_123 = arith.constant 0 : index
    %278 = vector.load %arg7[%c0_122, %c0_123] : memref<8x128xf32, #tpu.memory_space<vmem>>, vector<8x128xf32>
    tpu.vector_store %arg7[%c0_122, %c0_123], %273 {strides = array<i32>} : memref<8x128xf32, #tpu.memory_space<vmem>>, vector<8x128xf32>,
    %279 = arith.index_cast %c6_i32 : i32 to index
    %c0_124 = arith.constant 0 : index
    %c0_125 = arith.constant 0 : index
    %280 = vector.load %arg5[%279, %c0_124, %c0_125] : memref<7x8x128xbf16, #tpu.memory_space<vmem>>, vector<1x8x128xbf16>
    %281 = vector.shape_cast %280 : vector<1x8x128xbf16> to vector<8x128xbf16>
    %282 = vector.shape_cast %276 : vector<8x128xbf16> to vector<1x8x128xbf16>
    tpu.vector_store %arg5[%279, %c0_124, %c0_125], %282 {strides = array<i32>} : memref<7x8x128xbf16, #tpu.memory_space<vmem>>, vector<1x8x128xbf16>,
    %c7_i32 = arith.constant 7 : i32
    return
  }
  func.func @transform_0(%arg0: i32, %arg1: i32) -> (i32, i32) {
    %c0_i32 = arith.constant 0 : i32
    %c0_i32_0 = arith.constant 0 : i32
    return %arg0, %c0_i32 : i32, i32
  }
  func.func @transform_1(%arg0: i32, %arg1: i32) -> (i32, i32, i32) {
    %c0_i32 = arith.constant 0 : i32
    %c0_i32_0 = arith.constant 0 : i32
    return %arg1, %arg0, %c0_i32 : i32, i32, i32
  }
  func.func @transform_2(%arg0: i32, %arg1: i32) -> (i32, i32) {
    %c0_i32 = arith.constant 0 : i32
    %c0_i32_0 = arith.constant 0 : i32
    %c0_i32_1 = arith.constant 0 : i32
    return %c0_i32, %c0_i32_0 : i32, i32
  }
  func.func @transform_3(%arg0: i32, %arg1: i32) -> (i32, i32, i32) {
    %c0_i32 = arith.constant 0 : i32
    %c0_i32_0 = arith.constant 0 : i32
    return %arg1, %arg0, %c0_i32 : i32, i32, i32
  }
}

module attributes {stable_mosaic.version = 11 : i64} {
  func.func @input_proj_kernel(%arg0: i32, %arg1: memref<56x32xbf16, #tpu.memory_space<vmem>>, %arg2: memref<32x512xbf16, #tpu.memory_space<vmem>>, %arg3: memref<1x512xf32, #tpu.memory_space<vmem>>, %arg4: memref<56x512xf32, #tpu.memory_space<vmem>>) attributes {dimension_semantics = [#tpu.dimension_semantics<parallel>], iteration_bounds = array<i64: 1>, scalar_prefetch = 0 : i64, scratch_operands = 0 : i64, tpu.core_type = #tpu.core_type<tc>, window_params = [{transform_indices = @transform_0, window_bounds = array<i64: 56, 32>}, {pipeline_mode = #tpu.pipeline_mode<synchronous>, transform_indices = @transform_1, window_bounds = array<i64: 32, 512>}, {pipeline_mode = #tpu.pipeline_mode<synchronous>, transform_indices = @transform_2, window_bounds = array<i64: 1, 512>}, {transform_indices = @transform_3, window_bounds = array<i64: 56, 512>}]} {
    %c0 = arith.constant 0 : index
    %c0_0 = arith.constant 0 : index
    %0 = vector.load %arg1[%c0, %c0_0] : memref<56x32xbf16, #tpu.memory_space<vmem>>, vector<56x32xbf16>
    %cst = arith.constant 0.000000e+00 : bf16
    %1 = vector.broadcast %cst : bf16 to vector<56x32xbf16>
    %2 = arith.maximumf %0, %1 : vector<56x32xbf16>
    %c0_1 = arith.constant 0 : index
    %c0_2 = arith.constant 0 : index
    %3 = vector.load %arg2[%c0_1, %c0_2] : memref<32x512xbf16, #tpu.memory_space<vmem>>, vector<32x512xbf16>
    %cst_3 = arith.constant dense<0.000000e+00> : vector<56x512xf32>
    %4 = tpu.matmul %2, %3, %cst_3 {dimension_numbers = #tpu.dot_dimension_numbers<[1], [0], [0], [1], [0, 0, 1, 1], [], []>} : vector<56x32xbf16>, vector<32x512xbf16>, vector<56x512xf32> -> vector<56x512xf32>
    %c0_4 = arith.constant 0 : index
    %c0_5 = arith.constant 0 : index
    %5 = vector.load %arg3[%c0_4, %c0_5] : memref<1x512xf32, #tpu.memory_space<vmem>>, vector<1x512xf32>
    %6 = vector.broadcast %5 : vector<1x512xf32> to vector<56x512xf32>
    %7 = arith.addf %4, %6 : vector<56x512xf32>
    %c0_6 = arith.constant 0 : index
    %c0_7 = arith.constant 0 : index
    %8 = vector.load %arg4[%c0_6, %c0_7] : memref<56x512xf32, #tpu.memory_space<vmem>>, vector<56x512xf32>
    tpu.vector_store %arg4[%c0_6, %c0_7], %7 {strides = array<i32>} : memref<56x512xf32, #tpu.memory_space<vmem>>, vector<56x512xf32>,
    return
  }
  func.func @transform_0(%arg0: i32) -> (i32, i32) {
    %c0_i32 = arith.constant 0 : i32
    %c0_i32_0 = arith.constant 0 : i32
    return %arg0, %c0_i32 : i32, i32
  }
  func.func @transform_1(%arg0: i32) -> (i32, i32) {
    %c0_i32 = arith.constant 0 : i32
    %c0_i32_0 = arith.constant 0 : i32
    %c0_i32_1 = arith.constant 0 : i32
    return %c0_i32, %c0_i32_0 : i32, i32
  }
  func.func @transform_2(%arg0: i32) -> (i32, i32) {
    %c0_i32 = arith.constant 0 : i32
    %c0_i32_0 = arith.constant 0 : i32
    %c0_i32_1 = arith.constant 0 : i32
    return %c0_i32, %c0_i32_0 : i32, i32
  }
  func.func @transform_3(%arg0: i32) -> (i32, i32) {
    %c0_i32 = arith.constant 0 : i32
    %c0_i32_0 = arith.constant 0 : i32
    return %arg0, %c0_i32 : i32, i32
  }
}

module attributes {stable_mosaic.version = 11 : i64} {
  func.func @lstm_recurrence_kernel(%arg0: i32, %arg1: i32, %arg2: memref<8x512xf32, #tpu.memory_space<vmem>>, %arg3: memref<7x8x512xf32, #tpu.memory_space<vmem>>, %arg4: memref<128x512xbf16, #tpu.memory_space<vmem>>, %arg5: memref<7x8x128xbf16, #tpu.memory_space<vmem>>, %arg6: memref<8x128xbf16, #tpu.memory_space<vmem>>, %arg7: memref<8x128xf32, #tpu.memory_space<vmem>>) attributes {dimension_semantics = [#tpu.dimension_semantics<parallel>, #tpu.dimension_semantics<arbitrary>], iteration_bounds = array<i64: 1, 1>, scalar_prefetch = 0 : i64, scratch_operands = 2 : i64, tpu.core_type = #tpu.core_type<tc>, window_params = [{transform_indices = @transform_0, window_bounds = array<i64: 8, 512>}, {transform_indices = @transform_1, window_bounds = array<i64: 7, 8, 512>}, {pipeline_mode = #tpu.pipeline_mode<synchronous>, transform_indices = @transform_2, window_bounds = array<i64: 128, 512>}, {transform_indices = @transform_3, window_bounds = array<i64: 7, 8, 128>}]} {
    %c0_i32 = arith.constant 0 : i32
    %0 = arith.cmpi eq, %arg1, %c0_i32 : i32
    %1 = arith.extui %0 : i1 to i32
    %c0_i32_0 = arith.constant 0 : i32
    %2 = arith.cmpi ne, %1, %c0_i32_0 : i32
    scf.if %2 {
      %c0_126 = arith.constant 0 : index
      %c0_127 = arith.constant 0 : index
      %283 = vector.load %arg2[%c0_126, %c0_127] : memref<8x512xf32, #tpu.memory_space<vmem>>, vector<8x512xf32>
      %cst_128 = arith.constant 0.000000e+00 : f32
      %284 = vector.broadcast %cst_128 : f32 to vector<8x128xf32>
      %285 = vector.extract_strided_slice %283 {offsets = [0, 0], sizes = [8, 128], strides = [1, 1]} : vector<8x512xf32> to vector<8x128xf32>
      %286 = arith.negf %285 : vector<8x128xf32>
      %287 = math.exp %286 : vector<8x128xf32>
      %cst_129 = arith.constant 1.000000e+00 : f32
      %288 = vector.broadcast %cst_129 : f32 to vector<8x128xf32>
      %289 = arith.addf %288, %287 : vector<8x128xf32>
      %290 = arith.divf %288, %289 : vector<8x128xf32>
      %291 = vector.extract_strided_slice %283 {offsets = [0, 128], sizes = [8, 128], strides = [1, 1]} : vector<8x512xf32> to vector<8x128xf32>
      %292 = arith.negf %291 : vector<8x128xf32>
      %293 = math.exp %292 : vector<8x128xf32>
      %cst_130 = arith.constant 1.000000e+00 : f32
      %294 = vector.broadcast %cst_130 : f32 to vector<8x128xf32>
      %295 = arith.addf %294, %293 : vector<8x128xf32>
      %296 = arith.divf %294, %295 : vector<8x128xf32>
      %297 = vector.extract_strided_slice %283 {offsets = [0, 256], sizes = [8, 128], strides = [1, 1]} : vector<8x512xf32> to vector<8x128xf32>
      %298 = math.tanh %297 : vector<8x128xf32>
      %299 = vector.extract_strided_slice %283 {offsets = [0, 384], sizes = [8, 128], strides = [1, 1]} : vector<8x512xf32> to vector<8x128xf32>
      %300 = arith.negf %299 : vector<8x128xf32>
      %301 = math.exp %300 : vector<8x128xf32>
      %cst_131 = arith.constant 1.000000e+00 : f32
      %302 = vector.broadcast %cst_131 : f32 to vector<8x128xf32>
      %303 = arith.addf %302, %301 : vector<8x128xf32>
      %304 = arith.divf %302, %303 : vector<8x128xf32>
      %305 = arith.mulf %296, %284 : vector<8x128xf32>
      %306 = arith.mulf %290, %298 : vector<8x128xf32>
      %307 = arith.addf %305, %306 : vector<8x128xf32>
      %308 = math.tanh %307 : vector<8x128xf32>
      %309 = arith.mulf %304, %308 : vector<8x128xf32>
      %310 = arith.truncf %309 : vector<8x128xf32> to vector<8x128xbf16>
      %c0_132 = arith.constant 0 : index
      %c0_133 = arith.constant 0 : index
      %311 = vector.load %arg6[%c0_132, %c0_133] : memref<8x128xbf16, #tpu.memory_space<vmem>>, vector<8x128xbf16>
      tpu.vector_store %arg6[%c0_132, %c0_133], %310 {strides = array<i32>} : memref<8x128xbf16, #tpu.memory_space<vmem>>, vector<8x128xbf16>,
      %c0_134 = arith.constant 0 : index
      %c0_135 = arith.constant 0 : index
      %312 = vector.load %arg7[%c0_134, %c0_135] : memref<8x128xf32, #tpu.memory_space<vmem>>, vector<8x128xf32>
      tpu.vector_store %arg7[%c0_134, %c0_135], %307 {strides = array<i32>} : memref<8x128xf32, #tpu.memory_space<vmem>>, vector<8x128xf32>,
    } else {
    }
    %c0_i32_1 = arith.constant 0 : i32
    %3 = arith.index_cast %c0_i32_1 : i32 to index
    %c0 = arith.constant 0 : index
    %c0_2 = arith.constant 0 : index
    %4 = vector.load %arg3[%3, %c0, %c0_2] : memref<7x8x512xf32, #tpu.memory_space<vmem>>, vector<1x8x512xf32>
    %5 = vector.shape_cast %4 : vector<1x8x512xf32> to vector<8x512xf32>
    %c0_3 = arith.constant 0 : index
    %c0_4 = arith.constant 0 : index
    %6 = vector.load %arg6[%c0_3, %c0_4] : memref<8x128xbf16, #tpu.memory_space<vmem>>, vector<8x128xbf16>
    %c0_5 = arith.constant 0 : index
    %c0_6 = arith.constant 0 : index
    %7 = vector.load %arg4[%c0_5, %c0_6] : memref<128x512xbf16, #tpu.memory_space<vmem>>, vector<128x512xbf16>
    %cst = arith.constant dense<0.000000e+00> : vector<8x512xf32>
    %8 = tpu.matmul %6, %7, %cst {dimension_numbers = #tpu.dot_dimension_numbers<[1], [0], [0], [1], [0, 0, 1, 1], [], []>} : vector<8x128xbf16>, vector<128x512xbf16>, vector<8x512xf32> -> vector<8x512xf32>
    %9 = arith.addf %5, %8 : vector<8x512xf32>
    %c0_7 = arith.constant 0 : index
    %c0_8 = arith.constant 0 : index
    %10 = vector.load %arg7[%c0_7, %c0_8] : memref<8x128xf32, #tpu.memory_space<vmem>>, vector<8x128xf32>
    %11 = vector.extract_strided_slice %9 {offsets = [0, 0], sizes = [8, 128], strides = [1, 1]} : vector<8x512xf32> to vector<8x128xf32>
    %12 = arith.negf %11 : vector<8x128xf32>
    %13 = math.exp %12 : vector<8x128xf32>
    %cst_9 = arith.constant 1.000000e+00 : f32
    %14 = vector.broadcast %cst_9 : f32 to vector<8x128xf32>
    %15 = arith.addf %14, %13 : vector<8x128xf32>
    %16 = arith.divf %14, %15 : vector<8x128xf32>
    %17 = vector.extract_strided_slice %9 {offsets = [0, 128], sizes = [8, 128], strides = [1, 1]} : vector<8x512xf32> to vector<8x128xf32>
    %18 = arith.negf %17 : vector<8x128xf32>
    %19 = math.exp %18 : vector<8x128xf32>
    %cst_10 = arith.constant 1.000000e+00 : f32
    %20 = vector.broadcast %cst_10 : f32 to vector<8x128xf32>
    %21 = arith.addf %20, %19 : vector<8x128xf32>
    %22 = arith.divf %20, %21 : vector<8x128xf32>
    %23 = vector.extract_strided_slice %9 {offsets = [0, 256], sizes = [8, 128], strides = [1, 1]} : vector<8x512xf32> to vector<8x128xf32>
    %24 = math.tanh %23 : vector<8x128xf32>
    %25 = vector.extract_strided_slice %9 {offsets = [0, 384], sizes = [8, 128], strides = [1, 1]} : vector<8x512xf32> to vector<8x128xf32>
    %26 = arith.negf %25 : vector<8x128xf32>
    %27 = math.exp %26 : vector<8x128xf32>
    %cst_11 = arith.constant 1.000000e+00 : f32
    %28 = vector.broadcast %cst_11 : f32 to vector<8x128xf32>
    %29 = arith.addf %28, %27 : vector<8x128xf32>
    %30 = arith.divf %28, %29 : vector<8x128xf32>
    %31 = arith.mulf %22, %10 : vector<8x128xf32>
    %32 = arith.mulf %16, %24 : vector<8x128xf32>
    %33 = arith.addf %31, %32 : vector<8x128xf32>
    %34 = math.tanh %33 : vector<8x128xf32>
    %35 = arith.mulf %30, %34 : vector<8x128xf32>
    %36 = arith.truncf %35 : vector<8x128xf32> to vector<8x128xbf16>
    %c0_12 = arith.constant 0 : index
    %c0_13 = arith.constant 0 : index
    %37 = vector.load %arg6[%c0_12, %c0_13] : memref<8x128xbf16, #tpu.memory_space<vmem>>, vector<8x128xbf16>
    tpu.vector_store %arg6[%c0_12, %c0_13], %36 {strides = array<i32>} : memref<8x128xbf16, #tpu.memory_space<vmem>>, vector<8x128xbf16>,
    %c0_14 = arith.constant 0 : index
    %c0_15 = arith.constant 0 : index
    %38 = vector.load %arg7[%c0_14, %c0_15] : memref<8x128xf32, #tpu.memory_space<vmem>>, vector<8x128xf32>
    tpu.vector_store %arg7[%c0_14, %c0_15], %33 {strides = array<i32>} : memref<8x128xf32, #tpu.memory_space<vmem>>, vector<8x128xf32>,
    %39 = arith.index_cast %c0_i32_1 : i32 to index
    %c0_16 = arith.constant 0 : index
    %c0_17 = arith.constant 0 : index
    %40 = vector.load %arg5[%39, %c0_16, %c0_17] : memref<7x8x128xbf16, #tpu.memory_space<vmem>>, vector<1x8x128xbf16>
    %41 = vector.shape_cast %40 : vector<1x8x128xbf16> to vector<8x128xbf16>
    %42 = vector.shape_cast %36 : vector<8x128xbf16> to vector<1x8x128xbf16>
    tpu.vector_store %arg5[%39, %c0_16, %c0_17], %42 {strides = array<i32>} : memref<7x8x128xbf16, #tpu.memory_space<vmem>>, vector<1x8x128xbf16>,
    %c1_i32 = arith.constant 1 : i32
    %43 = arith.index_cast %c1_i32 : i32 to index
    %c0_18 = arith.constant 0 : index
    %c0_19 = arith.constant 0 : index
    %44 = vector.load %arg3[%43, %c0_18, %c0_19] : memref<7x8x512xf32, #tpu.memory_space<vmem>>, vector<1x8x512xf32>
    %45 = vector.shape_cast %44 : vector<1x8x512xf32> to vector<8x512xf32>
    %c0_20 = arith.constant 0 : index
    %c0_21 = arith.constant 0 : index
    %46 = vector.load %arg6[%c0_20, %c0_21] : memref<8x128xbf16, #tpu.memory_space<vmem>>, vector<8x128xbf16>
    %c0_22 = arith.constant 0 : index
    %c0_23 = arith.constant 0 : index
    %47 = vector.load %arg4[%c0_22, %c0_23] : memref<128x512xbf16, #tpu.memory_space<vmem>>, vector<128x512xbf16>
    %cst_24 = arith.constant dense<0.000000e+00> : vector<8x512xf32>
    %48 = tpu.matmul %46, %47, %cst_24 {dimension_numbers = #tpu.dot_dimension_numbers<[1], [0], [0], [1], [0, 0, 1, 1], [], []>} : vector<8x128xbf16>, vector<128x512xbf16>, vector<8x512xf32> -> vector<8x512xf32>
    %49 = arith.addf %45, %48 : vector<8x512xf32>
    %c0_25 = arith.constant 0 : index
    %c0_26 = arith.constant 0 : index
    %50 = vector.load %arg7[%c0_25, %c0_26] : memref<8x128xf32, #tpu.memory_space<vmem>>, vector<8x128xf32>
    %51 = vector.extract_strided_slice %49 {offsets = [0, 0], sizes = [8, 128], strides = [1, 1]} : vector<8x512xf32> to vector<8x128xf32>
    %52 = arith.negf %51 : vector<8x128xf32>
    %53 = math.exp %52 : vector<8x128xf32>
    %cst_27 = arith.constant 1.000000e+00 : f32
    %54 = vector.broadcast %cst_27 : f32 to vector<8x128xf32>
    %55 = arith.addf %54, %53 : vector<8x128xf32>
    %56 = arith.divf %54, %55 : vector<8x128xf32>
    %57 = vector.extract_strided_slice %49 {offsets = [0, 128], sizes = [8, 128], strides = [1, 1]} : vector<8x512xf32> to vector<8x128xf32>
    %58 = arith.negf %57 : vector<8x128xf32>
    %59 = math.exp %58 : vector<8x128xf32>
    %cst_28 = arith.constant 1.000000e+00 : f32
    %60 = vector.broadcast %cst_28 : f32 to vector<8x128xf32>
    %61 = arith.addf %60, %59 : vector<8x128xf32>
    %62 = arith.divf %60, %61 : vector<8x128xf32>
    %63 = vector.extract_strided_slice %49 {offsets = [0, 256], sizes = [8, 128], strides = [1, 1]} : vector<8x512xf32> to vector<8x128xf32>
    %64 = math.tanh %63 : vector<8x128xf32>
    %65 = vector.extract_strided_slice %49 {offsets = [0, 384], sizes = [8, 128], strides = [1, 1]} : vector<8x512xf32> to vector<8x128xf32>
    %66 = arith.negf %65 : vector<8x128xf32>
    %67 = math.exp %66 : vector<8x128xf32>
    %cst_29 = arith.constant 1.000000e+00 : f32
    %68 = vector.broadcast %cst_29 : f32 to vector<8x128xf32>
    %69 = arith.addf %68, %67 : vector<8x128xf32>
    %70 = arith.divf %68, %69 : vector<8x128xf32>
    %71 = arith.mulf %62, %50 : vector<8x128xf32>
    %72 = arith.mulf %56, %64 : vector<8x128xf32>
    %73 = arith.addf %71, %72 : vector<8x128xf32>
    %74 = math.tanh %73 : vector<8x128xf32>
    %75 = arith.mulf %70, %74 : vector<8x128xf32>
    %76 = arith.truncf %75 : vector<8x128xf32> to vector<8x128xbf16>
    %c0_30 = arith.constant 0 : index
    %c0_31 = arith.constant 0 : index
    %77 = vector.load %arg6[%c0_30, %c0_31] : memref<8x128xbf16, #tpu.memory_space<vmem>>, vector<8x128xbf16>
    tpu.vector_store %arg6[%c0_30, %c0_31], %76 {strides = array<i32>} : memref<8x128xbf16, #tpu.memory_space<vmem>>, vector<8x128xbf16>,
    %c0_32 = arith.constant 0 : index
    %c0_33 = arith.constant 0 : index
    %78 = vector.load %arg7[%c0_32, %c0_33] : memref<8x128xf32, #tpu.memory_space<vmem>>, vector<8x128xf32>
    tpu.vector_store %arg7[%c0_32, %c0_33], %73 {strides = array<i32>} : memref<8x128xf32, #tpu.memory_space<vmem>>, vector<8x128xf32>,
    %79 = arith.index_cast %c1_i32 : i32 to index
    %c0_34 = arith.constant 0 : index
    %c0_35 = arith.constant 0 : index
    %80 = vector.load %arg5[%79, %c0_34, %c0_35] : memref<7x8x128xbf16, #tpu.memory_space<vmem>>, vector<1x8x128xbf16>
    %81 = vector.shape_cast %80 : vector<1x8x128xbf16> to vector<8x128xbf16>
    %82 = vector.shape_cast %76 : vector<8x128xbf16> to vector<1x8x128xbf16>
    tpu.vector_store %arg5[%79, %c0_34, %c0_35], %82 {strides = array<i32>} : memref<7x8x128xbf16, #tpu.memory_space<vmem>>, vector<1x8x128xbf16>,
    %c2_i32 = arith.constant 2 : i32
    %83 = arith.index_cast %c2_i32 : i32 to index
    %c0_36 = arith.constant 0 : index
    %c0_37 = arith.constant 0 : index
    %84 = vector.load %arg3[%83, %c0_36, %c0_37] : memref<7x8x512xf32, #tpu.memory_space<vmem>>, vector<1x8x512xf32>
    %85 = vector.shape_cast %84 : vector<1x8x512xf32> to vector<8x512xf32>
    %c0_38 = arith.constant 0 : index
    %c0_39 = arith.constant 0 : index
    %86 = vector.load %arg6[%c0_38, %c0_39] : memref<8x128xbf16, #tpu.memory_space<vmem>>, vector<8x128xbf16>
    %c0_40 = arith.constant 0 : index
    %c0_41 = arith.constant 0 : index
    %87 = vector.load %arg4[%c0_40, %c0_41] : memref<128x512xbf16, #tpu.memory_space<vmem>>, vector<128x512xbf16>
    %cst_42 = arith.constant dense<0.000000e+00> : vector<8x512xf32>
    %88 = tpu.matmul %86, %87, %cst_42 {dimension_numbers = #tpu.dot_dimension_numbers<[1], [0], [0], [1], [0, 0, 1, 1], [], []>} : vector<8x128xbf16>, vector<128x512xbf16>, vector<8x512xf32> -> vector<8x512xf32>
    %89 = arith.addf %85, %88 : vector<8x512xf32>
    %c0_43 = arith.constant 0 : index
    %c0_44 = arith.constant 0 : index
    %90 = vector.load %arg7[%c0_43, %c0_44] : memref<8x128xf32, #tpu.memory_space<vmem>>, vector<8x128xf32>
    %91 = vector.extract_strided_slice %89 {offsets = [0, 0], sizes = [8, 128], strides = [1, 1]} : vector<8x512xf32> to vector<8x128xf32>
    %92 = arith.negf %91 : vector<8x128xf32>
    %93 = math.exp %92 : vector<8x128xf32>
    %cst_45 = arith.constant 1.000000e+00 : f32
    %94 = vector.broadcast %cst_45 : f32 to vector<8x128xf32>
    %95 = arith.addf %94, %93 : vector<8x128xf32>
    %96 = arith.divf %94, %95 : vector<8x128xf32>
    %97 = vector.extract_strided_slice %89 {offsets = [0, 128], sizes = [8, 128], strides = [1, 1]} : vector<8x512xf32> to vector<8x128xf32>
    %98 = arith.negf %97 : vector<8x128xf32>
    %99 = math.exp %98 : vector<8x128xf32>
    %cst_46 = arith.constant 1.000000e+00 : f32
    %100 = vector.broadcast %cst_46 : f32 to vector<8x128xf32>
    %101 = arith.addf %100, %99 : vector<8x128xf32>
    %102 = arith.divf %100, %101 : vector<8x128xf32>
    %103 = vector.extract_strided_slice %89 {offsets = [0, 256], sizes = [8, 128], strides = [1, 1]} : vector<8x512xf32> to vector<8x128xf32>
    %104 = math.tanh %103 : vector<8x128xf32>
    %105 = vector.extract_strided_slice %89 {offsets = [0, 384], sizes = [8, 128], strides = [1, 1]} : vector<8x512xf32> to vector<8x128xf32>
    %106 = arith.negf %105 : vector<8x128xf32>
    %107 = math.exp %106 : vector<8x128xf32>
    %cst_47 = arith.constant 1.000000e+00 : f32
    %108 = vector.broadcast %cst_47 : f32 to vector<8x128xf32>
    %109 = arith.addf %108, %107 : vector<8x128xf32>
    %110 = arith.divf %108, %109 : vector<8x128xf32>
    %111 = arith.mulf %102, %90 : vector<8x128xf32>
    %112 = arith.mulf %96, %104 : vector<8x128xf32>
    %113 = arith.addf %111, %112 : vector<8x128xf32>
    %114 = math.tanh %113 : vector<8x128xf32>
    %115 = arith.mulf %110, %114 : vector<8x128xf32>
    %116 = arith.truncf %115 : vector<8x128xf32> to vector<8x128xbf16>
    %c0_48 = arith.constant 0 : index
    %c0_49 = arith.constant 0 : index
    %117 = vector.load %arg6[%c0_48, %c0_49] : memref<8x128xbf16, #tpu.memory_space<vmem>>, vector<8x128xbf16>
    tpu.vector_store %arg6[%c0_48, %c0_49], %116 {strides = array<i32>} : memref<8x128xbf16, #tpu.memory_space<vmem>>, vector<8x128xbf16>,
    %c0_50 = arith.constant 0 : index
    %c0_51 = arith.constant 0 : index
    %118 = vector.load %arg7[%c0_50, %c0_51] : memref<8x128xf32, #tpu.memory_space<vmem>>, vector<8x128xf32>
    tpu.vector_store %arg7[%c0_50, %c0_51], %113 {strides = array<i32>} : memref<8x128xf32, #tpu.memory_space<vmem>>, vector<8x128xf32>,
    %119 = arith.index_cast %c2_i32 : i32 to index
    %c0_52 = arith.constant 0 : index
    %c0_53 = arith.constant 0 : index
    %120 = vector.load %arg5[%119, %c0_52, %c0_53] : memref<7x8x128xbf16, #tpu.memory_space<vmem>>, vector<1x8x128xbf16>
    %121 = vector.shape_cast %120 : vector<1x8x128xbf16> to vector<8x128xbf16>
    %122 = vector.shape_cast %116 : vector<8x128xbf16> to vector<1x8x128xbf16>
    tpu.vector_store %arg5[%119, %c0_52, %c0_53], %122 {strides = array<i32>} : memref<7x8x128xbf16, #tpu.memory_space<vmem>>, vector<1x8x128xbf16>,
    %c3_i32 = arith.constant 3 : i32
    %123 = arith.index_cast %c3_i32 : i32 to index
    %c0_54 = arith.constant 0 : index
    %c0_55 = arith.constant 0 : index
    %124 = vector.load %arg3[%123, %c0_54, %c0_55] : memref<7x8x512xf32, #tpu.memory_space<vmem>>, vector<1x8x512xf32>
    %125 = vector.shape_cast %124 : vector<1x8x512xf32> to vector<8x512xf32>
    %c0_56 = arith.constant 0 : index
    %c0_57 = arith.constant 0 : index
    %126 = vector.load %arg6[%c0_56, %c0_57] : memref<8x128xbf16, #tpu.memory_space<vmem>>, vector<8x128xbf16>
    %c0_58 = arith.constant 0 : index
    %c0_59 = arith.constant 0 : index
    %127 = vector.load %arg4[%c0_58, %c0_59] : memref<128x512xbf16, #tpu.memory_space<vmem>>, vector<128x512xbf16>
    %cst_60 = arith.constant dense<0.000000e+00> : vector<8x512xf32>
    %128 = tpu.matmul %126, %127, %cst_60 {dimension_numbers = #tpu.dot_dimension_numbers<[1], [0], [0], [1], [0, 0, 1, 1], [], []>} : vector<8x128xbf16>, vector<128x512xbf16>, vector<8x512xf32> -> vector<8x512xf32>
    %129 = arith.addf %125, %128 : vector<8x512xf32>
    %c0_61 = arith.constant 0 : index
    %c0_62 = arith.constant 0 : index
    %130 = vector.load %arg7[%c0_61, %c0_62] : memref<8x128xf32, #tpu.memory_space<vmem>>, vector<8x128xf32>
    %131 = vector.extract_strided_slice %129 {offsets = [0, 0], sizes = [8, 128], strides = [1, 1]} : vector<8x512xf32> to vector<8x128xf32>
    %132 = arith.negf %131 : vector<8x128xf32>
    %133 = math.exp %132 : vector<8x128xf32>
    %cst_63 = arith.constant 1.000000e+00 : f32
    %134 = vector.broadcast %cst_63 : f32 to vector<8x128xf32>
    %135 = arith.addf %134, %133 : vector<8x128xf32>
    %136 = arith.divf %134, %135 : vector<8x128xf32>
    %137 = vector.extract_strided_slice %129 {offsets = [0, 128], sizes = [8, 128], strides = [1, 1]} : vector<8x512xf32> to vector<8x128xf32>
    %138 = arith.negf %137 : vector<8x128xf32>
    %139 = math.exp %138 : vector<8x128xf32>
    %cst_64 = arith.constant 1.000000e+00 : f32
    %140 = vector.broadcast %cst_64 : f32 to vector<8x128xf32>
    %141 = arith.addf %140, %139 : vector<8x128xf32>
    %142 = arith.divf %140, %141 : vector<8x128xf32>
    %143 = vector.extract_strided_slice %129 {offsets = [0, 256], sizes = [8, 128], strides = [1, 1]} : vector<8x512xf32> to vector<8x128xf32>
    %144 = math.tanh %143 : vector<8x128xf32>
    %145 = vector.extract_strided_slice %129 {offsets = [0, 384], sizes = [8, 128], strides = [1, 1]} : vector<8x512xf32> to vector<8x128xf32>
    %146 = arith.negf %145 : vector<8x128xf32>
    %147 = math.exp %146 : vector<8x128xf32>
    %cst_65 = arith.constant 1.000000e+00 : f32
    %148 = vector.broadcast %cst_65 : f32 to vector<8x128xf32>
    %149 = arith.addf %148, %147 : vector<8x128xf32>
    %150 = arith.divf %148, %149 : vector<8x128xf32>
    %151 = arith.mulf %142, %130 : vector<8x128xf32>
    %152 = arith.mulf %136, %144 : vector<8x128xf32>
    %153 = arith.addf %151, %152 : vector<8x128xf32>
    %154 = math.tanh %153 : vector<8x128xf32>
    %155 = arith.mulf %150, %154 : vector<8x128xf32>
    %156 = arith.truncf %155 : vector<8x128xf32> to vector<8x128xbf16>
    %c0_66 = arith.constant 0 : index
    %c0_67 = arith.constant 0 : index
    %157 = vector.load %arg6[%c0_66, %c0_67] : memref<8x128xbf16, #tpu.memory_space<vmem>>, vector<8x128xbf16>
    tpu.vector_store %arg6[%c0_66, %c0_67], %156 {strides = array<i32>} : memref<8x128xbf16, #tpu.memory_space<vmem>>, vector<8x128xbf16>,
    %c0_68 = arith.constant 0 : index
    %c0_69 = arith.constant 0 : index
    %158 = vector.load %arg7[%c0_68, %c0_69] : memref<8x128xf32, #tpu.memory_space<vmem>>, vector<8x128xf32>
    tpu.vector_store %arg7[%c0_68, %c0_69], %153 {strides = array<i32>} : memref<8x128xf32, #tpu.memory_space<vmem>>, vector<8x128xf32>,
    %159 = arith.index_cast %c3_i32 : i32 to index
    %c0_70 = arith.constant 0 : index
    %c0_71 = arith.constant 0 : index
    %160 = vector.load %arg5[%159, %c0_70, %c0_71] : memref<7x8x128xbf16, #tpu.memory_space<vmem>>, vector<1x8x128xbf16>
    %161 = vector.shape_cast %160 : vector<1x8x128xbf16> to vector<8x128xbf16>
    %162 = vector.shape_cast %156 : vector<8x128xbf16> to vector<1x8x128xbf16>
    tpu.vector_store %arg5[%159, %c0_70, %c0_71], %162 {strides = array<i32>} : memref<7x8x128xbf16, #tpu.memory_space<vmem>>, vector<1x8x128xbf16>,
    %c4_i32 = arith.constant 4 : i32
    %163 = arith.index_cast %c4_i32 : i32 to index
    %c0_72 = arith.constant 0 : index
    %c0_73 = arith.constant 0 : index
    %164 = vector.load %arg3[%163, %c0_72, %c0_73] : memref<7x8x512xf32, #tpu.memory_space<vmem>>, vector<1x8x512xf32>
    %165 = vector.shape_cast %164 : vector<1x8x512xf32> to vector<8x512xf32>
    %c0_74 = arith.constant 0 : index
    %c0_75 = arith.constant 0 : index
    %166 = vector.load %arg6[%c0_74, %c0_75] : memref<8x128xbf16, #tpu.memory_space<vmem>>, vector<8x128xbf16>
    %c0_76 = arith.constant 0 : index
    %c0_77 = arith.constant 0 : index
    %167 = vector.load %arg4[%c0_76, %c0_77] : memref<128x512xbf16, #tpu.memory_space<vmem>>, vector<128x512xbf16>
    %cst_78 = arith.constant dense<0.000000e+00> : vector<8x512xf32>
    %168 = tpu.matmul %166, %167, %cst_78 {dimension_numbers = #tpu.dot_dimension_numbers<[1], [0], [0], [1], [0, 0, 1, 1], [], []>} : vector<8x128xbf16>, vector<128x512xbf16>, vector<8x512xf32> -> vector<8x512xf32>
    %169 = arith.addf %165, %168 : vector<8x512xf32>
    %c0_79 = arith.constant 0 : index
    %c0_80 = arith.constant 0 : index
    %170 = vector.load %arg7[%c0_79, %c0_80] : memref<8x128xf32, #tpu.memory_space<vmem>>, vector<8x128xf32>
    %171 = vector.extract_strided_slice %169 {offsets = [0, 0], sizes = [8, 128], strides = [1, 1]} : vector<8x512xf32> to vector<8x128xf32>
    %172 = arith.negf %171 : vector<8x128xf32>
    %173 = math.exp %172 : vector<8x128xf32>
    %cst_81 = arith.constant 1.000000e+00 : f32
    %174 = vector.broadcast %cst_81 : f32 to vector<8x128xf32>
    %175 = arith.addf %174, %173 : vector<8x128xf32>
    %176 = arith.divf %174, %175 : vector<8x128xf32>
    %177 = vector.extract_strided_slice %169 {offsets = [0, 128], sizes = [8, 128], strides = [1, 1]} : vector<8x512xf32> to vector<8x128xf32>
    %178 = arith.negf %177 : vector<8x128xf32>
    %179 = math.exp %178 : vector<8x128xf32>
    %cst_82 = arith.constant 1.000000e+00 : f32
    %180 = vector.broadcast %cst_82 : f32 to vector<8x128xf32>
    %181 = arith.addf %180, %179 : vector<8x128xf32>
    %182 = arith.divf %180, %181 : vector<8x128xf32>
    %183 = vector.extract_strided_slice %169 {offsets = [0, 256], sizes = [8, 128], strides = [1, 1]} : vector<8x512xf32> to vector<8x128xf32>
    %184 = math.tanh %183 : vector<8x128xf32>
    %185 = vector.extract_strided_slice %169 {offsets = [0, 384], sizes = [8, 128], strides = [1, 1]} : vector<8x512xf32> to vector<8x128xf32>
    %186 = arith.negf %185 : vector<8x128xf32>
    %187 = math.exp %186 : vector<8x128xf32>
    %cst_83 = arith.constant 1.000000e+00 : f32
    %188 = vector.broadcast %cst_83 : f32 to vector<8x128xf32>
    %189 = arith.addf %188, %187 : vector<8x128xf32>
    %190 = arith.divf %188, %189 : vector<8x128xf32>
    %191 = arith.mulf %182, %170 : vector<8x128xf32>
    %192 = arith.mulf %176, %184 : vector<8x128xf32>
    %193 = arith.addf %191, %192 : vector<8x128xf32>
    %194 = math.tanh %193 : vector<8x128xf32>
    %195 = arith.mulf %190, %194 : vector<8x128xf32>
    %196 = arith.truncf %195 : vector<8x128xf32> to vector<8x128xbf16>
    %c0_84 = arith.constant 0 : index
    %c0_85 = arith.constant 0 : index
    %197 = vector.load %arg6[%c0_84, %c0_85] : memref<8x128xbf16, #tpu.memory_space<vmem>>, vector<8x128xbf16>
    tpu.vector_store %arg6[%c0_84, %c0_85], %196 {strides = array<i32>} : memref<8x128xbf16, #tpu.memory_space<vmem>>, vector<8x128xbf16>,
    %c0_86 = arith.constant 0 : index
    %c0_87 = arith.constant 0 : index
    %198 = vector.load %arg7[%c0_86, %c0_87] : memref<8x128xf32, #tpu.memory_space<vmem>>, vector<8x128xf32>
    tpu.vector_store %arg7[%c0_86, %c0_87], %193 {strides = array<i32>} : memref<8x128xf32, #tpu.memory_space<vmem>>, vector<8x128xf32>,
    %199 = arith.index_cast %c4_i32 : i32 to index
    %c0_88 = arith.constant 0 : index
    %c0_89 = arith.constant 0 : index
    %200 = vector.load %arg5[%199, %c0_88, %c0_89] : memref<7x8x128xbf16, #tpu.memory_space<vmem>>, vector<1x8x128xbf16>
    %201 = vector.shape_cast %200 : vector<1x8x128xbf16> to vector<8x128xbf16>
    %202 = vector.shape_cast %196 : vector<8x128xbf16> to vector<1x8x128xbf16>
    tpu.vector_store %arg5[%199, %c0_88, %c0_89], %202 {strides = array<i32>} : memref<7x8x128xbf16, #tpu.memory_space<vmem>>, vector<1x8x128xbf16>,
    %c5_i32 = arith.constant 5 : i32
    %203 = arith.index_cast %c5_i32 : i32 to index
    %c0_90 = arith.constant 0 : index
    %c0_91 = arith.constant 0 : index
    %204 = vector.load %arg3[%203, %c0_90, %c0_91] : memref<7x8x512xf32, #tpu.memory_space<vmem>>, vector<1x8x512xf32>
    %205 = vector.shape_cast %204 : vector<1x8x512xf32> to vector<8x512xf32>
    %c0_92 = arith.constant 0 : index
    %c0_93 = arith.constant 0 : index
    %206 = vector.load %arg6[%c0_92, %c0_93] : memref<8x128xbf16, #tpu.memory_space<vmem>>, vector<8x128xbf16>
    %c0_94 = arith.constant 0 : index
    %c0_95 = arith.constant 0 : index
    %207 = vector.load %arg4[%c0_94, %c0_95] : memref<128x512xbf16, #tpu.memory_space<vmem>>, vector<128x512xbf16>
    %cst_96 = arith.constant dense<0.000000e+00> : vector<8x512xf32>
    %208 = tpu.matmul %206, %207, %cst_96 {dimension_numbers = #tpu.dot_dimension_numbers<[1], [0], [0], [1], [0, 0, 1, 1], [], []>} : vector<8x128xbf16>, vector<128x512xbf16>, vector<8x512xf32> -> vector<8x512xf32>
    %209 = arith.addf %205, %208 : vector<8x512xf32>
    %c0_97 = arith.constant 0 : index
    %c0_98 = arith.constant 0 : index
    %210 = vector.load %arg7[%c0_97, %c0_98] : memref<8x128xf32, #tpu.memory_space<vmem>>, vector<8x128xf32>
    %211 = vector.extract_strided_slice %209 {offsets = [0, 0], sizes = [8, 128], strides = [1, 1]} : vector<8x512xf32> to vector<8x128xf32>
    %212 = arith.negf %211 : vector<8x128xf32>
    %213 = math.exp %212 : vector<8x128xf32>
    %cst_99 = arith.constant 1.000000e+00 : f32
    %214 = vector.broadcast %cst_99 : f32 to vector<8x128xf32>
    %215 = arith.addf %214, %213 : vector<8x128xf32>
    %216 = arith.divf %214, %215 : vector<8x128xf32>
    %217 = vector.extract_strided_slice %209 {offsets = [0, 128], sizes = [8, 128], strides = [1, 1]} : vector<8x512xf32> to vector<8x128xf32>
    %218 = arith.negf %217 : vector<8x128xf32>
    %219 = math.exp %218 : vector<8x128xf32>
    %cst_100 = arith.constant 1.000000e+00 : f32
    %220 = vector.broadcast %cst_100 : f32 to vector<8x128xf32>
    %221 = arith.addf %220, %219 : vector<8x128xf32>
    %222 = arith.divf %220, %221 : vector<8x128xf32>
    %223 = vector.extract_strided_slice %209 {offsets = [0, 256], sizes = [8, 128], strides = [1, 1]} : vector<8x512xf32> to vector<8x128xf32>
    %224 = math.tanh %223 : vector<8x128xf32>
    %225 = vector.extract_strided_slice %209 {offsets = [0, 384], sizes = [8, 128], strides = [1, 1]} : vector<8x512xf32> to vector<8x128xf32>
    %226 = arith.negf %225 : vector<8x128xf32>
    %227 = math.exp %226 : vector<8x128xf32>
    %cst_101 = arith.constant 1.000000e+00 : f32
    %228 = vector.broadcast %cst_101 : f32 to vector<8x128xf32>
    %229 = arith.addf %228, %227 : vector<8x128xf32>
    %230 = arith.divf %228, %229 : vector<8x128xf32>
    %231 = arith.mulf %222, %210 : vector<8x128xf32>
    %232 = arith.mulf %216, %224 : vector<8x128xf32>
    %233 = arith.addf %231, %232 : vector<8x128xf32>
    %234 = math.tanh %233 : vector<8x128xf32>
    %235 = arith.mulf %230, %234 : vector<8x128xf32>
    %236 = arith.truncf %235 : vector<8x128xf32> to vector<8x128xbf16>
    %c0_102 = arith.constant 0 : index
    %c0_103 = arith.constant 0 : index
    %237 = vector.load %arg6[%c0_102, %c0_103] : memref<8x128xbf16, #tpu.memory_space<vmem>>, vector<8x128xbf16>
    tpu.vector_store %arg6[%c0_102, %c0_103], %236 {strides = array<i32>} : memref<8x128xbf16, #tpu.memory_space<vmem>>, vector<8x128xbf16>,
    %c0_104 = arith.constant 0 : index
    %c0_105 = arith.constant 0 : index
    %238 = vector.load %arg7[%c0_104, %c0_105] : memref<8x128xf32, #tpu.memory_space<vmem>>, vector<8x128xf32>
    tpu.vector_store %arg7[%c0_104, %c0_105], %233 {strides = array<i32>} : memref<8x128xf32, #tpu.memory_space<vmem>>, vector<8x128xf32>,
    %239 = arith.index_cast %c5_i32 : i32 to index
    %c0_106 = arith.constant 0 : index
    %c0_107 = arith.constant 0 : index
    %240 = vector.load %arg5[%239, %c0_106, %c0_107] : memref<7x8x128xbf16, #tpu.memory_space<vmem>>, vector<1x8x128xbf16>
    %241 = vector.shape_cast %240 : vector<1x8x128xbf16> to vector<8x128xbf16>
    %242 = vector.shape_cast %236 : vector<8x128xbf16> to vector<1x8x128xbf16>
    tpu.vector_store %arg5[%239, %c0_106, %c0_107], %242 {strides = array<i32>} : memref<7x8x128xbf16, #tpu.memory_space<vmem>>, vector<1x8x128xbf16>,
    %c6_i32 = arith.constant 6 : i32
    %243 = arith.index_cast %c6_i32 : i32 to index
    %c0_108 = arith.constant 0 : index
    %c0_109 = arith.constant 0 : index
    %244 = vector.load %arg3[%243, %c0_108, %c0_109] : memref<7x8x512xf32, #tpu.memory_space<vmem>>, vector<1x8x512xf32>
    %245 = vector.shape_cast %244 : vector<1x8x512xf32> to vector<8x512xf32>
    %c0_110 = arith.constant 0 : index
    %c0_111 = arith.constant 0 : index
    %246 = vector.load %arg6[%c0_110, %c0_111] : memref<8x128xbf16, #tpu.memory_space<vmem>>, vector<8x128xbf16>
    %c0_112 = arith.constant 0 : index
    %c0_113 = arith.constant 0 : index
    %247 = vector.load %arg4[%c0_112, %c0_113] : memref<128x512xbf16, #tpu.memory_space<vmem>>, vector<128x512xbf16>
    %cst_114 = arith.constant dense<0.000000e+00> : vector<8x512xf32>
    %248 = tpu.matmul %246, %247, %cst_114 {dimension_numbers = #tpu.dot_dimension_numbers<[1], [0], [0], [1], [0, 0, 1, 1], [], []>} : vector<8x128xbf16>, vector<128x512xbf16>, vector<8x512xf32> -> vector<8x512xf32>
    %249 = arith.addf %245, %248 : vector<8x512xf32>
    %c0_115 = arith.constant 0 : index
    %c0_116 = arith.constant 0 : index
    %250 = vector.load %arg7[%c0_115, %c0_116] : memref<8x128xf32, #tpu.memory_space<vmem>>, vector<8x128xf32>
    %251 = vector.extract_strided_slice %249 {offsets = [0, 0], sizes = [8, 128], strides = [1, 1]} : vector<8x512xf32> to vector<8x128xf32>
    %252 = arith.negf %251 : vector<8x128xf32>
    %253 = math.exp %252 : vector<8x128xf32>
    %cst_117 = arith.constant 1.000000e+00 : f32
    %254 = vector.broadcast %cst_117 : f32 to vector<8x128xf32>
    %255 = arith.addf %254, %253 : vector<8x128xf32>
    %256 = arith.divf %254, %255 : vector<8x128xf32>
    %257 = vector.extract_strided_slice %249 {offsets = [0, 128], sizes = [8, 128], strides = [1, 1]} : vector<8x512xf32> to vector<8x128xf32>
    %258 = arith.negf %257 : vector<8x128xf32>
    %259 = math.exp %258 : vector<8x128xf32>
    %cst_118 = arith.constant 1.000000e+00 : f32
    %260 = vector.broadcast %cst_118 : f32 to vector<8x128xf32>
    %261 = arith.addf %260, %259 : vector<8x128xf32>
    %262 = arith.divf %260, %261 : vector<8x128xf32>
    %263 = vector.extract_strided_slice %249 {offsets = [0, 256], sizes = [8, 128], strides = [1, 1]} : vector<8x512xf32> to vector<8x128xf32>
    %264 = math.tanh %263 : vector<8x128xf32>
    %265 = vector.extract_strided_slice %249 {offsets = [0, 384], sizes = [8, 128], strides = [1, 1]} : vector<8x512xf32> to vector<8x128xf32>
    %266 = arith.negf %265 : vector<8x128xf32>
    %267 = math.exp %266 : vector<8x128xf32>
    %cst_119 = arith.constant 1.000000e+00 : f32
    %268 = vector.broadcast %cst_119 : f32 to vector<8x128xf32>
    %269 = arith.addf %268, %267 : vector<8x128xf32>
    %270 = arith.divf %268, %269 : vector<8x128xf32>
    %271 = arith.mulf %262, %250 : vector<8x128xf32>
    %272 = arith.mulf %256, %264 : vector<8x128xf32>
    %273 = arith.addf %271, %272 : vector<8x128xf32>
    %274 = math.tanh %273 : vector<8x128xf32>
    %275 = arith.mulf %270, %274 : vector<8x128xf32>
    %276 = arith.truncf %275 : vector<8x128xf32> to vector<8x128xbf16>
    %c0_120 = arith.constant 0 : index
    %c0_121 = arith.constant 0 : index
    %277 = vector.load %arg6[%c0_120, %c0_121] : memref<8x128xbf16, #tpu.memory_space<vmem>>, vector<8x128xbf16>
    tpu.vector_store %arg6[%c0_120, %c0_121], %276 {strides = array<i32>} : memref<8x128xbf16, #tpu.memory_space<vmem>>, vector<8x128xbf16>,
    %c0_122 = arith.constant 0 : index
    %c0_123 = arith.constant 0 : index
    %278 = vector.load %arg7[%c0_122, %c0_123] : memref<8x128xf32, #tpu.memory_space<vmem>>, vector<8x128xf32>
    tpu.vector_store %arg7[%c0_122, %c0_123], %273 {strides = array<i32>} : memref<8x128xf32, #tpu.memory_space<vmem>>, vector<8x128xf32>,
    %279 = arith.index_cast %c6_i32 : i32 to index
    %c0_124 = arith.constant 0 : index
    %c0_125 = arith.constant 0 : index
    %280 = vector.load %arg5[%279, %c0_124, %c0_125] : memref<7x8x128xbf16, #tpu.memory_space<vmem>>, vector<1x8x128xbf16>
    %281 = vector.shape_cast %280 : vector<1x8x128xbf16> to vector<8x128xbf16>
    %282 = vector.shape_cast %276 : vector<8x128xbf16> to vector<1x8x128xbf16>
    tpu.vector_store %arg5[%279, %c0_124, %c0_125], %282 {strides = array<i32>} : memref<7x8x128xbf16, #tpu.memory_space<vmem>>, vector<1x8x128xbf16>,
    %c7_i32 = arith.constant 7 : i32
    return
  }
  func.func @transform_0(%arg0: i32, %arg1: i32) -> (i32, i32) {
    %c0_i32 = arith.constant 0 : i32
    %c0_i32_0 = arith.constant 0 : i32
    return %arg0, %c0_i32 : i32, i32
  }
  func.func @transform_1(%arg0: i32, %arg1: i32) -> (i32, i32, i32) {
    %c0_i32 = arith.constant 0 : i32
    %c0_i32_0 = arith.constant 0 : i32
    return %arg1, %arg0, %c0_i32 : i32, i32, i32
  }
  func.func @transform_2(%arg0: i32, %arg1: i32) -> (i32, i32) {
    %c0_i32 = arith.constant 0 : i32
    %c0_i32_0 = arith.constant 0 : i32
    %c0_i32_1 = arith.constant 0 : i32
    return %c0_i32, %c0_i32_0 : i32, i32
  }
  func.func @transform_3(%arg0: i32, %arg1: i32) -> (i32, i32, i32) {
    %c0_i32 = arith.constant 0 : i32
    %c0_i32_0 = arith.constant 0 : i32
    return %arg1, %arg0, %c0_i32 : i32, i32, i32
  }
}

module attributes {stable_mosaic.version = 11 : i64} {
  func.func @classifier_kernel(%arg0: i32, %arg1: memref<56x128xbf16, #tpu.memory_space<vmem>>, %arg2: memref<128x128xbf16, #tpu.memory_space<vmem>>, %arg3: memref<1x128xf32, #tpu.memory_space<vmem>>, %arg4: memref<56x128xf32, #tpu.memory_space<vmem>>) attributes {dimension_semantics = [#tpu.dimension_semantics<parallel>], iteration_bounds = array<i64: 1>, scalar_prefetch = 0 : i64, scratch_operands = 0 : i64, tpu.core_type = #tpu.core_type<tc>, window_params = [{transform_indices = @transform_0, window_bounds = array<i64: 56, 128>}, {pipeline_mode = #tpu.pipeline_mode<synchronous>, transform_indices = @transform_1, window_bounds = array<i64: 128, 128>}, {pipeline_mode = #tpu.pipeline_mode<synchronous>, transform_indices = @transform_2, window_bounds = array<i64: 1, 128>}, {transform_indices = @transform_3, window_bounds = array<i64: 56, 128>}]} {
    %c0 = arith.constant 0 : index
    %c0_0 = arith.constant 0 : index
    %0 = vector.load %arg1[%c0, %c0_0] : memref<56x128xbf16, #tpu.memory_space<vmem>>, vector<56x128xbf16>
    %c0_1 = arith.constant 0 : index
    %c0_2 = arith.constant 0 : index
    %1 = vector.load %arg2[%c0_1, %c0_2] : memref<128x128xbf16, #tpu.memory_space<vmem>>, vector<128x128xbf16>
    %cst = arith.constant dense<0.000000e+00> : vector<56x128xf32>
    %2 = tpu.matmul %0, %1, %cst {dimension_numbers = #tpu.dot_dimension_numbers<[1], [0], [0], [1], [0, 0, 1, 1], [], []>} : vector<56x128xbf16>, vector<128x128xbf16>, vector<56x128xf32> -> vector<56x128xf32>
    %c0_3 = arith.constant 0 : index
    %c0_4 = arith.constant 0 : index
    %3 = vector.load %arg3[%c0_3, %c0_4] : memref<1x128xf32, #tpu.memory_space<vmem>>, vector<1x128xf32>
    %4 = vector.broadcast %3 : vector<1x128xf32> to vector<56x128xf32>
    %5 = arith.addf %2, %4 : vector<56x128xf32>
    %cst_5 = arith.constant dense<0xFF800000> : vector<56xf32>
    %6 = vector.multi_reduction <maximumf>, %5, %cst_5 [1] : vector<56x128xf32> to vector<56xf32>
    %7 = vector.shape_cast %6 : vector<56xf32> to vector<56x1xf32>
    %8 = vector.broadcast %7 : vector<56x1xf32> to vector<56x128xf32>
    %9 = arith.subf %5, %8 : vector<56x128xf32>
    %10 = math.exp %9 : vector<56x128xf32>
    %cst_6 = arith.constant dense<0.000000e+00> : vector<56xf32>
    %11 = vector.multi_reduction <add>, %10, %cst_6 [1] : vector<56x128xf32> to vector<56xf32>
    %12 = vector.shape_cast %11 : vector<56xf32> to vector<56x1xf32>
    %13 = math.log %12 : vector<56x1xf32>
    %14 = arith.addf %7, %13 : vector<56x1xf32>
    %15 = vector.broadcast %14 : vector<56x1xf32> to vector<56x128xf32>
    %16 = arith.subf %5, %15 : vector<56x128xf32>
    %c0_7 = arith.constant 0 : index
    %c0_8 = arith.constant 0 : index
    %17 = vector.load %arg4[%c0_7, %c0_8] : memref<56x128xf32, #tpu.memory_space<vmem>>, vector<56x128xf32>
    tpu.vector_store %arg4[%c0_7, %c0_8], %16 {strides = array<i32>} : memref<56x128xf32, #tpu.memory_space<vmem>>, vector<56x128xf32>,
    return
  }
  func.func @transform_0(%arg0: i32) -> (i32, i32) {
    %c0_i32 = arith.constant 0 : i32
    %c0_i32_0 = arith.constant 0 : i32
    return %arg0, %c0_i32 : i32, i32
  }
  func.func @transform_1(%arg0: i32) -> (i32, i32) {
    %c0_i32 = arith.constant 0 : i32
    %c0_i32_0 = arith.constant 0 : i32
    %c0_i32_1 = arith.constant 0 : i32
    return %c0_i32, %c0_i32_0 : i32, i32
  }
  func.func @transform_2(%arg0: i32) -> (i32, i32) {
    %c0_i32 = arith.constant 0 : i32
    %c0_i32_0 = arith.constant 0 : i32
    %c0_i32_1 = arith.constant 0 : i32
    return %c0_i32, %c0_i32_0 : i32, i32
  }
  func.func @transform_3(%arg0: i32) -> (i32, i32) {
    %c0_i32 = arith.constant 0 : i32
    %c0_i32_0 = arith.constant 0 : i32
    return %arg0, %c0_i32 : i32, i32
  }
}

</mosaic_0001>

<bundles_post_ra>
// kernel: forward_xe.3
= control target key start
LH: loop header
LB: loop body
LE: loop exit
PB: predicated region body
PF: predicated region fallthrough
CT: control target
= control target key end

     0   :  { %v337_v1 = vmov 0   ;;  %vm117_vm0 = vcmask 261120   ;;  %v39_v27 = vlaneseq  ;;  %s534_s1 = inlined_call_operand.vmem [shape: bf16[32,512], index: 1, kind: input, shape index: {}]   ;;  %s535_s0 = inlined_call_operand.vmem [shape: bf16[56,32], index: 0, kind: input, shape index: {}]   ;;  %s536_s2 = inlined_call_operand.vmem [shape: f32[1,512], index: 2, kind: input, shape index: {}]   ;;  %s537_s3 = inlined_call_operand.vmem [shape: f32[56,512], index: 3, kind: output, shape index: {}]  }
   0x1   :  { %v325_v0 = vld [vmem:[%s534_s1 + $0x4] ss:$16 sps:$4 sm:$0xff]   ;;  %162 = vmatprep.mubr.bf16.mxu0 %v337_v1  ;;  %233 = vmatprep.mubr.bf16.mxu1 %v337_v1  ;;  %v327_v2 = vld [vmem:[%s534_s1 + $0xc] ss:$16 sps:$4 sm:$0xff]   ;;  %v329_v3 = vld [vmem:[%s534_s1] ss:$16 sps:$4 sm:$0xff]  }
   0x2   :  { %130 = vmatprep.subr.bf16.mxu0 %v325_v0  ;;  %v330_v4 = vld [vmem:[%s534_s1 + $0x8] ss:$16 sps:$4 sm:$0xff]   ;;  %201 = vmatprep.subr.bf16.mxu1 %v327_v2  ;;  %v331_v5 = vld [vmem:[%s534_s1 + $0x24] ss:$16 sps:$4 sm:$0xff]   ;;  %v333_v6 = vld [vmem:[%s534_s1 + $0x2c] ss:$16 sps:$4 sm:$0xff]  }
   0x3   :  { %131 = vmatpush1.bf16.msra.mxu0 %v329_v3  ;;  %202 = vmatpush1.bf16.msra.mxu1 %v330_v4  ;;  %v335_v7 = vld [vmem:[%s534_s1 + $0x20] ss:$16 sps:$4 sm:$0xff]   ;;  %v336_v8 = vld [vmem:[%s534_s1 + $0x28] ss:$16 sps:$4 sm:$0xff]   ;;  %v16_v10 = vld [vmem:[%s535_s0 + $0x4] sm:$0xf] }
   0x4   :  { %132 = vmatprep.subr.bf16.mxu0 %v331_v5  ;;  %v15_v9 = vld [vmem:[%s535_s0] sm:$0xf]  ;;  %203 = vmatprep.subr.bf16.mxu1 %v333_v6  ;;  %v23_v12 = vmax.bf16 %v337_v1, %v16_v10  ;;  %v17_v14 = vld [vmem:[%s535_s0 + $0x8] sm:$0xf]  ;;  %v18_v15 = vld [vmem:[%s535_s0 + $0xc] sm:$0xf] }
   0x5   :  { %v22_v11 = vmax.bf16 %v337_v1, %v15_v9  ;;  %v24_v16 = vmax.bf16 %v337_v1, %v17_v14  ;;  %v25_v17 = vmax.bf16 %v337_v1, %v18_v15  ;;  %v19_v19 = vld [vmem:[%s535_s0 + $0x10] sm:$0xf]  ;;  %v20_v20 = vld [vmem:[%s535_s0 + $0x14] sm:$0xf]  ;;  %v21_v24 = vld [vmem:[%s535_s0 + $0x18] sm:$0xf] }
   0x6   :  { %v26_v21 = vmax.bf16 %v337_v1, %v19_v19  ;;  %v27_v22 = vmax.bf16 %v337_v1, %v20_v20  ;;  %v28_v25 = vmax.bf16 %v337_v1, %v21_v24  ;;  %v40_v28 = vshrl.u32 %v39_v27, 7  ;;  %v37_v31 = vld [vmem:[%s536_s2] sm:$0xf] }
   0x7   :  { %133 = vmatpush1.bf16.msra.mxu0 %v335_v7  ;;  %204 = vmatpush1.bf16.msra.mxu1 %v336_v8  ;;  %v304_v13 = vcombine.low %v22_v11, %v23_v12  ;;  %v305_v18 = vcombine.low %v24_v16, %v25_v17 }
   0x8   :  { %v306_v23 = vcombine.low %v26_v21, %v27_v22  ;;  %v307_v26 = vcombine.low %v28_v25, %v28_v25  ;;  %v41_v29 = vsub.s32 0, %v40_v28  ;;  %v49_v30 = vsub.s32 2, %v40_v28 }
   0x9   :  { %v45_v32 = vsub.s32 1, %v40_v28  ;;  %v53_v33 = vsub.s32 3, %v40_v28 }
   0xa   :  { %316 = vmatmul.mubr.msk.bf16.vlgmr.msra.gmra.mrb[0].mxu0 %vm117_vm0, %v304_v13  ;;  %320 = vmatmul.mubr.msk.bf16.vlgmr.msra.gmra.mrb[0].mxu1 %vm117_vm0, %v304_v13  ;;  %v414_v34 = vrot.slane %v37_v31, %v41_v29  ;;  %v416_v35 = vrot.slane %v37_v31, %v49_v30 }
   0xb   :  { %172 = vmatprep.mubr.bf16.mxu0 %v337_v1  ;;  %243 = vmatprep.mubr.bf16.mxu1 %v337_v1  ;;  %v418_v36 = vrot.slane %v37_v31, %v45_v32  ;;  %v420_v37 = vrot.slane %v37_v31, %v53_v33 }
  0x12   :  { %317 = vmatmul.mubr.msk.bf16.gmra.mrb[4].mxu0 %vm117_vm0, %v305_v18  ;;  %321 = vmatmul.mubr.msk.bf16.gmra.mrb[4].mxu1 %vm117_vm0, %v305_v18 }
  0x13   :  { %182 = vmatprep.mubr.bf16.mxu0 %v337_v1  ;;  %253 = vmatprep.mubr.bf16.mxu1 %v337_v1 }
  0x1a   :  { %318 = vmatmul.mubr.msk.bf16.gmra.mrb[8].mxu0 %vm117_vm0, %v306_v23  ;;  %322 = vmatmul.mubr.msk.bf16.gmra.mrb[8].mxu1 %vm117_vm0, %v306_v23 }
  0x1b   :  { %192 = vmatprep.mubr.bf16.mxu0 %v337_v1  ;;  %263 = vmatprep.mubr.bf16.mxu1 %v337_v1 }
  0x22   :  { %319 = vmatmul.mubr.msk.bf16.gmra.mrb[12].mxu0 %vm117_vm0, %v307_v26  ;;  %323 = vmatmul.mubr.msk.bf16.gmra.mrb[12].mxu1 %vm117_vm0, %v307_v26 }
  0xdd   :  { %v164_v38 = vpop.f32.mrb[0].mxu0  ;;  %v235_v39 = vpop.f32.mrb[0].mxu1 }
  0xde   :  { %v165_v40 = vadd.f32 %v164_v38, %v414_v34  ;;  %v236_v41 = vadd.f32 %v235_v39, %v416_v35  ;;  %v166_v42 = vpop.f32.mrb[1].mxu0  ;;  %v237_v43 = vpop.f32.mrb[1].mxu1 }
  0xdf   :  { %v167_v44 = vadd.f32 %v166_v42, %v418_v36  ;;  %v238_v45 = vadd.f32 %v237_v43, %v420_v37  ;;  %v168_v46 = vpop.f32.mrb[2].mxu0  ;;  %v239_v47 = vpop.f32.mrb[2].mxu1 }
  0xe0   :  { %272 = vst [vmem:[%s537_s3] sm:$0xff] %v165_v40  ;;  %274 = vst [vmem:[%s537_s3 + $0x10] sm:$0xff] %v236_v41  ;;  %v169_v48 = vadd.f32 %v168_v46, %v414_v34  ;;  %v240_v49 = vadd.f32 %v239_v47, %v416_v35  ;;  %v170_v50 = vpop.f32.mrb[3].mxu0  ;;  %v241_v51 = vpop.f32.mrb[3].mxu1 }
  0xe1   :  { %273 = vst [vmem:[%s537_s3 + $0x8] sm:$0xff] %v167_v44  ;;  %275 = vst [vmem:[%s537_s3 + $0x18] sm:$0xff] %v238_v45  ;;  %v171_v52 = vadd.f32 %v170_v50, %v418_v36  ;;  %v242_v53 = vadd.f32 %v241_v51, %v420_v37 }
  0xe2   :  { %276 = vst [vmem:[%s537_s3 + $0x20] sm:$0xff] %v169_v48  ;;  %278 = vst [vmem:[%s537_s3 + $0x30] sm:$0xff] %v240_v49 }
  0xe3   :  { %277 = vst [vmem:[%s537_s3 + $0x28] sm:$0xff] %v171_v52  ;;  %279 = vst [vmem:[%s537_s3 + $0x38] sm:$0xff] %v242_v53 }
  0xe5   :  { %v174_v54 = vpop.f32.mrb[4].mxu0  ;;  %v245_v55 = vpop.f32.mrb[4].mxu1 }
  0xe6   :  { %v175_v56 = vadd.f32 %v174_v54, %v414_v34  ;;  %v246_v57 = vadd.f32 %v245_v55, %v416_v35  ;;  %v176_v58 = vpop.f32.mrb[5].mxu0  ;;  %v247_v59 = vpop.f32.mrb[5].mxu1 }
  0xe7   :  { %v177_v60 = vadd.f32 %v176_v58, %v418_v36  ;;  %v248_v61 = vadd.f32 %v247_v59, %v420_v37  ;;  %v178_v62 = vpop.f32.mrb[6].mxu0  ;;  %v249_v63 = vpop.f32.mrb[6].mxu1 }
  0xe8   :  { %280 = vst [vmem:[%s537_s3 + $0x40] sm:$0xff] %v175_v56  ;;  %282 = vst [vmem:[%s537_s3 + $0x50] sm:$0xff] %v246_v57  ;;  %v179_v0 = vadd.f32 %v178_v62, %v414_v34  ;;  %v250_v1 = vadd.f32 %v249_v63, %v416_v35  ;;  %v180_v2 = vpop.f32.mrb[7].mxu0  ;;  %v251_v3 = vpop.f32.mrb[7].mxu1 }
  0xe9   :  { %281 = vst [vmem:[%s537_s3 + $0x48] sm:$0xff] %v177_v60  ;;  %283 = vst [vmem:[%s537_s3 + $0x58] sm:$0xff] %v248_v61  ;;  %v181_v4 = vadd.f32 %v180_v2, %v418_v36  ;;  %v252_v5 = vadd.f32 %v251_v3, %v420_v37 }
  0xea   :  { %284 = vst [vmem:[%s537_s3 + $0x60] sm:$0xff] %v179_v0  ;;  %286 = vst [vmem:[%s537_s3 + $0x70] sm:$0xff] %v250_v1 }
  0xeb   :  { %285 = vst [vmem:[%s537_s3 + $0x68] sm:$0xff] %v181_v4  ;;  %287 = vst [vmem:[%s537_s3 + $0x78] sm:$0xff] %v252_v5 }
  0xed   :  { %v184_v6 = vpop.f32.mrb[8].mxu0  ;;  %v255_v7 = vpop.f32.mrb[8].mxu1 }
  0xee   :  { %v185_v8 = vadd.f32 %v184_v6, %v414_v34  ;;  %v256_v9 = vadd.f32 %v255_v7, %v416_v35  ;;  %v186_v10 = vpop.f32.mrb[9].mxu0  ;;  %v257_v11 = vpop.f32.mrb[9].mxu1 }
  0xef   :  { %v187_v12 = vadd.f32 %v186_v10, %v418_v36  ;;  %v258_v13 = vadd.f32 %v257_v11, %v420_v37  ;;  %v188_v14 = vpop.f32.mrb[10].mxu0  ;;  %v259_v15 = vpop.f32.mrb[10].mxu1 }
  0xf0   :  { %288 = vst [vmem:[%s537_s3 + $0x80] sm:$0xff] %v185_v8  ;;  %290 = vst [vmem:[%s537_s3 + $0x90] sm:$0xff] %v256_v9  ;;  %v189_v16 = vadd.f32 %v188_v14, %v414_v34  ;;  %v260_v17 = vadd.f32 %v259_v15, %v416_v35  ;;  %v190_v18 = vpop.f32.mrb[11].mxu0  ;;  %v261_v19 = vpop.f32.mrb[11].mxu1 }
  0xf1   :  { %289 = vst [vmem:[%s537_s3 + $0x88] sm:$0xff] %v187_v12  ;;  %291 = vst [vmem:[%s537_s3 + $0x98] sm:$0xff] %v258_v13  ;;  %v191_v20 = vadd.f32 %v190_v18, %v418_v36  ;;  %v262_v21 = vadd.f32 %v261_v19, %v420_v37 }
  0xf2   :  { %292 = vst [vmem:[%s537_s3 + $0xa0] sm:$0xff] %v189_v16  ;;  %294 = vst [vmem:[%s537_s3 + $0xb0] sm:$0xff] %v260_v17 }
  0xf3   :  { %293 = vst [vmem:[%s537_s3 + $0xa8] sm:$0xff] %v191_v20  ;;  %295 = vst [vmem:[%s537_s3 + $0xb8] sm:$0xff] %v262_v21 }
  0xf5   :  { %v194_v22 = vpop.f32.mrb[12].mxu0  ;;  %v265_v23 = vpop.f32.mrb[12].mxu1 }
  0xf6   :  { %v195_v24 = vadd.f32 %v194_v22, %v414_v34  ;;  %v266_v25 = vadd.f32 %v265_v23, %v416_v35  ;;  %v196_v26 = vpop.f32.mrb[13].mxu0  ;;  %v267_v27 = vpop.f32.mrb[13].mxu1 }
  0xf7   :  { %v197_v28 = vadd.f32 %v196_v26, %v418_v36  ;;  %v268_v29 = vadd.f32 %v267_v27, %v420_v37  ;;  %v198_v30 = vpop.f32.mrb[14].mxu0  ;;  %v269_v31 = vpop.f32.mrb[14].mxu1 }
  0xf8   :  { %296 = vst [vmem:[%s537_s3 + $0xc0] sm:$0xff] %v195_v24  ;;  %298 = vst [vmem:[%s537_s3 + $0xd0] sm:$0xff] %v266_v25  ;;  %v199_v32 = vpop.f32.mrb[15].mxu0  ;;  %v270_v33 = vpop.f32.mrb[15].mxu1 }
  0xf9   :  { %297 = vst [vmem:[%s537_s3 + $0xc8] sm:$0xff] %v197_v28  ;;  %299 = vst [vmem:[%s537_s3 + $0xd8] sm:$0xff] %v268_v29 }

// kernel: forward_xe.5
= control target key start
LH: loop header
LB: loop body
LE: loop exit
PB: predicated region body
PF: predicated region fallthrough
CT: control target
= control target key end

     0   :  { %s503_s1 = inlined_call_operand.vmem [shape: bf16[128,128], index: 1, kind: input, shape index: {}]   ;;  %s504_s0 = inlined_call_operand.vmem [shape: bf16[56,128], index: 0, kind: input, shape index: {}]   ;;  %s505_s2 = inlined_call_operand.vmem [shape: f32[1,128], index: 2, kind: input, shape index: {}]   ;;  %s506_s3 = inlined_call_operand.vmem [shape: f32[56,128], index: 3, kind: output, shape index: {}]  }
   0x1   :  { %v332_v0 = vld [vmem:[%s503_s1] sm:$0xff]   ;;  %v333_v1 = vld [vmem:[%s503_s1 + $0x8] sm:$0xff]   ;;  %v334_v2 = vld [vmem:[%s503_s1 + $0x10] sm:$0xff]  }
   0x2   :  { %292 = vmatprep.subr.bf16.mxu0 %v332_v0  ;;  %316 = vmatprep.subr.bf16.mxu1 %v332_v0  ;;  %v335_v3 = vld [vmem:[%s503_s1 + $0x18] sm:$0xff]   ;;  %v340_v4 = vld [vmem:[%s504_s0] sm:$0xff]   ;;  %v342_v5 = vld [vmem:[%s504_s0 + $0x10] sm:$0xff]  }
   0x3   :  { %293 = vmatpush3.bf16.msra.mxu0 %v332_v0  ;;  %324 = vmatpush3.bf16.msra.mxu1 %v332_v0  ;;  %v336_v6 = vld [vmem:[%s503_s1 + $0x20] sm:$0xff]   ;;  %v337_v7 = vld [vmem:[%s503_s1 + $0x28] sm:$0xff]   ;;  %v338_v8 = vld [vmem:[%s503_s1 + $0x30] sm:$0xff]  }
   0x4   :  { %294 = vmatprep.subr.bf16.mxu0 %v333_v1  ;;  %317 = vmatprep.subr.bf16.mxu1 %v333_v1  ;;  %v339_v9 = vld [vmem:[%s503_s1 + $0x38] sm:$0xff]   ;;  %v341_v10 = vld [vmem:[%s504_s0 + $0x8] sm:$0xff]   ;;  %v267_v12 = vld [vmem:[%s505_s2] ss:$0 sm:$0xff] }
   0x5   :  { %308 = vmatprep.mubr.bf16.mxu0 %v340_v4  ;;  %312 = vmatprep.mubr.bf16.mxu1 %v342_v5  ;;  %v343_v11 = vld [vmem:[%s504_s0 + $0x18] ss:$0 sps:$4 sm:$0xff]  }
   0x7   :  { %295 = vmatpush3.bf16.msra.mxu0 %v333_v1  ;;  %325 = vmatpush3.bf16.msra.mxu1 %v333_v1 }
   0x8   :  { %296 = vmatprep.subr.bf16.mxu0 %v334_v2  ;;  %318 = vmatprep.subr.bf16.mxu1 %v334_v2 }
   0xb   :  { %297 = vmatpush3.bf16.msra.mxu0 %v334_v2  ;;  %326 = vmatpush3.bf16.msra.mxu1 %v334_v2 }
   0xc   :  { %298 = vmatprep.subr.bf16.mxu0 %v335_v3  ;;  %319 = vmatprep.subr.bf16.mxu1 %v335_v3 }
   0xf   :  { %299 = vmatpush3.bf16.msra.mxu0 %v335_v3  ;;  %327 = vmatpush3.bf16.msra.mxu1 %v335_v3 }
  0x10   :  { %300 = vmatprep.subr.bf16.mxu0 %v336_v6  ;;  %320 = vmatprep.subr.bf16.mxu1 %v336_v6 }
  0x13   :  { %301 = vmatpush3.bf16.msra.mxu0 %v336_v6  ;;  %328 = vmatpush3.bf16.msra.mxu1 %v336_v6 }
  0x14   :  { %302 = vmatprep.subr.bf16.mxu0 %v337_v7  ;;  %321 = vmatprep.subr.bf16.mxu1 %v337_v7 }
  0x17   :  { %303 = vmatpush3.bf16.msra.mxu0 %v337_v7  ;;  %329 = vmatpush3.bf16.msra.mxu1 %v337_v7 }
  0x18   :  { %304 = vmatprep.subr.bf16.mxu0 %v338_v8  ;;  %322 = vmatprep.subr.bf16.mxu1 %v338_v8 }
  0x1b   :  { %305 = vmatpush3.bf16.msra.mxu0 %v338_v8  ;;  %330 = vmatpush3.bf16.msra.mxu1 %v338_v8 }
  0x1c   :  { %306 = vmatprep.subr.bf16.mxu0 %v339_v9  ;;  %323 = vmatprep.subr.bf16.mxu1 %v339_v9 }
  0x1f   :  { %307 = vmatpush3.bf16.msra.mxu0 %v339_v9  ;;  %331 = vmatpush3.bf16.msra.mxu1 %v339_v9 }
  0x22   :  { %309 = vmatmul.mubr.bf16.vlgmr.msra.gmra.mrb[0].mxu0 %v341_v10  ;;  %313 = vmatmul.mubr.bf16.vlgmr.msra.gmra.mrb[0].mxu1 %v343_v11 }
  0xf5   :  { %v310_v13 = vpop.f32.mrb[0].mxu0  ;;  %v314_v14 = vpop.f32.mrb[0].mxu1 }
  0xf6   :  { %v431_v15 = vadd.f32 %v310_v13, %v267_v12  ;;  %v149_v16 = vpop.f32.mrb[1].mxu0  ;;  %v165_v17 = vpop.f32.mrb[1].mxu1  ;;  %v449_v27 = vadd.f32 %v314_v14, %v267_v12 }
  0xf7   :  { %v433_v18 = vadd.f32 %v267_v12, %v149_v16  ;;  %v311_v19 = vpop.f32.mrb[2].mxu0  ;;  %v315_v20 = vpop.f32.mrb[2].mxu1  ;;  %v436_v23 = vadd.f32 %v267_v12, %v165_v17 }
  0xf8   :  { %183 = vmax.xlane.f32.xlu1 %v431_v15  ;;  %v152_v21 = vpop.f32.mrb[3].mxu0  ;;  %v168_v22 = vpop.f32.mrb[3].mxu1  ;;  %v439_v24 = vadd.f32 %v311_v19, %v267_v12 }
  0xf9   :  { %179 = vmax.xlane.f32.xlu0 %v433_v18  ;;  %v443_v25 = vadd.f32 %v267_v12, %v168_v22  ;;  %v445_v26 = vadd.f32 %v267_v12, %v152_v21 }
  0xfc   :  { %185 = vmax.xlane.f32.xlu1 %v439_v24 }
  0xfd   :  { %187 = vmax.xlane.f32.xlu0 %v436_v23 }
 0x100   :  { %189 = vmax.xlane.f32.xlu1 %v443_v25 }
 0x101   :  { %181 = vmax.xlane.f32.xlu0 %v445_v26 }
 0x105   :  { %191 = vmax.xlane.f32.xlu0 %v449_v27 }
 0x185   :  { %v184_v28 = vpop.xlane.xlu1 %183 }
 0x186   :  { %v195_v29 = vsub.f32 %v431_v15, %v184_v28  ;;  %v453_v30 = vpop.xlane.xlu0 %179 }
 0x187   :  { %v193_v31 = vsub.f32 %v433_v18, %v453_v30 }
 0x188   :  { %v204_v32 = vmul.f32 1.442695, %v195_v29 }
 0x189   :  { %v200_v33 = vmul.f32 1.442695, %v193_v31  ;;  %v186_v34 = vpop.xlane.xlu1 %185 }
 0x18a   :  { %344 = vpow2.f32 %v204_v32  ;;  %v196_v35 = vsub.f32 %v439_v24, %v186_v34  ;;  %v458_v36 = vpop.xlane.xlu0 %187 }
 0x18b   :  { %v197_v37 = vsub.f32 %v436_v23, %v458_v36  ;;  %346 = vpow2.f32 %v200_v33 }
 0x18c   :  { %v206_v38 = vmul.f32 1.442695, %v196_v35 }
 0x18d   :  { %v462_v39 = vpop.xlane.xlu1 %189  ;;  %v208_v40 = vmul.f32 1.442695, %v197_v37 }
 0x18e   :  { %348 = vpow2.f32 %v206_v38  ;;  %v198_v41 = vsub.f32 %v443_v25, %v462_v39  ;;  %v182_v42 = vpop.xlane.xlu0 %181 }
 0x18f   :  { %v194_v43 = vsub.f32 %v445_v26, %v182_v42  ;;  %350 = vpow2.f32 %v208_v40 }
 0x190   :  { %v210_v45 = vmul.f32 1.442695, %v198_v41 }
 0x191   :  { %v202_v44 = vmul.f32 1.442695, %v194_v43 }
 0x192   :  { %v467_v46 = vpop.xlane.xlu0 %191 }
 0x193   :  { %352 = vpow2.f32 %v202_v44  ;;  %v199_v47 = vsub.f32 %v449_v27, %v467_v46 }
 0x194   :  { %v345_v48 = vpop.eup %344  ;;  %354 = vpow2.f32 %v210_v45 }
 0x195   :  { %v212_v49 = vmul.f32 1.442695, %v199_v47  ;;  %218 = vadd.xlane.f32.xlu1 %v345_v48  ;;  %v347_v50 = vpop.eup %346 }
 0x197   :  { %356 = vpow2.f32 %v212_v49 }
 0x198   :  { %v349_v51 = vpop.eup %348 }
 0x199   :  { %220 = vadd.xlane.f32.xlu0 %v349_v51  ;;  %214 = vadd.xlane.f32.xlu1 %v347_v50  ;;  %v351_v52 = vpop.eup %350 }
 0x19d   :  { %v353_v53 = vpop.eup %352  ;;  %222 = vadd.xlane.f32.xlu1 %v351_v52 }
 0x19e   :  { %216 = vadd.xlane.f32.xlu0 %v353_v53  ;;  %v355_v54 = vpop.eup %354 }
 0x1a1   :  { %v357_v55 = vpop.eup %356 }
 0x1a2   :  { %224 = vadd.xlane.f32.xlu0 %v355_v54  ;;  %226 = vadd.xlane.f32.xlu1 %v357_v55 }
 0x222   :  { %v219_v56 = vpop.xlane.xlu1 %218 }
 0x223   :  { %358 = vlog2.f32 %v219_v56 }
 0x226   :  { %v215_v57 = vpop.xlane.xlu1 %214  ;;  %v221_v58 = vpop.xlane.xlu0 %220 }
 0x227   :  { %360 = vlog2.f32 %v215_v57 }
 0x228   :  { %362 = vlog2.f32 %v221_v58 }
 0x22a   :  { %v223_v59 = vpop.xlane.xlu1 %222 }
 0x22b   :  { %364 = vlog2.f32 %v223_v59  ;;  %v217_v60 = vpop.xlane.xlu0 %216 }
 0x22c   :  { %366 = vlog2.f32 %v217_v60 }
 0x22d   :  { %v359_v61 = vpop.eup %358 }
 0x22e   :  { %v233_v62 = vmul.f32 0.6931472, %v359_v61 }
 0x22f   :  { %v227_v63 = vpop.xlane.xlu1 %226  ;;  %v225_v0 = vpop.xlane.xlu0 %224 }
 0x230   :  { %v244_v1 = vadd.f32 %v233_v62, %v184_v28  ;;  %368 = vlog2.f32 %v227_v63 }
 0x231   :  { %v361_v2 = vpop.eup %360  ;;  %370 = vlog2.f32 %v225_v0 }
 0x232   :  { %v363_v3 = vpop.eup %362  ;;  %v251_v4 = vsub.f32 %v431_v15, %v244_v1  ;;  %v229_v5 = vmul.f32 0.6931472, %v361_v2 }
 0x233   :  { %v235_v6 = vmul.f32 0.6931472, %v363_v3 }
 0x234   :  { %258 = vst [vmem:[%s506_s3 + $0x10] sm:$0xff] %v251_v4  ;;  %v242_v7 = vadd.f32 %v229_v5, %v453_v30 }
 0x235   :  { %v365_v8 = vpop.eup %364  ;;  %v245_v9 = vadd.f32 %v235_v6, %v186_v34 }
 0x236   :  { %v367_v10 = vpop.eup %366  ;;  %v249_v11 = vsub.f32 %v433_v18, %v242_v7  ;;  %v237_v12 = vmul.f32 0.6931472, %v365_v8 }
 0x237   :  { %v252_v13 = vsub.f32 %v439_v24, %v245_v9  ;;  %v231_v14 = vmul.f32 0.6931472, %v367_v10 }
 0x238   :  { %256 = vst [vmem:[%s506_s3] sm:$0xff] %v249_v11  ;;  %v246_v15 = vadd.f32 %v237_v12, %v458_v36 }
 0x239   :  { %259 = vst [vmem:[%s506_s3 + $0x18] sm:$0xff] %v252_v13  ;;  %v243_v16 = vadd.f32 %v231_v14, %v182_v42 }
 0x23a   :  { %v369_v17 = vpop.eup %368  ;;  %v253_v19 = vsub.f32 %v436_v23, %v246_v15 }
 0x23b   :  { %v371_v20 = vpop.eup %370  ;;  %v250_v18 = vsub.f32 %v445_v26, %v243_v16  ;;  %v241_v21 = vmul.f32 0.6931472, %v369_v17 }
 0x23c   :  { %260 = vst [vmem:[%s506_s3 + $0x20] sm:$0xff] %v253_v19  ;;  %v239_v22 = vmul.f32 0.6931472, %v371_v20 }
 0x23d   :  { %257 = vst [vmem:[%s506_s3 + $0x8] sm:$0xff] %v250_v18  ;;  %v248_v24 = vadd.f32 %v241_v21, %v467_v46 }
 0x23e   :  { %v247_v28 = vadd.f32 %v239_v22, %v462_v39 }
 0x23f   :  { %v255_v29 = vsub.f32 %v449_v27, %v248_v24 }
 0x240   :  { %v254_v23 = vsub.f32 %v443_v25, %v247_v28 }
 0x241   :  { %262 = vst [vmem:[%s506_s3 + $0x30] sm:$0xff] %v255_v29 }
 0x242   :  { %261 = vst [vmem:[%s506_s3 + $0x28] sm:$0xff] %v254_v23 }

// kernel: forward_xe.4
= control target key start
LH: loop header
LB: loop body
LE: loop exit
PB: predicated region body
PF: predicated region fallthrough
CT: control target
= control target key end

     0   :  { %v2753_v1 = vmov 0   ;;  %s3473_s2 = inlined_call_operand.vmem [shape: bf16[128,512], index: 2, kind: input, shape index: {}]   ;;  %s3474_s0 = inlined_call_operand.vmem [shape: f32[8,512], index: 0, kind: input, shape index: {}]   ;;  %s3475_s1 = inlined_call_operand.vmem [shape: f32[7,8,512], index: 1, kind: input, shape index: {}]   ;;  %s3476_s3 = inlined_call_operand.vmem [shape: bf16[7,8,128], index: 3, kind: output, shape index: {}]  }
   0x1   :  { %v2777_v0 = vld [vmem:[%s3473_s2 + $0x4] ss:$16 sps:$4 sm:$0xff]   ;;  %279 = vmatprep.mubr.bf16.mxu0 %v2753_v1  ;;  %320 = vmatprep.mubr.bf16.mxu1 %v2753_v1  ;;  %v2784_v2 = vld [vmem:[%s3473_s2] ss:$16 sps:$4 sm:$0xff]   ;;  %v2807_v6 = vld [vmem:[%s3473_s2 + $0xc] ss:$16 sps:$4 sm:$0xff]  }
   0x2   :  { %247 = vmatprep.subr.bf16.mxu0 %v2777_v0  ;;  %v2790_v3 = vld [vmem:[%s3473_s2 + $0x24] ss:$16 sps:$4 sm:$0xff]   ;;  %v2796_v4 = vld [vmem:[%s3473_s2 + $0x20] ss:$16 sps:$4 sm:$0xff]   ;;  %v2812_v7 = vld [vmem:[%s3473_s2 + $0x8] ss:$16 sps:$4 sm:$0xff]   ;;  %288 = vmatprep.subr.bf16.mxu1 %v2807_v6 }
   0x3   :  { %248 = vmatpush1.bf16.msra.mxu0 %v2784_v2  ;;  %v2802_v5 = vld [vmem:[%s3473_s2 + $0x44] ss:$16 sps:$4 sm:$0xff]   ;;  %v2818_v8 = vld [vmem:[%s3473_s2 + $0x40] ss:$16 sps:$4 sm:$0xff]   ;;  %289 = vmatpush1.bf16.msra.mxu1 %v2812_v7  ;;  %v2831_v10 = vld [vmem:[%s3473_s2 + $0x2c] ss:$16 sps:$4 sm:$0xff]  }
   0x4   :  { %249 = vmatprep.subr.bf16.mxu0 %v2790_v3  ;;  %v2825_v9 = vld [vmem:[%s3473_s2 + $0x64] ss:$16 sps:$4 sm:$0xff]   ;;  %v2836_v11 = vld [vmem:[%s3473_s2 + $0x28] ss:$16 sps:$4 sm:$0xff]   ;;  %290 = vmatprep.subr.bf16.mxu1 %v2831_v10  ;;  %v2843_v12 = vld [vmem:[%s3473_s2 + $0x60] ss:$16 sps:$4 sm:$0xff]  }
   0x5   :  { %v2848_v13 = vld [vmem:[%s3473_s2 + $0x84] ss:$16 sps:$4 sm:$0xff]   ;;  %v2853_v14 = vld [vmem:[%s3473_s2 + $0x4c] ss:$16 sps:$4 sm:$0xff]   ;;  %v2860_v15 = vld [vmem:[%s3473_s2 + $0x48] ss:$16 sps:$4 sm:$0xff]  }
   0x6   :  { %v2866_v16 = vld [vmem:[%s3473_s2 + $0x6c] ss:$16 sps:$4 sm:$0xff]   ;;  %v2872_v17 = vld [vmem:[%s3473_s2 + $0x80] ss:$16 sps:$4 sm:$0xff]   ;;  %v2878_v18 = vld [vmem:[%s3473_s2 + $0xa4] ss:$16 sps:$4 sm:$0xff]  }
   0x7   :  { %250 = vmatpush1.bf16.msra.mxu0 %v2796_v4  ;;  %291 = vmatpush1.bf16.msra.mxu1 %v2836_v11  ;;  %v2884_v19 = vld [vmem:[%s3473_s2 + $0x68] ss:$16 sps:$4 sm:$0xff]   ;;  %v2890_v20 = vld [vmem:[%s3473_s2 + $0x8c] ss:$16 sps:$4 sm:$0xff]   ;;  %v19_v21 = vld [vmem:[%s3474_s0] sm:$0xff] }
   0x8   :  { %251 = vmatprep.subr.bf16.mxu0 %v2802_v5  ;;  %292 = vmatprep.subr.bf16.mxu1 %v2853_v14  ;;  %v20_v22 = vld [vmem:[%s3474_s0 + $0x8] sm:$0xff]  ;;  %v2901_v23 = vld [vmem:[%s3473_s2 + $0xa0] ss:$16 sps:$4 sm:$0xff]   ;;  %v2250_v24 = vmul.f32 -1.442695, %v19_v21  ;;  %v22_v31 = vld [vmem:[%s3474_s0 + $0x18] sm:$0xff] }
   0x9   :  { %v2251_v25 = vmul.f32 -1.442695, %v20_v22  ;;  %v2907_v26 = vld [vmem:[%s3473_s2 + $0xc4] ss:$16 sps:$4 sm:$0xff]   ;;  %v2914_v27 = vld [vmem:[%s3473_s2 + $0x88] ss:$16 sps:$4 sm:$0xff]  }
   0xa   :  { %2625 = vpow2.f32 %v2250_v24  ;;  %v2919_v28 = vld [vmem:[%s3473_s2 + $0xc0] ss:$16 sps:$4 sm:$0xff]   ;;  %v2925_v29 = vld [vmem:[%s3473_s2 + $0xac] ss:$16 sps:$4 sm:$0xff]   ;;  %v2930_v30 = vld [vmem:[%s3473_s2 + $0xe4] ss:$16 sps:$4 sm:$0xff]  }
   0xb   :  { %252 = vmatpush1.bf16.msra.mxu0 %v2818_v8  ;;  %293 = vmatpush1.bf16.msra.mxu1 %v2860_v15  ;;  %2627 = vpow2.f32 %v2251_v25  ;;  %v2938_v32 = vld [vmem:[%s3473_s2 + $0xa8] ss:$16 sps:$4 sm:$0xff]   ;;  %v2944_v33 = vld [vmem:[%s3473_s2 + $0xcc] ss:$16 sps:$4 sm:$0xff]   ;;  %v2951_v34 = vld [vmem:[%s3473_s2 + $0xe0] ss:$16 sps:$4 sm:$0xff]  }
   0xc   :  { %253 = vmatprep.subr.bf16.mxu0 %v2825_v9  ;;  %294 = vmatprep.subr.bf16.mxu1 %v2866_v16  ;;  %v21_v35 = vld [vmem:[%s3474_s0 + $0x10] sm:$0xff]  ;;  %v2252_v36 = vmul.f32 -1.442695, %v22_v31  ;;  %v2960_v37 = vld [vmem:[%s3473_s2 + $0xc8] ss:$16 sps:$4 sm:$0xff]   ;;  %v50_v57 = vld [vmem:[%s3475_s1] sm:$0xff] }
   0xd   :  { %v2966_v38 = vld [vmem:[%s3473_s2 + $0xec] ss:$16 sps:$4 sm:$0xff]   ;;  %v2974_v40 = vld [vmem:[%s3473_s2 + $0xe8] ss:$16 sps:$4 sm:$0xff]  }
   0xe   :  { %2629 = vpow2.f32 %v2252_v36  ;;  %v51_v58 = vld [vmem:[%s3475_s1 + $0x8] sm:$0xff] }
   0xf   :  { %254 = vmatpush1.bf16.msra.mxu0 %v2843_v12  ;;  %295 = vmatpush1.bf16.msra.mxu1 %v2884_v19  ;;  %2631 = vtanh.f32 %v21_v35 }
  0x10   :  { %255 = vmatprep.subr.bf16.mxu0 %v2848_v13  ;;  %296 = vmatprep.subr.bf16.mxu1 %v2890_v20 }
  0x13   :  { %256 = vmatpush1.bf16.msra.mxu0 %v2872_v17  ;;  %297 = vmatpush1.bf16.msra.mxu1 %v2914_v27 }
  0x14   :  { %257 = vmatprep.subr.bf16.mxu0 %v2878_v18  ;;  %298 = vmatprep.subr.bf16.mxu1 %v2925_v29  ;;  %v2626_v39 = vpop.eup %2625 }
  0x15   :  { %v2628_v41 = vpop.eup %2627  ;;  %v26_v42 = vadd.f32 1.0, %v2626_v39  ;;  %v53_v39 = vld [vmem:[%s3475_s1 + $0x18] sm:$0xff] }
  0x16   :  { %v32_v43 = vadd.f32 1.0, %v2628_v41 }
  0x17   :  { %258 = vmatpush1.bf16.msra.mxu0 %v2901_v23  ;;  %299 = vmatpush1.bf16.msra.mxu1 %v2938_v32  ;;  %2633 = vrcp.f32 %v26_v42  ;;  %v52_v42 = vld [vmem:[%s3475_s1 + $0x10] sm:$0xff] }
  0x18   :  { %259 = vmatprep.subr.bf16.mxu0 %v2907_v26  ;;  %300 = vmatprep.subr.bf16.mxu1 %v2944_v33  ;;  %2635 = vrcp.f32 %v32_v43  ;;  %v2630_v44 = vpop.eup %2629 }
  0x19   :  { %v2632_v45 = vpop.eup %2631  ;;  %v39_v47 = vadd.f32 1.0, %v2630_v44 }
  0x1b   :  { %260 = vmatpush1.bf16.msra.mxu0 %v2919_v28  ;;  %301 = vmatpush1.bf16.msra.mxu1 %v2960_v37  ;;  %2637 = vrcp.f32 %v39_v47 }
  0x1c   :  { %261 = vmatprep.subr.bf16.mxu0 %v2930_v30  ;;  %302 = vmatprep.subr.bf16.mxu1 %v2966_v38 }
  0x1f   :  { %262 = vmatpush1.bf16.msra.mxu0 %v2951_v34  ;;  %303 = vmatpush1.bf16.msra.mxu1 %v2974_v40 }
  0x20   :  { %560 = vmatprep.subr.bf16.mxu0 %v2777_v0  ;;  %601 = vmatprep.subr.bf16.mxu1 %v2807_v6 }
  0x21   :  { %v2634_v46 = vpop.eup %2633 }
  0x22   :  { %v2636_v48 = vpop.eup %2635  ;;  %v43_v49 = vmul.f32 %v2634_v46, %v2632_v45 }
  0x23   :  { %v42_v50 = vmul.f32 0.0, %v2636_v48 }
  0x25   :  { %v2982_v51 = vadd.f32 %v43_v49, %v42_v50  ;;  %v2638_v52 = vpop.eup %2637 }
  0x27   :  { %2639 = vtanh.f32 %v2982_v51 }
  0x31   :  { %v2640_v53 = vpop.eup %2639 }
  0x32   :  { %v46_v54 = vmul.f32 %v2640_v53, %v2638_v52 }
  0x34   :  { %v47_v55 = vpack.c.bf16 %v46_v54, %v46_v54 }
  0x36   :  { %48 = vst [vmem:[#allocation2] sm:$0xf] %v47_v55 }
  0x3d   :  { %v54_v56 = vld [vmem:[#allocation2] sm:$0xf] }
  0x3e   :  { %280 = vmatmul.mubr.bf16.vlgmr.msra.gmra.mrb[0].mxu0 %v54_v56  ;;  %321 = vmatmul.mubr.bf16.vlgmr.msra.gmra.mrb[0].mxu1 %v54_v56 }
  0x3f   :  { %561 = vmatpush1.bf16.msra.mxu0 %v2784_v2  ;;  %602 = vmatpush1.bf16.msra.mxu1 %v2812_v7 }
  0x40   :  { %562 = vmatprep.subr.bf16.mxu0 %v2790_v3  ;;  %603 = vmatprep.subr.bf16.mxu1 %v2831_v10 }
  0x41   :  { %592 = vmatprep.mubr.bf16.mxu0 %v2753_v1  ;;  %633 = vmatprep.mubr.bf16.mxu1 %v2753_v1 }
  0x43   :  { %563 = vmatpush1.bf16.msra.mxu0 %v2796_v4  ;;  %604 = vmatpush1.bf16.msra.mxu1 %v2836_v11 }
  0x44   :  { %564 = vmatprep.subr.bf16.mxu0 %v2802_v5  ;;  %605 = vmatprep.subr.bf16.mxu1 %v2853_v14 }
  0x47   :  { %565 = vmatpush1.bf16.msra.mxu0 %v2818_v8  ;;  %606 = vmatpush1.bf16.msra.mxu1 %v2860_v15 }
  0x48   :  { %566 = vmatprep.subr.bf16.mxu0 %v2825_v9  ;;  %607 = vmatprep.subr.bf16.mxu1 %v2866_v16 }
  0x4b   :  { %567 = vmatpush1.bf16.msra.mxu0 %v2843_v12  ;;  %608 = vmatpush1.bf16.msra.mxu1 %v2884_v19 }
  0x4c   :  { %568 = vmatprep.subr.bf16.mxu0 %v2848_v13  ;;  %609 = vmatprep.subr.bf16.mxu1 %v2890_v20 }
  0x4f   :  { %569 = vmatpush1.bf16.msra.mxu0 %v2872_v17  ;;  %610 = vmatpush1.bf16.msra.mxu1 %v2914_v27 }
  0x50   :  { %570 = vmatprep.subr.bf16.mxu0 %v2878_v18  ;;  %611 = vmatprep.subr.bf16.mxu1 %v2925_v29 }
  0x53   :  { %571 = vmatpush1.bf16.msra.mxu0 %v2901_v23  ;;  %612 = vmatpush1.bf16.msra.mxu1 %v2938_v32 }
  0x54   :  { %572 = vmatprep.subr.bf16.mxu0 %v2907_v26  ;;  %613 = vmatprep.subr.bf16.mxu1 %v2944_v33 }
  0x57   :  { %573 = vmatpush1.bf16.msra.mxu0 %v2919_v28  ;;  %614 = vmatpush1.bf16.msra.mxu1 %v2960_v37 }
  0x58   :  { %574 = vmatprep.subr.bf16.mxu0 %v2930_v30  ;;  %615 = vmatprep.subr.bf16.mxu1 %v2966_v38 }
  0x5b   :  { %575 = vmatpush1.bf16.msra.mxu0 %v2951_v34  ;;  %616 = vmatpush1.bf16.msra.mxu1 %v2974_v40 }
  0x5c   :  { %874 = vmatprep.subr.bf16.mxu0 %v2777_v0  ;;  %915 = vmatprep.subr.bf16.mxu1 %v2807_v6 }
 0x111   :  { %v281_v59 = vpop.f32.mrb[0].mxu0  ;;  %v322_v60 = vpop.f32.mrb[0].mxu1 }
 0x112   :  { %v329_v61 = vadd.f32 %v281_v59, %v50_v57  ;;  %v283_v62 = vpop.f32.mrb[1].mxu0  ;;  %v324_v63 = vpop.f32.mrb[1].mxu1  ;;  %v331_v44 = vadd.f32 %v322_v60, %v52_v42 }
 0x113   :  { %v330_v21 = vadd.f32 %v283_v62, %v51_v58  ;;  %v285_v22 = vpop.f32.mrb[2].mxu0  ;;  %v326_v24 = vpop.f32.mrb[2].mxu1  ;;  %v332_v41 = vadd.f32 %v324_v63, %v53_v39  ;;  %v2289_v63 = vld [vmem:[%s3475_s1 + $0x28] sm:$0xff] }
 0x114   :  { %v2285_v25 = vmul.f32 -1.442695, %v329_v61  ;;  %v286_v31 = vpop.f32.mrb[3].mxu0  ;;  %v327_v35 = vpop.f32.mrb[3].mxu1 }
 0x115   :  { %v2286_v36 = vmul.f32 -1.442695, %v330_v21  ;;  %v2287_v43 = vmul.f32 -1.442695, %v332_v41 }
 0x116   :  { %2641 = vpow2.f32 %v2285_v25 }
 0x117   :  { %2643 = vpow2.f32 %v2286_v36 }
 0x118   :  { %2645 = vpow2.f32 %v2287_v43  ;;  %v2291_v43 = vld [vmem:[%s3475_s1 + $0x38] sm:$0xff] }
 0x119   :  { %2647 = vtanh.f32 %v331_v44 }
 0x120   :  { %v2642_v45 = vpop.eup %2641 }
 0x121   :  { %v2644_v46 = vpop.eup %2643  ;;  %v337_v47 = vadd.f32 1.0, %v2642_v45  ;;  %v2290_v45 = vld [vmem:[%s3475_s1 + $0x30] sm:$0xff] }
 0x122   :  { %v343_v48 = vadd.f32 1.0, %v2644_v46  ;;  %v2646_v49 = vpop.eup %2645 }
 0x123   :  { %2649 = vrcp.f32 %v337_v47  ;;  %v2648_v50 = vpop.eup %2647  ;;  %v350_v53 = vadd.f32 1.0, %v2646_v49 }
 0x124   :  { %2651 = vrcp.f32 %v343_v48 }
 0x125   :  { %2653 = vrcp.f32 %v350_v53 }
 0x12d   :  { %v2650_v52 = vpop.eup %2649 }
 0x12e   :  { %v2652_v54 = vpop.eup %2651  ;;  %v354_v55 = vmul.f32 %v2650_v52, %v2648_v50 }
 0x12f   :  { %v353_v56 = vmul.f32 %v2652_v54, %v2982_v51  ;;  %v2654_v58 = vpop.eup %2653  ;;  %v2288_v51 = vld [vmem:[%s3475_s1 + $0x20] sm:$0xff] }
 0x131   :  { %v3032_v57 = vadd.f32 %v354_v55, %v353_v56 }
 0x133   :  { %2655 = vtanh.f32 %v3032_v57 }
 0x13d   :  { %v2656_v59 = vpop.eup %2655 }
 0x13e   :  { %v357_v60 = vmul.f32 %v2656_v59, %v2654_v58 }
 0x140   :  { %v358_v61 = vpack.c.bf16 %v357_v60, %v357_v60 }
 0x142   :  { %359 = vst [vmem:[#allocation2] sm:$0xf] %v358_v61  ;;  %361 = vst [vmem:[%s3476_s3] sm:$0xf] %v358_v61 }
 0x149   :  { %v367_v62 = vld [vmem:[#allocation2] sm:$0xf] }
 0x14a   :  { %593 = vmatmul.mubr.bf16.vlgmr.msra.gmra.mrb[4].mxu0 %v367_v62  ;;  %634 = vmatmul.mubr.bf16.vlgmr.msra.gmra.mrb[4].mxu1 %v367_v62 }
 0x14b   :  { %875 = vmatpush1.bf16.msra.mxu0 %v2784_v2  ;;  %916 = vmatpush1.bf16.msra.mxu1 %v2812_v7 }
 0x14c   :  { %876 = vmatprep.subr.bf16.mxu0 %v2790_v3  ;;  %917 = vmatprep.subr.bf16.mxu1 %v2831_v10 }
 0x14d   :  { %906 = vmatprep.mubr.bf16.mxu0 %v2753_v1  ;;  %947 = vmatprep.mubr.bf16.mxu1 %v2753_v1 }
 0x14f   :  { %877 = vmatpush1.bf16.msra.mxu0 %v2796_v4  ;;  %918 = vmatpush1.bf16.msra.mxu1 %v2836_v11 }
 0x150   :  { %878 = vmatprep.subr.bf16.mxu0 %v2802_v5  ;;  %919 = vmatprep.subr.bf16.mxu1 %v2853_v14 }
 0x153   :  { %879 = vmatpush1.bf16.msra.mxu0 %v2818_v8  ;;  %920 = vmatpush1.bf16.msra.mxu1 %v2860_v15 }
 0x154   :  { %880 = vmatprep.subr.bf16.mxu0 %v2825_v9  ;;  %921 = vmatprep.subr.bf16.mxu1 %v2866_v16 }
 0x157   :  { %881 = vmatpush1.bf16.msra.mxu0 %v2843_v12  ;;  %922 = vmatpush1.bf16.msra.mxu1 %v2884_v19 }
 0x158   :  { %882 = vmatprep.subr.bf16.mxu0 %v2848_v13  ;;  %923 = vmatprep.subr.bf16.mxu1 %v2890_v20 }
 0x15b   :  { %883 = vmatpush1.bf16.msra.mxu0 %v2872_v17  ;;  %924 = vmatpush1.bf16.msra.mxu1 %v2914_v27 }
 0x15c   :  { %884 = vmatprep.subr.bf16.mxu0 %v2878_v18  ;;  %925 = vmatprep.subr.bf16.mxu1 %v2925_v29 }
 0x15f   :  { %885 = vmatpush1.bf16.msra.mxu0 %v2901_v23  ;;  %926 = vmatpush1.bf16.msra.mxu1 %v2938_v32 }
 0x160   :  { %886 = vmatprep.subr.bf16.mxu0 %v2907_v26  ;;  %927 = vmatprep.subr.bf16.mxu1 %v2944_v33 }
 0x163   :  { %887 = vmatpush1.bf16.msra.mxu0 %v2919_v28  ;;  %928 = vmatpush1.bf16.msra.mxu1 %v2960_v37 }
 0x164   :  { %888 = vmatprep.subr.bf16.mxu0 %v2930_v30  ;;  %929 = vmatprep.subr.bf16.mxu1 %v2966_v38 }
 0x167   :  { %889 = vmatpush1.bf16.msra.mxu0 %v2951_v34  ;;  %930 = vmatpush1.bf16.msra.mxu1 %v2974_v40 }
 0x168   :  { %1188 = vmatprep.subr.bf16.mxu0 %v2777_v0  ;;  %1229 = vmatprep.subr.bf16.mxu1 %v2807_v6 }
 0x21d   :  { %v594_v21 = vpop.f32.mrb[4].mxu0  ;;  %v635_v22 = vpop.f32.mrb[4].mxu1 }
 0x21e   :  { %v642_v24 = vadd.f32 %v2288_v51, %v594_v21  ;;  %v596_v25 = vpop.f32.mrb[5].mxu0  ;;  %v637_v31 = vpop.f32.mrb[5].mxu1  ;;  %v644_v47 = vadd.f32 %v2290_v45, %v635_v22  ;;  %v3186_v45 = vld [vmem:[%s3473_s2 + $0x28] ss:$16 sps:$4 sm:$0xff]  }
 0x21f   :  { %v643_v35 = vadd.f32 %v2289_v63, %v596_v25  ;;  %v598_v36 = vpop.f32.mrb[6].mxu0  ;;  %v639_v39 = vpop.f32.mrb[6].mxu1  ;;  %v645_v44 = vadd.f32 %v2291_v43, %v637_v31  ;;  %v3176_v43 = vld [vmem:[%s3473_s2 + $0x2c] ss:$16 sps:$4 sm:$0xff]  }
 0x220   :  { %v2324_v41 = vmul.f32 -1.442695, %v642_v24  ;;  %v599_v0 = vpop.f32.mrb[7].mxu0  ;;  %v640_v42 = vpop.f32.mrb[7].mxu1  ;;  %v3147_v39 = vld [vmem:[%s3473_s2 + $0x4] ss:$16 sps:$4 sm:$0xff]  }
 0x221   :  { %v2325_v6 = vmul.f32 -1.442695, %v643_v35  ;;  %v2326_v46 = vmul.f32 -1.442695, %v645_v44  ;;  %v3157_v0 = vld [vmem:[%s3473_s2] ss:$16 sps:$4 sm:$0xff]  }
 0x222   :  { %2657 = vpow2.f32 %v2324_v41  ;;  %v3152_v41 = vld [vmem:[%s3473_s2 + $0xc] ss:$16 sps:$4 sm:$0xff]   ;;  %v3162_v42 = vld [vmem:[%s3473_s2 + $0x8] ss:$16 sps:$4 sm:$0xff]   ;;  %v3181_v44 = vld [vmem:[%s3473_s2 + $0x20] ss:$16 sps:$4 sm:$0xff]  }
 0x223   :  { %2659 = vpow2.f32 %v2325_v6  ;;  %v3171_v6 = vld [vmem:[%s3473_s2 + $0x24] ss:$16 sps:$4 sm:$0xff]  }
 0x224   :  { %2661 = vpow2.f32 %v2326_v46  ;;  %v3195_v46 = vld [vmem:[%s3473_s2 + $0x44] ss:$16 sps:$4 sm:$0xff]  }
 0x225   :  { %2663 = vtanh.f32 %v644_v47  ;;  %v3200_v47 = vld [vmem:[%s3473_s2 + $0x4c] ss:$16 sps:$4 sm:$0xff]  }
 0x22c   :  { %v2658_v48 = vpop.eup %2657 }
 0x22d   :  { %v2660_v49 = vpop.eup %2659  ;;  %v650_v50 = vadd.f32 1.0, %v2658_v48  ;;  %v3205_v48 = vld [vmem:[%s3473_s2 + $0x40] ss:$16 sps:$4 sm:$0xff]  }
 0x22e   :  { %v656_v52 = vadd.f32 1.0, %v2660_v49  ;;  %v2662_v53 = vpop.eup %2661  ;;  %v3210_v49 = vld [vmem:[%s3473_s2 + $0x48] ss:$16 sps:$4 sm:$0xff]  }
 0x22f   :  { %2665 = vrcp.f32 %v650_v50  ;;  %v2664_v54 = vpop.eup %2663  ;;  %v663_v59 = vadd.f32 1.0, %v2662_v53  ;;  %v3219_v50 = vld [vmem:[%s3473_s2 + $0x64] ss:$16 sps:$4 sm:$0xff]   ;;  %v3229_v53 = vld [vmem:[%s3473_s2 + $0x60] ss:$16 sps:$4 sm:$0xff]  }
 0x230   :  { %2667 = vrcp.f32 %v656_v52  ;;  %v3224_v52 = vld [vmem:[%s3473_s2 + $0x6c] ss:$16 sps:$4 sm:$0xff]  }
 0x231   :  { %2669 = vrcp.f32 %v663_v59  ;;  %v3258_v59 = vld [vmem:[%s3473_s2 + $0x88] ss:$16 sps:$4 sm:$0xff]  }
 0x239   :  { %v2666_v55 = vpop.eup %2665 }
 0x23a   :  { %v2668_v56 = vpop.eup %2667  ;;  %v667_v58 = vmul.f32 %v2666_v55, %v2664_v54  ;;  %v3234_v54 = vld [vmem:[%s3473_s2 + $0x68] ss:$16 sps:$4 sm:$0xff]   ;;  %v3243_v55 = vld [vmem:[%s3473_s2 + $0x84] ss:$16 sps:$4 sm:$0xff]  }
 0x23b   :  { %v666_v60 = vmul.f32 %v2668_v56, %v3032_v57  ;;  %v2670_v62 = vpop.eup %2669  ;;  %v3248_v56 = vld [vmem:[%s3473_s2 + $0x8c] ss:$16 sps:$4 sm:$0xff]  }
 0x23d   :  { %v3085_v61 = vadd.f32 %v667_v58, %v666_v60  ;;  %v3253_v58 = vld [vmem:[%s3473_s2 + $0x80] ss:$16 sps:$4 sm:$0xff]   ;;  %v3267_v60 = vld [vmem:[%s3473_s2 + $0xa4] ss:$16 sps:$4 sm:$0xff]  }
 0x23f   :  { %2671 = vtanh.f32 %v3085_v61 }
 0x249   :  { %v2672_v51 = vpop.eup %2671 }
 0x24a   :  { %v670_v63 = vmul.f32 %v2672_v51, %v2670_v62  ;;  %v3277_v62 = vld [vmem:[%s3473_s2 + $0xa0] ss:$16 sps:$4 sm:$0xff]   ;;  %v3282_v51 = vld [vmem:[%s3473_s2 + $0xa8] ss:$16 sps:$4 sm:$0xff]  }
 0x24c   :  { %v671_v21 = vpack.c.bf16 %v670_v63, %v670_v63  ;;  %v3291_v63 = vld [vmem:[%s3473_s2 + $0xc4] ss:$16 sps:$4 sm:$0xff]  }
 0x24e   :  { %672 = vst [vmem:[#allocation2] sm:$0xf] %v671_v21  ;;  %2327 = vst [vmem:[%s3476_s3 + $0x4] sm:$0xf] %v671_v21  ;;  %v3296_v21 = vld [vmem:[%s3473_s2 + $0xcc] ss:$16 sps:$4 sm:$0xff]  }
 0x255   :  { %v681_v22 = vld [vmem:[#allocation2] sm:$0xf] }
 0x256   :  { %907 = vmatmul.mubr.bf16.vlgmr.msra.gmra.mrb[8].mxu0 %v681_v22  ;;  %948 = vmatmul.mubr.bf16.vlgmr.msra.gmra.mrb[8].mxu1 %v681_v22  ;;  %v3301_v22 = vld [vmem:[%s3473_s2 + $0xc0] ss:$16 sps:$4 sm:$0xff]  }
 0x257   :  { %1189 = vmatpush1.bf16.msra.mxu0 %v2784_v2  ;;  %1230 = vmatpush1.bf16.msra.mxu1 %v2812_v7  ;;  %v2328_v2 = vld [vmem:[%s3475_s1 + $0x40] sm:$0xff] }
 0x258   :  { %1190 = vmatprep.subr.bf16.mxu0 %v2790_v3  ;;  %1231 = vmatprep.subr.bf16.mxu1 %v2831_v10  ;;  %v2329_v3 = vld [vmem:[%s3475_s1 + $0x48] sm:$0xff] }
 0x259   :  { %1220 = vmatprep.mubr.bf16.mxu0 %v2753_v1  ;;  %1261 = vmatprep.mubr.bf16.mxu1 %v2753_v1 }
 0x25b   :  { %1191 = vmatpush1.bf16.msra.mxu0 %v2796_v4  ;;  %1232 = vmatpush1.bf16.msra.mxu1 %v2836_v11 }
 0x25c   :  { %1192 = vmatprep.subr.bf16.mxu0 %v2802_v5  ;;  %1233 = vmatprep.subr.bf16.mxu1 %v2853_v14 }
 0x25f   :  { %1193 = vmatpush1.bf16.msra.mxu0 %v2818_v8  ;;  %1234 = vmatpush1.bf16.msra.mxu1 %v2860_v15 }
 0x260   :  { %1194 = vmatprep.subr.bf16.mxu0 %v2825_v9  ;;  %1235 = vmatprep.subr.bf16.mxu1 %v2866_v16 }
 0x263   :  { %1195 = vmatpush1.bf16.msra.mxu0 %v2843_v12  ;;  %1236 = vmatpush1.bf16.msra.mxu1 %v2884_v19  ;;  %v2330_v19 = vld [vmem:[%s3475_s1 + $0x50] sm:$0xff] }
 0x264   :  { %1196 = vmatprep.subr.bf16.mxu0 %v2848_v13  ;;  %1237 = vmatprep.subr.bf16.mxu1 %v2890_v20 }
 0x267   :  { %1197 = vmatpush1.bf16.msra.mxu0 %v2872_v17  ;;  %1238 = vmatpush1.bf16.msra.mxu1 %v2914_v27  ;;  %v2331_v17 = vld [vmem:[%s3475_s1 + $0x58] sm:$0xff] }
 0x268   :  { %1198 = vmatprep.subr.bf16.mxu0 %v2878_v18  ;;  %1239 = vmatprep.subr.bf16.mxu1 %v2925_v29 }
 0x26b   :  { %1199 = vmatpush1.bf16.msra.mxu0 %v2901_v23  ;;  %1240 = vmatpush1.bf16.msra.mxu1 %v2938_v32 }
 0x26c   :  { %1200 = vmatprep.subr.bf16.mxu0 %v2907_v26  ;;  %1241 = vmatprep.subr.bf16.mxu1 %v2944_v33 }
 0x26f   :  { %1201 = vmatpush1.bf16.msra.mxu0 %v2919_v28  ;;  %1242 = vmatpush1.bf16.msra.mxu1 %v2960_v37 }
 0x270   :  { %1202 = vmatprep.subr.bf16.mxu0 %v2930_v30  ;;  %1243 = vmatprep.subr.bf16.mxu1 %v2966_v38 }
 0x273   :  { %1203 = vmatpush1.bf16.msra.mxu0 %v2951_v34  ;;  %1244 = vmatpush1.bf16.msra.mxu1 %v2974_v40 }
 0x274   :  { %1502 = vmatprep.subr.bf16.mxu0 %v3147_v39  ;;  %1543 = vmatprep.subr.bf16.mxu1 %v3152_v41 }
 0x329   :  { %v908_v4 = vpop.f32.mrb[8].mxu0  ;;  %v949_v5 = vpop.f32.mrb[8].mxu1 }
 0x32a   :  { %v956_v7 = vadd.f32 %v2328_v2, %v908_v4  ;;  %v910_v8 = vpop.f32.mrb[9].mxu0  ;;  %v951_v9 = vpop.f32.mrb[9].mxu1  ;;  %v958_v23 = vadd.f32 %v2330_v19, %v949_v5  ;;  %v3306_v2 = vld [vmem:[%s3473_s2 + $0xc8] ss:$16 sps:$4 sm:$0xff]   ;;  %v3318_v4 = vld [vmem:[%s3473_s2 + $0xec] ss:$16 sps:$4 sm:$0xff]  }
 0x32b   :  { %v957_v10 = vadd.f32 %v2329_v3, %v910_v8  ;;  %v912_v11 = vpop.f32.mrb[10].mxu0  ;;  %v953_v12 = vpop.f32.mrb[10].mxu1  ;;  %v959_v18 = vadd.f32 %v2331_v17, %v951_v9  ;;  %v3313_v3 = vld [vmem:[%s3473_s2 + $0xe4] ss:$16 sps:$4 sm:$0xff]   ;;  %v3325_v5 = vld [vmem:[%s3473_s2 + $0xe0] ss:$16 sps:$4 sm:$0xff]  }
 0x32c   :  { %v2364_v13 = vmul.f32 -1.442695, %v956_v7  ;;  %v913_v14 = vpop.f32.mrb[11].mxu0  ;;  %v954_v15 = vpop.f32.mrb[11].mxu1  ;;  %v3330_v7 = vld [vmem:[%s3473_s2 + $0xe8] ss:$16 sps:$4 sm:$0xff]  }
 0x32d   :  { %v2365_v16 = vmul.f32 -1.442695, %v957_v10  ;;  %v2366_v20 = vmul.f32 -1.442695, %v959_v18  ;;  %v2368_v8 = vld [vmem:[%s3475_s1 + $0x60] sm:$0xff]  ;;  %v2369_v9 = vld [vmem:[%s3475_s1 + $0x68] sm:$0xff] }
 0x32e   :  { %2673 = vpow2.f32 %v2364_v13 }
 0x32f   :  { %2675 = vpow2.f32 %v2365_v16 }
 0x330   :  { %2677 = vpow2.f32 %v2366_v20 }
 0x331   :  { %2679 = vtanh.f32 %v958_v23 }
 0x338   :  { %v2674_v26 = vpop.eup %2673 }
 0x339   :  { %v2676_v27 = vpop.eup %2675  ;;  %v964_v28 = vadd.f32 1.0, %v2674_v26  ;;  %v2371_v26 = vld [vmem:[%s3475_s1 + $0x78] sm:$0xff] }
 0x33a   :  { %v970_v29 = vadd.f32 1.0, %v2676_v27  ;;  %v2678_v30 = vpop.eup %2677 }
 0x33b   :  { %2681 = vrcp.f32 %v964_v28  ;;  %v2680_v32 = vpop.eup %2679  ;;  %v977_v38 = vadd.f32 1.0, %v2678_v30  ;;  %v2370_v28 = vld [vmem:[%s3475_s1 + $0x70] sm:$0xff] }
 0x33c   :  { %2683 = vrcp.f32 %v970_v29 }
 0x33d   :  { %2685 = vrcp.f32 %v977_v38 }
 0x345   :  { %v2682_v33 = vpop.eup %2681 }
 0x346   :  { %v2684_v34 = vpop.eup %2683  ;;  %v981_v37 = vmul.f32 %v2682_v33, %v2680_v32 }
 0x347   :  { %v980_v40 = vmul.f32 %v2684_v34, %v3085_v61  ;;  %v2686_v24 = vpop.eup %2685  ;;  %v3272_v61 = vld [vmem:[%s3473_s2 + $0xac] ss:$16 sps:$4 sm:$0xff]  }
 0x349   :  { %v3136_v57 = vadd.f32 %v981_v37, %v980_v40 }
 0x34b   :  { %2687 = vtanh.f32 %v3136_v57 }
 0x355   :  { %v2688_v25 = vpop.eup %2687 }
 0x356   :  { %v984_v31 = vmul.f32 %v2688_v25, %v2686_v24 }
 0x358   :  { %v985_v35 = vpack.c.bf16 %v984_v31, %v984_v31 }
 0x35a   :  { %986 = vst [vmem:[#allocation2] sm:$0xf] %v985_v35  ;;  %2367 = vst [vmem:[%s3476_s3 + $0x8] sm:$0xf] %v985_v35 }
 0x361   :  { %v995_v36 = vld [vmem:[#allocation2] sm:$0xf] }
 0x362   :  { %1221 = vmatmul.mubr.bf16.vlgmr.msra.gmra.mrb[12].mxu0 %v995_v36  ;;  %1262 = vmatmul.mubr.bf16.vlgmr.msra.gmra.mrb[12].mxu1 %v995_v36 }
 0x363   :  { %1534 = vmatprep.mubr.bf16.mxu0 %v2753_v1  ;;  %1575 = vmatprep.mubr.bf16.mxu1 %v2753_v1 }
 0x364   :  { %1503 = vmatpush1.bf16.msra.mxu0 %v3157_v0  ;;  %1544 = vmatpush1.bf16.msra.mxu1 %v3162_v42 }
 0x365   :  { %1504 = vmatprep.subr.bf16.mxu0 %v3171_v6  ;;  %1545 = vmatprep.subr.bf16.mxu1 %v3176_v43 }
 0x368   :  { %1505 = vmatpush1.bf16.msra.mxu0 %v3181_v44  ;;  %1546 = vmatpush1.bf16.msra.mxu1 %v3186_v45 }
 0x369   :  { %1506 = vmatprep.subr.bf16.mxu0 %v3195_v46  ;;  %1547 = vmatprep.subr.bf16.mxu1 %v3200_v47 }
 0x36c   :  { %1507 = vmatpush1.bf16.msra.mxu0 %v3205_v48  ;;  %1548 = vmatpush1.bf16.msra.mxu1 %v3210_v49 }
 0x36d   :  { %1508 = vmatprep.subr.bf16.mxu0 %v3219_v50  ;;  %1549 = vmatprep.subr.bf16.mxu1 %v3224_v52 }
 0x370   :  { %1509 = vmatpush1.bf16.msra.mxu0 %v3229_v53  ;;  %1550 = vmatpush1.bf16.msra.mxu1 %v3234_v54 }
 0x371   :  { %1510 = vmatprep.subr.bf16.mxu0 %v3243_v55  ;;  %1551 = vmatprep.subr.bf16.mxu1 %v3248_v56 }
 0x374   :  { %1511 = vmatpush1.bf16.msra.mxu0 %v3253_v58  ;;  %1552 = vmatpush1.bf16.msra.mxu1 %v3258_v59 }
 0x375   :  { %1512 = vmatprep.subr.bf16.mxu0 %v3267_v60  ;;  %1553 = vmatprep.subr.bf16.mxu1 %v3272_v61 }
 0x378   :  { %1513 = vmatpush1.bf16.msra.mxu0 %v3277_v62  ;;  %1554 = vmatpush1.bf16.msra.mxu1 %v3282_v51 }
 0x379   :  { %1514 = vmatprep.subr.bf16.mxu0 %v3291_v63  ;;  %1555 = vmatprep.subr.bf16.mxu1 %v3296_v21 }
 0x37c   :  { %1515 = vmatpush1.bf16.msra.mxu0 %v3301_v22  ;;  %1556 = vmatpush1.bf16.msra.mxu1 %v3306_v2 }
 0x37d   :  { %1516 = vmatprep.subr.bf16.mxu0 %v3313_v3  ;;  %1557 = vmatprep.subr.bf16.mxu1 %v3318_v4 }
 0x380   :  { %1517 = vmatpush1.bf16.msra.mxu0 %v3325_v5  ;;  %1558 = vmatpush1.bf16.msra.mxu1 %v3330_v7 }
 0x381   :  { %1816 = vmatprep.subr.bf16.mxu0 %v3147_v39  ;;  %1857 = vmatprep.subr.bf16.mxu1 %v3152_v41 }
 0x435   :  { %v1222_v10 = vpop.f32.mrb[12].mxu0  ;;  %v1263_v11 = vpop.f32.mrb[12].mxu1 }
 0x436   :  { %v1270_v12 = vadd.f32 %v2368_v8, %v1222_v10  ;;  %v1224_v13 = vpop.f32.mrb[13].mxu0  ;;  %v1265_v14 = vpop.f32.mrb[13].mxu1  ;;  %v1272_v30 = vadd.f32 %v2370_v28, %v1263_v11 }
 0x437   :  { %v1271_v15 = vadd.f32 %v2369_v9, %v1224_v13  ;;  %v1226_v16 = vpop.f32.mrb[14].mxu0  ;;  %v1267_v17 = vpop.f32.mrb[14].mxu1  ;;  %v1273_v27 = vadd.f32 %v2371_v26, %v1265_v14  ;;  %v2409_v14 = vld [vmem:[%s3475_s1 + $0x88] sm:$0xff] }
 0x438   :  { %v2404_v18 = vmul.f32 -1.442695, %v1270_v12  ;;  %v1227_v19 = vpop.f32.mrb[15].mxu0  ;;  %v1268_v20 = vpop.f32.mrb[15].mxu1 }
 0x439   :  { %v2405_v23 = vmul.f32 -1.442695, %v1271_v15  ;;  %v2406_v29 = vmul.f32 -1.442695, %v1273_v27 }
 0x43a   :  { %2689 = vpow2.f32 %v2404_v18 }
 0x43b   :  { %2691 = vpow2.f32 %v2405_v23 }
 0x43c   :  { %2693 = vpow2.f32 %v2406_v29  ;;  %v2411_v29 = vld [vmem:[%s3475_s1 + $0x98] sm:$0xff] }
 0x43d   :  { %2695 = vtanh.f32 %v1272_v30 }
 0x444   :  { %v2690_v32 = vpop.eup %2689 }
 0x445   :  { %v2692_v33 = vpop.eup %2691  ;;  %v1278_v34 = vadd.f32 1.0, %v2690_v32  ;;  %v2410_v32 = vld [vmem:[%s3475_s1 + $0x90] sm:$0xff] }
 0x446   :  { %v1284_v37 = vadd.f32 1.0, %v2692_v33  ;;  %v2694_v38 = vpop.eup %2693 }
 0x447   :  { %2697 = vrcp.f32 %v1278_v34  ;;  %v2696_v40 = vpop.eup %2695  ;;  %v1291_v35 = vadd.f32 1.0, %v2694_v38 }
 0x448   :  { %2699 = vrcp.f32 %v1284_v37 }
 0x449   :  { %2701 = vrcp.f32 %v1291_v35 }
 0x451   :  { %v2698_v24 = vpop.eup %2697 }
 0x452   :  { %v2700_v25 = vpop.eup %2699  ;;  %v1295_v31 = vmul.f32 %v2698_v24, %v2696_v40 }
 0x453   :  { %v1294_v36 = vmul.f32 %v2700_v25, %v3136_v57  ;;  %v2702_v9 = vpop.eup %2701  ;;  %v2408_v57 = vld [vmem:[%s3475_s1 + $0x80] sm:$0xff] }
 0x455   :  { %v3351_v8 = vadd.f32 %v1295_v31, %v1294_v36 }
 0x457   :  { %2703 = vtanh.f32 %v3351_v8 }
 0x461   :  { %v2704_v10 = vpop.eup %2703 }
 0x462   :  { %v1298_v11 = vmul.f32 %v2704_v10, %v2702_v9 }
 0x464   :  { %v1299_v12 = vpack.c.bf16 %v1298_v11, %v1298_v11 }
 0x466   :  { %1300 = vst [vmem:[#allocation2] sm:$0xf] %v1299_v12  ;;  %2407 = vst [vmem:[%s3476_s3 + $0xc] sm:$0xf] %v1299_v12 }
 0x46d   :  { %v1309_v13 = vld [vmem:[#allocation2] sm:$0xf] }
 0x46e   :  { %1535 = vmatmul.mubr.bf16.vlgmr.msra.gmra.mrb[16].mxu0 %v1309_v13  ;;  %1576 = vmatmul.mubr.bf16.vlgmr.msra.gmra.mrb[16].mxu1 %v1309_v13 }
 0x46f   :  { %1817 = vmatpush1.bf16.msra.mxu0 %v3157_v0  ;;  %1858 = vmatpush1.bf16.msra.mxu1 %v3162_v42 }
 0x470   :  { %1818 = vmatprep.subr.bf16.mxu0 %v3171_v6  ;;  %1859 = vmatprep.subr.bf16.mxu1 %v3176_v43 }
 0x471   :  { %1848 = vmatprep.mubr.bf16.mxu0 %v2753_v1  ;;  %1889 = vmatprep.mubr.bf16.mxu1 %v2753_v1 }
 0x473   :  { %1819 = vmatpush1.bf16.msra.mxu0 %v3181_v44  ;;  %1860 = vmatpush1.bf16.msra.mxu1 %v3186_v45 }
 0x474   :  { %1820 = vmatprep.subr.bf16.mxu0 %v3195_v46  ;;  %1861 = vmatprep.subr.bf16.mxu1 %v3200_v47 }
 0x477   :  { %1821 = vmatpush1.bf16.msra.mxu0 %v3205_v48  ;;  %1862 = vmatpush1.bf16.msra.mxu1 %v3210_v49 }
 0x478   :  { %1822 = vmatprep.subr.bf16.mxu0 %v3219_v50  ;;  %1863 = vmatprep.subr.bf16.mxu1 %v3224_v52 }
 0x47b   :  { %1823 = vmatpush1.bf16.msra.mxu0 %v3229_v53  ;;  %1864 = vmatpush1.bf16.msra.mxu1 %v3234_v54 }
 0x47c   :  { %1824 = vmatprep.subr.bf16.mxu0 %v3243_v55  ;;  %1865 = vmatprep.subr.bf16.mxu1 %v3248_v56 }
 0x47f   :  { %1825 = vmatpush1.bf16.msra.mxu0 %v3253_v58  ;;  %1866 = vmatpush1.bf16.msra.mxu1 %v3258_v59 }
 0x480   :  { %1826 = vmatprep.subr.bf16.mxu0 %v3267_v60  ;;  %1867 = vmatprep.subr.bf16.mxu1 %v3272_v61 }
 0x483   :  { %1827 = vmatpush1.bf16.msra.mxu0 %v3277_v62  ;;  %1868 = vmatpush1.bf16.msra.mxu1 %v3282_v51 }
 0x484   :  { %1828 = vmatprep.subr.bf16.mxu0 %v3291_v63  ;;  %1869 = vmatprep.subr.bf16.mxu1 %v3296_v21 }
 0x487   :  { %1829 = vmatpush1.bf16.msra.mxu0 %v3301_v22  ;;  %1870 = vmatpush1.bf16.msra.mxu1 %v3306_v2 }
 0x488   :  { %1830 = vmatprep.subr.bf16.mxu0 %v3313_v3  ;;  %1871 = vmatprep.subr.bf16.mxu1 %v3318_v4 }
 0x48b   :  { %1831 = vmatpush1.bf16.msra.mxu0 %v3325_v5  ;;  %1872 = vmatpush1.bf16.msra.mxu1 %v3330_v7 }
 0x48c   :  { %2130 = vmatprep.subr.bf16.mxu0 %v3147_v39  ;;  %2171 = vmatprep.subr.bf16.mxu1 %v3152_v41 }
 0x541   :  { %v1536_v15 = vpop.f32.mrb[16].mxu0  ;;  %v1577_v16 = vpop.f32.mrb[16].mxu1 }
 0x542   :  { %v1584_v17 = vadd.f32 %v2408_v57, %v1536_v15  ;;  %v1538_v18 = vpop.f32.mrb[17].mxu0  ;;  %v1579_v19 = vpop.f32.mrb[17].mxu1  ;;  %v1586_v34 = vadd.f32 %v2410_v32, %v1577_v16 }
 0x543   :  { %v1585_v20 = vadd.f32 %v2409_v14, %v1538_v18  ;;  %v1540_v23 = vpop.f32.mrb[18].mxu0  ;;  %v1581_v26 = vpop.f32.mrb[18].mxu1  ;;  %v1587_v30 = vadd.f32 %v2411_v29, %v1579_v19 }
 0x544   :  { %v2444_v27 = vmul.f32 -1.442695, %v1584_v17  ;;  %v1541_v39 = vpop.f32.mrb[19].mxu0  ;;  %v1582_v28 = vpop.f32.mrb[19].mxu1  ;;  %v2488_v23 = vld [vmem:[%s3475_s1 + $0xc0] sm:$0xff]  ;;  %v2489_v26 = vld [vmem:[%s3475_s1 + $0xc8] sm:$0xff] }
 0x545   :  { %v2445_v41 = vmul.f32 -1.442695, %v1585_v20  ;;  %v2446_v33 = vmul.f32 -1.442695, %v1587_v30 }
 0x546   :  { %2705 = vpow2.f32 %v2444_v27 }
 0x547   :  { %2707 = vpow2.f32 %v2445_v41 }
 0x548   :  { %2709 = vpow2.f32 %v2446_v33 }
 0x549   :  { %2711 = vtanh.f32 %v1586_v34 }
 0x550   :  { %v2706_v37 = vpop.eup %2705 }
 0x551   :  { %v2708_v38 = vpop.eup %2707  ;;  %v1592_v40 = vadd.f32 1.0, %v2706_v37 }
 0x552   :  { %v1598_v24 = vadd.f32 1.0, %v2708_v38  ;;  %v2710_v25 = vpop.eup %2709 }
 0x553   :  { %2713 = vrcp.f32 %v1592_v40  ;;  %v2712_v31 = vpop.eup %2711  ;;  %v1605_v10 = vadd.f32 1.0, %v2710_v25 }
 0x554   :  { %2715 = vrcp.f32 %v1598_v24  ;;  %v2491_v24 = vld [vmem:[%s3475_s1 + $0xd8] sm:$0xff] }
 0x555   :  { %2717 = vrcp.f32 %v1605_v10 }
 0x55d   :  { %v2714_v35 = vpop.eup %2713 }
 0x55e   :  { %v2716_v36 = vpop.eup %2715  ;;  %v1609_v9 = vmul.f32 %v2714_v35, %v2712_v31  ;;  %v2490_v31 = vld [vmem:[%s3475_s1 + $0xd0] sm:$0xff] }
 0x55f   :  { %v1608_v11 = vmul.f32 %v2716_v36, %v3351_v8  ;;  %v2718_v13 = vpop.eup %2717 }
 0x561   :  { %v3404_v12 = vadd.f32 %v1609_v9, %v1608_v11 }
 0x563   :  { %2719 = vtanh.f32 %v3404_v12 }
 0x56d   :  { %v2720_v57 = vpop.eup %2719 }
 0x56e   :  { %v1612_v14 = vmul.f32 %v2720_v57, %v2718_v13 }
 0x570   :  { %v1613_v15 = vpack.c.bf16 %v1612_v14, %v1612_v14 }
 0x572   :  { %2447 = vst [vmem:[%s3476_s3 + $0x10] sm:$0xf] %v1613_v15  ;;  %1614 = vst [vmem:[#allocation2] sm:$0xf] %v1613_v15 }
 0x579   :  { %v1623_v16 = vld [vmem:[#allocation2] sm:$0xf] }
 0x57a   :  { %1849 = vmatmul.mubr.bf16.vlgmr.msra.gmra.mrb[20].mxu0 %v1623_v16  ;;  %1890 = vmatmul.mubr.bf16.vlgmr.msra.gmra.mrb[20].mxu1 %v1623_v16 }
 0x57b   :  { %2131 = vmatpush1.bf16.msra.mxu0 %v3157_v0  ;;  %2172 = vmatpush1.bf16.msra.mxu1 %v3162_v42  ;;  %v2449_v0 = vld [vmem:[%s3475_s1 + $0xa8] sm:$0xff] }
 0x57c   :  { %2132 = vmatprep.subr.bf16.mxu0 %v3171_v6  ;;  %2173 = vmatprep.subr.bf16.mxu1 %v3176_v43 }
 0x57d   :  { %2162 = vmatprep.mubr.bf16.mxu0 %v2753_v1  ;;  %2203 = vmatprep.mubr.bf16.mxu1 %v2753_v1  ;;  %v2448_v1 = vld [vmem:[%s3475_s1 + $0xa0] sm:$0xff] }
 0x57f   :  { %2133 = vmatpush1.bf16.msra.mxu0 %v3181_v44  ;;  %2174 = vmatpush1.bf16.msra.mxu1 %v3186_v45 }
 0x580   :  { %2134 = vmatprep.subr.bf16.mxu0 %v3195_v46  ;;  %2175 = vmatprep.subr.bf16.mxu1 %v3200_v47 }
 0x583   :  { %2135 = vmatpush1.bf16.msra.mxu0 %v3205_v48  ;;  %2176 = vmatpush1.bf16.msra.mxu1 %v3210_v49 }
 0x584   :  { %2136 = vmatprep.subr.bf16.mxu0 %v3219_v50  ;;  %2177 = vmatprep.subr.bf16.mxu1 %v3224_v52 }
 0x587   :  { %2137 = vmatpush1.bf16.msra.mxu0 %v3229_v53  ;;  %2178 = vmatpush1.bf16.msra.mxu1 %v3234_v54  ;;  %v2451_v54 = vld [vmem:[%s3475_s1 + $0xb8] sm:$0xff] }
 0x588   :  { %2138 = vmatprep.subr.bf16.mxu0 %v3243_v55  ;;  %2179 = vmatprep.subr.bf16.mxu1 %v3248_v56  ;;  %v2450_v56 = vld [vmem:[%s3475_s1 + $0xb0] sm:$0xff] }
 0x58b   :  { %2139 = vmatpush1.bf16.msra.mxu0 %v3253_v58  ;;  %2180 = vmatpush1.bf16.msra.mxu1 %v3258_v59 }
 0x58c   :  { %2140 = vmatprep.subr.bf16.mxu0 %v3267_v60  ;;  %2181 = vmatprep.subr.bf16.mxu1 %v3272_v61 }
 0x58f   :  { %2141 = vmatpush1.bf16.msra.mxu0 %v3277_v62  ;;  %2182 = vmatpush1.bf16.msra.mxu1 %v3282_v51 }
 0x590   :  { %2142 = vmatprep.subr.bf16.mxu0 %v3291_v63  ;;  %2183 = vmatprep.subr.bf16.mxu1 %v3296_v21 }
 0x593   :  { %2143 = vmatpush1.bf16.msra.mxu0 %v3301_v22  ;;  %2184 = vmatpush1.bf16.msra.mxu1 %v3306_v2 }
 0x594   :  { %2144 = vmatprep.subr.bf16.mxu0 %v3313_v3  ;;  %2185 = vmatprep.subr.bf16.mxu1 %v3318_v4 }
 0x597   :  { %2145 = vmatpush1.bf16.msra.mxu0 %v3325_v5  ;;  %2186 = vmatpush1.bf16.msra.mxu1 %v3330_v7 }
 0x64d   :  { %v1850_v42 = vpop.f32.mrb[20].mxu0  ;;  %v1891_v6 = vpop.f32.mrb[20].mxu1 }
 0x64e   :  { %v1898_v43 = vadd.f32 %v2448_v1, %v1850_v42  ;;  %v1852_v44 = vpop.f32.mrb[21].mxu0  ;;  %v1893_v45 = vpop.f32.mrb[21].mxu1  ;;  %v1900_v59 = vadd.f32 %v2450_v56, %v1891_v6 }
 0x64f   :  { %v1899_v46 = vadd.f32 %v2449_v0, %v1852_v44  ;;  %v1854_v47 = vpop.f32.mrb[22].mxu0  ;;  %v1895_v48 = vpop.f32.mrb[22].mxu1  ;;  %v1901_v55 = vadd.f32 %v2451_v54, %v1893_v45 }
 0x650   :  { %v2484_v49 = vmul.f32 -1.442695, %v1898_v43  ;;  %v1855_v50 = vpop.f32.mrb[23].mxu0  ;;  %v1896_v52 = vpop.f32.mrb[23].mxu1 }
 0x651   :  { %v2485_v53 = vmul.f32 -1.442695, %v1899_v46  ;;  %v2486_v58 = vmul.f32 -1.442695, %v1901_v55 }
 0x652   :  { %2721 = vpow2.f32 %v2484_v49 }
 0x653   :  { %2723 = vpow2.f32 %v2485_v53 }
 0x654   :  { %2725 = vpow2.f32 %v2486_v58 }
 0x655   :  { %2727 = vtanh.f32 %v1900_v59 }
 0x65c   :  { %v2722_v60 = vpop.eup %2721 }
 0x65d   :  { %v2724_v61 = vpop.eup %2723  ;;  %v1906_v62 = vadd.f32 1.0, %v2722_v60 }
 0x65e   :  { %v1912_v51 = vadd.f32 1.0, %v2724_v61  ;;  %v2726_v63 = vpop.eup %2725 }
 0x65f   :  { %2729 = vrcp.f32 %v1906_v62  ;;  %v2728_v21 = vpop.eup %2727  ;;  %v1919_v4 = vadd.f32 1.0, %v2726_v63 }
 0x660   :  { %2731 = vrcp.f32 %v1912_v51 }
 0x661   :  { %2733 = vrcp.f32 %v1919_v4 }
 0x669   :  { %v2730_v22 = vpop.eup %2729 }
 0x66a   :  { %v2732_v2 = vpop.eup %2731  ;;  %v1923_v3 = vmul.f32 %v2730_v22, %v2728_v21 }
 0x66b   :  { %v1922_v5 = vmul.f32 %v2732_v2, %v3404_v12  ;;  %v2734_v8 = vpop.eup %2733 }
 0x66d   :  { %v1924_v7 = vadd.f32 %v1923_v3, %v1922_v5 }
 0x66f   :  { %2735 = vtanh.f32 %v1924_v7 }
 0x679   :  { %v2736_v17 = vpop.eup %2735 }
 0x67a   :  { %v1926_v18 = vmul.f32 %v2736_v17, %v2734_v8 }
 0x67c   :  { %v1927_v19 = vpack.c.bf16 %v1926_v18, %v1926_v18 }
 0x67e   :  { %2487 = vst [vmem:[%s3476_s3 + $0x14] sm:$0xf] %v1927_v19  ;;  %1928 = vst [vmem:[#allocation2] sm:$0xf] %v1927_v19 }
 0x685   :  { %v1937_v20 = vld [vmem:[#allocation2] sm:$0xf] }
 0x686   :  { %2163 = vmatmul.mubr.bf16.vlgmr.msra.gmra.mrb[24].mxu0 %v1937_v20  ;;  %2204 = vmatmul.mubr.bf16.vlgmr.msra.gmra.mrb[24].mxu1 %v1937_v20 }
 0x759   :  { %v2164_v27 = vpop.f32.mrb[24].mxu0  ;;  %v2205_v39 = vpop.f32.mrb[24].mxu1 }
 0x75a   :  { %v2212_v28 = vadd.f32 %v2488_v23, %v2164_v27  ;;  %v2166_v41 = vpop.f32.mrb[25].mxu0  ;;  %v2207_v29 = vpop.f32.mrb[25].mxu1  ;;  %v2214_v36 = vadd.f32 %v2490_v31, %v2205_v39 }
 0x75b   :  { %v2213_v30 = vadd.f32 %v2489_v26, %v2166_v41  ;;  %v2168_v32 = vpop.f32.mrb[26].mxu0  ;;  %v2209_v33 = vpop.f32.mrb[26].mxu1  ;;  %v2215_v25 = vadd.f32 %v2491_v24, %v2207_v29 }
 0x75c   :  { %v2524_v34 = vmul.f32 -1.442695, %v2212_v28  ;;  %v2169_v37 = vpop.f32.mrb[27].mxu0  ;;  %v2210_v38 = vpop.f32.mrb[27].mxu1 }
 0x75d   :  { %v2525_v40 = vmul.f32 -1.442695, %v2213_v30  ;;  %v2526_v35 = vmul.f32 -1.442695, %v2215_v25 }
 0x75e   :  { %2737 = vpow2.f32 %v2524_v34 }
 0x75f   :  { %2739 = vpow2.f32 %v2525_v40 }
 0x760   :  { %2741 = vpow2.f32 %v2526_v35 }
 0x761   :  { %2743 = vtanh.f32 %v2214_v36 }
 0x768   :  { %v2738_v9 = vpop.eup %2737 }
 0x769   :  { %v2740_v10 = vpop.eup %2739  ;;  %v2220_v11 = vadd.f32 1.0, %v2738_v9 }
 0x76a   :  { %v2226_v12 = vadd.f32 1.0, %v2740_v10  ;;  %v2742_v13 = vpop.eup %2741 }
 0x76b   :  { %2745 = vrcp.f32 %v2220_v11  ;;  %v2744_v57 = vpop.eup %2743  ;;  %v2233_v1 = vadd.f32 1.0, %v2742_v13 }
 0x76c   :  { %2747 = vrcp.f32 %v2226_v12 }
 0x76d   :  { %2749 = vrcp.f32 %v2233_v1 }
 0x775   :  { %v2746_v14 = vpop.eup %2745 }
 0x776   :  { %v2748_v15 = vpop.eup %2747  ;;  %v2237_v16 = vmul.f32 %v2746_v14, %v2744_v57 }
 0x777   :  { %v2236_v0 = vmul.f32 %v2748_v15, %v1924_v7  ;;  %v2750_v6 = vpop.eup %2749 }
 0x779   :  { %v2238_v42 = vadd.f32 %v2237_v16, %v2236_v0 }
 0x77b   :  { %2751 = vtanh.f32 %v2238_v42 }
 0x785   :  { %v2752_v43 = vpop.eup %2751 }
 0x786   :  { %v2240_v44 = vmul.f32 %v2752_v43, %v2750_v6 }
 0x788   :  { %v2241_v45 = vpack.c.bf16 %v2240_v44, %v2240_v44 }
 0x78a   :  { %2242 = vst [vmem:[#allocation2] sm:$0xf] %v2241_v45  ;;  %2527 = vst [vmem:[%s3476_s3 + $0x18] sm:$0xf] %v2241_v45 }

// kernel: forward_xe.3
= control target key start
LH: loop header
LB: loop body
LE: loop exit
PB: predicated region body
PF: predicated region fallthrough
CT: control target
= control target key end

     0   :  { %v337_v1 = vmov 0   ;;  %vm117_vm0 = vcmask 261120   ;;  %v39_v27 = vlaneseq  ;;  %s534_s1 = inlined_call_operand.vmem [shape: bf16[32,512], index: 1, kind: input, shape index: {}]   ;;  %s535_s0 = inlined_call_operand.vmem [shape: bf16[56,32], index: 0, kind: input, shape index: {}]   ;;  %s536_s2 = inlined_call_operand.vmem [shape: f32[1,512], index: 2, kind: input, shape index: {}]   ;;  %s537_s3 = inlined_call_operand.vmem [shape: f32[56,512], index: 3, kind: output, shape index: {}]  }
   0x1   :  { %v325_v0 = vld [vmem:[%s534_s1 + $0x4] ss:$16 sps:$4 sm:$0xff]   ;;  %162 = vmatprep.mubr.bf16.mxu0 %v337_v1  ;;  %233 = vmatprep.mubr.bf16.mxu1 %v337_v1  ;;  %v327_v2 = vld [vmem:[%s534_s1 + $0xc] ss:$16 sps:$4 sm:$0xff]   ;;  %v329_v3 = vld [vmem:[%s534_s1] ss:$16 sps:$4 sm:$0xff]  }
   0x2   :  { %130 = vmatprep.subr.bf16.mxu0 %v325_v0  ;;  %v330_v4 = vld [vmem:[%s534_s1 + $0x8] ss:$16 sps:$4 sm:$0xff]   ;;  %201 = vmatprep.subr.bf16.mxu1 %v327_v2  ;;  %v331_v5 = vld [vmem:[%s534_s1 + $0x24] ss:$16 sps:$4 sm:$0xff]   ;;  %v333_v6 = vld [vmem:[%s534_s1 + $0x2c] ss:$16 sps:$4 sm:$0xff]  }
   0x3   :  { %131 = vmatpush1.bf16.msra.mxu0 %v329_v3  ;;  %202 = vmatpush1.bf16.msra.mxu1 %v330_v4  ;;  %v335_v7 = vld [vmem:[%s534_s1 + $0x20] ss:$16 sps:$4 sm:$0xff]   ;;  %v336_v8 = vld [vmem:[%s534_s1 + $0x28] ss:$16 sps:$4 sm:$0xff]   ;;  %v16_v10 = vld [vmem:[%s535_s0 + $0x4] sm:$0xf] }
   0x4   :  { %132 = vmatprep.subr.bf16.mxu0 %v331_v5  ;;  %v15_v9 = vld [vmem:[%s535_s0] sm:$0xf]  ;;  %203 = vmatprep.subr.bf16.mxu1 %v333_v6  ;;  %v23_v12 = vmax.bf16 %v337_v1, %v16_v10  ;;  %v17_v14 = vld [vmem:[%s535_s0 + $0x8] sm:$0xf]  ;;  %v18_v15 = vld [vmem:[%s535_s0 + $0xc] sm:$0xf] }
   0x5   :  { %v22_v11 = vmax.bf16 %v337_v1, %v15_v9  ;;  %v24_v16 = vmax.bf16 %v337_v1, %v17_v14  ;;  %v25_v17 = vmax.bf16 %v337_v1, %v18_v15  ;;  %v19_v19 = vld [vmem:[%s535_s0 + $0x10] sm:$0xf]  ;;  %v20_v20 = vld [vmem:[%s535_s0 + $0x14] sm:$0xf]  ;;  %v21_v24 = vld [vmem:[%s535_s0 + $0x18] sm:$0xf] }
   0x6   :  { %v26_v21 = vmax.bf16 %v337_v1, %v19_v19  ;;  %v27_v22 = vmax.bf16 %v337_v1, %v20_v20  ;;  %v28_v25 = vmax.bf16 %v337_v1, %v21_v24  ;;  %v40_v28 = vshrl.u32 %v39_v27, 7  ;;  %v37_v31 = vld [vmem:[%s536_s2] sm:$0xf] }
   0x7   :  { %133 = vmatpush1.bf16.msra.mxu0 %v335_v7  ;;  %204 = vmatpush1.bf16.msra.mxu1 %v336_v8  ;;  %v304_v13 = vcombine.low %v22_v11, %v23_v12  ;;  %v305_v18 = vcombine.low %v24_v16, %v25_v17 }
   0x8   :  { %v306_v23 = vcombine.low %v26_v21, %v27_v22  ;;  %v307_v26 = vcombine.low %v28_v25, %v28_v25  ;;  %v41_v29 = vsub.s32 0, %v40_v28  ;;  %v49_v30 = vsub.s32 2, %v40_v28 }
   0x9   :  { %v45_v32 = vsub.s32 1, %v40_v28  ;;  %v53_v33 = vsub.s32 3, %v40_v28 }
   0xa   :  { %316 = vmatmul.mubr.msk.bf16.vlgmr.msra.gmra.mrb[0].mxu0 %vm117_vm0, %v304_v13  ;;  %320 = vmatmul.mubr.msk.bf16.vlgmr.msra.gmra.mrb[0].mxu1 %vm117_vm0, %v304_v13  ;;  %v414_v34 = vrot.slane %v37_v31, %v41_v29  ;;  %v416_v35 = vrot.slane %v37_v31, %v49_v30 }
   0xb   :  { %172 = vmatprep.mubr.bf16.mxu0 %v337_v1  ;;  %243 = vmatprep.mubr.bf16.mxu1 %v337_v1  ;;  %v418_v36 = vrot.slane %v37_v31, %v45_v32  ;;  %v420_v37 = vrot.slane %v37_v31, %v53_v33 }
  0x12   :  { %317 = vmatmul.mubr.msk.bf16.gmra.mrb[4].mxu0 %vm117_vm0, %v305_v18  ;;  %321 = vmatmul.mubr.msk.bf16.gmra.mrb[4].mxu1 %vm117_vm0, %v305_v18 }
  0x13   :  { %182 = vmatprep.mubr.bf16.mxu0 %v337_v1  ;;  %253 = vmatprep.mubr.bf16.mxu1 %v337_v1 }
  0x1a   :  { %318 = vmatmul.mubr.msk.bf16.gmra.mrb[8].mxu0 %vm117_vm0, %v306_v23  ;;  %322 = vmatmul.mubr.msk.bf16.gmra.mrb[8].mxu1 %vm117_vm0, %v306_v23 }
  0x1b   :  { %192 = vmatprep.mubr.bf16.mxu0 %v337_v1  ;;  %263 = vmatprep.mubr.bf16.mxu1 %v337_v1 }
  0x22   :  { %319 = vmatmul.mubr.msk.bf16.gmra.mrb[12].mxu0 %vm117_vm0, %v307_v26  ;;  %323 = vmatmul.mubr.msk.bf16.gmra.mrb[12].mxu1 %vm117_vm0, %v307_v26 }
  0xdd   :  { %v164_v38 = vpop.f32.mrb[0].mxu0  ;;  %v235_v39 = vpop.f32.mrb[0].mxu1 }
  0xde   :  { %v165_v40 = vadd.f32 %v164_v38, %v414_v34  ;;  %v236_v41 = vadd.f32 %v235_v39, %v416_v35  ;;  %v166_v42 = vpop.f32.mrb[1].mxu0  ;;  %v237_v43 = vpop.f32.mrb[1].mxu1 }
  0xdf   :  { %v167_v44 = vadd.f32 %v166_v42, %v418_v36  ;;  %v238_v45 = vadd.f32 %v237_v43, %v420_v37  ;;  %v168_v46 = vpop.f32.mrb[2].mxu0  ;;  %v239_v47 = vpop.f32.mrb[2].mxu1 }
  0xe0   :  { %272 = vst [vmem:[%s537_s3] sm:$0xff] %v165_v40  ;;  %274 = vst [vmem:[%s537_s3 + $0x10] sm:$0xff] %v236_v41  ;;  %v169_v48 = vadd.f32 %v168_v46, %v414_v34  ;;  %v240_v49 = vadd.f32 %v239_v47, %v416_v35  ;;  %v170_v50 = vpop.f32.mrb[3].mxu0  ;;  %v241_v51 = vpop.f32.mrb[3].mxu1 }
  0xe1   :  { %273 = vst [vmem:[%s537_s3 + $0x8] sm:$0xff] %v167_v44  ;;  %275 = vst [vmem:[%s537_s3 + $0x18] sm:$0xff] %v238_v45  ;;  %v171_v52 = vadd.f32 %v170_v50, %v418_v36  ;;  %v242_v53 = vadd.f32 %v241_v51, %v420_v37 }
  0xe2   :  { %276 = vst [vmem:[%s537_s3 + $0x20] sm:$0xff] %v169_v48  ;;  %278 = vst [vmem:[%s537_s3 + $0x30] sm:$0xff] %v240_v49 }
  0xe3   :  { %277 = vst [vmem:[%s537_s3 + $0x28] sm:$0xff] %v171_v52  ;;  %279 = vst [vmem:[%s537_s3 + $0x38] sm:$0xff] %v242_v53 }
  0xe5   :  { %v174_v54 = vpop.f32.mrb[4].mxu0  ;;  %v245_v55 = vpop.f32.mrb[4].mxu1 }
  0xe6   :  { %v175_v56 = vadd.f32 %v174_v54, %v414_v34  ;;  %v246_v57 = vadd.f32 %v245_v55, %v416_v35  ;;  %v176_v58 = vpop.f32.mrb[5].mxu0  ;;  %v247_v59 = vpop.f32.mrb[5].mxu1 }
  0xe7   :  { %v177_v60 = vadd.f32 %v176_v58, %v418_v36  ;;  %v248_v61 = vadd.f32 %v247_v59, %v420_v37  ;;  %v178_v62 = vpop.f32.mrb[6].mxu0  ;;  %v249_v63 = vpop.f32.mrb[6].mxu1 }
  0xe8   :  { %280 = vst [vmem:[%s537_s3 + $0x40] sm:$0xff] %v175_v56  ;;  %282 = vst [vmem:[%s537_s3 + $0x50] sm:$0xff] %v246_v57  ;;  %v179_v0 = vadd.f32 %v178_v62, %v414_v34  ;;  %v250_v1 = vadd.f32 %v249_v63, %v416_v35  ;;  %v180_v2 = vpop.f32.mrb[7].mxu0  ;;  %v251_v3 = vpop.f32.mrb[7].mxu1 }
  0xe9   :  { %281 = vst [vmem:[%s537_s3 + $0x48] sm:$0xff] %v177_v60  ;;  %283 = vst [vmem:[%s537_s3 + $0x58] sm:$0xff] %v248_v61  ;;  %v181_v4 = vadd.f32 %v180_v2, %v418_v36  ;;  %v252_v5 = vadd.f32 %v251_v3, %v420_v37 }
  0xea   :  { %284 = vst [vmem:[%s537_s3 + $0x60] sm:$0xff] %v179_v0  ;;  %286 = vst [vmem:[%s537_s3 + $0x70] sm:$0xff] %v250_v1 }
  0xeb   :  { %285 = vst [vmem:[%s537_s3 + $0x68] sm:$0xff] %v181_v4  ;;  %287 = vst [vmem:[%s537_s3 + $0x78] sm:$0xff] %v252_v5 }
  0xed   :  { %v184_v6 = vpop.f32.mrb[8].mxu0  ;;  %v255_v7 = vpop.f32.mrb[8].mxu1 }
  0xee   :  { %v185_v8 = vadd.f32 %v184_v6, %v414_v34  ;;  %v256_v9 = vadd.f32 %v255_v7, %v416_v35  ;;  %v186_v10 = vpop.f32.mrb[9].mxu0  ;;  %v257_v11 = vpop.f32.mrb[9].mxu1 }
  0xef   :  { %v187_v12 = vadd.f32 %v186_v10, %v418_v36  ;;  %v258_v13 = vadd.f32 %v257_v11, %v420_v37  ;;  %v188_v14 = vpop.f32.mrb[10].mxu0  ;;  %v259_v15 = vpop.f32.mrb[10].mxu1 }
  0xf0   :  { %288 = vst [vmem:[%s537_s3 + $0x80] sm:$0xff] %v185_v8  ;;  %290 = vst [vmem:[%s537_s3 + $0x90] sm:$0xff] %v256_v9  ;;  %v189_v16 = vadd.f32 %v188_v14, %v414_v34  ;;  %v260_v17 = vadd.f32 %v259_v15, %v416_v35  ;;  %v190_v18 = vpop.f32.mrb[11].mxu0  ;;  %v261_v19 = vpop.f32.mrb[11].mxu1 }
  0xf1   :  { %289 = vst [vmem:[%s537_s3 + $0x88] sm:$0xff] %v187_v12  ;;  %291 = vst [vmem:[%s537_s3 + $0x98] sm:$0xff] %v258_v13  ;;  %v191_v20 = vadd.f32 %v190_v18, %v418_v36  ;;  %v262_v21 = vadd.f32 %v261_v19, %v420_v37 }
  0xf2   :  { %292 = vst [vmem:[%s537_s3 + $0xa0] sm:$0xff] %v189_v16  ;;  %294 = vst [vmem:[%s537_s3 + $0xb0] sm:$0xff] %v260_v17 }
  0xf3   :  { %293 = vst [vmem:[%s537_s3 + $0xa8] sm:$0xff] %v191_v20  ;;  %295 = vst [vmem:[%s537_s3 + $0xb8] sm:$0xff] %v262_v21 }
  0xf5   :  { %v194_v22 = vpop.f32.mrb[12].mxu0  ;;  %v265_v23 = vpop.f32.mrb[12].mxu1 }
  0xf6   :  { %v195_v24 = vadd.f32 %v194_v22, %v414_v34  ;;  %v266_v25 = vadd.f32 %v265_v23, %v416_v35  ;;  %v196_v26 = vpop.f32.mrb[13].mxu0  ;;  %v267_v27 = vpop.f32.mrb[13].mxu1 }
  0xf7   :  { %v197_v28 = vadd.f32 %v196_v26, %v418_v36  ;;  %v268_v29 = vadd.f32 %v267_v27, %v420_v37  ;;  %v198_v30 = vpop.f32.mrb[14].mxu0  ;;  %v269_v31 = vpop.f32.mrb[14].mxu1 }
  0xf8   :  { %296 = vst [vmem:[%s537_s3 + $0xc0] sm:$0xff] %v195_v24  ;;  %298 = vst [vmem:[%s537_s3 + $0xd0] sm:$0xff] %v266_v25  ;;  %v199_v32 = vpop.f32.mrb[15].mxu0  ;;  %v270_v33 = vpop.f32.mrb[15].mxu1 }
  0xf9   :  { %297 = vst [vmem:[%s537_s3 + $0xc8] sm:$0xff] %v197_v28  ;;  %299 = vst [vmem:[%s537_s3 + $0xd8] sm:$0xff] %v268_v29 }

// kernel: forward_xe.5
= control target key start
LH: loop header
LB: loop body
LE: loop exit
PB: predicated region body
PF: predicated region fallthrough
CT: control target
= control target key end

     0   :  { %s503_s1 = inlined_call_operand.vmem [shape: bf16[128,128], index: 1, kind: input, shape index: {}]   ;;  %s504_s0 = inlined_call_operand.vmem [shape: bf16[56,128], index: 0, kind: input, shape index: {}]   ;;  %s505_s2 = inlined_call_operand.vmem [shape: f32[1,128], index: 2, kind: input, shape index: {}]   ;;  %s506_s3 = inlined_call_operand.vmem [shape: f32[56,128], index: 3, kind: output, shape index: {}]  }
   0x1   :  { %v332_v0 = vld [vmem:[%s503_s1] sm:$0xff]   ;;  %v333_v1 = vld [vmem:[%s503_s1 + $0x8] sm:$0xff]   ;;  %v334_v2 = vld [vmem:[%s503_s1 + $0x10] sm:$0xff]  }
   0x2   :  { %292 = vmatprep.subr.bf16.mxu0 %v332_v0  ;;  %316 = vmatprep.subr.bf16.mxu1 %v332_v0  ;;  %v335_v3 = vld [vmem:[%s503_s1 + $0x18] sm:$0xff]   ;;  %v340_v4 = vld [vmem:[%s504_s0] sm:$0xff]   ;;  %v342_v5 = vld [vmem:[%s504_s0 + $0x10] sm:$0xff]  }
   0x3   :  { %293 = vmatpush3.bf16.msra.mxu0 %v332_v0  ;;  %324 = vmatpush3.bf16.msra.mxu1 %v332_v0  ;;  %v336_v6 = vld [vmem:[%s503_s1 + $0x20] sm:$0xff]   ;;  %v337_v7 = vld [vmem:[%s503_s1 + $0x28] sm:$0xff]   ;;  %v338_v8 = vld [vmem:[%s503_s1 + $0x30] sm:$0xff]  }
   0x4   :  { %294 = vmatprep.subr.bf16.mxu0 %v333_v1  ;;  %317 = vmatprep.subr.bf16.mxu1 %v333_v1  ;;  %v339_v9 = vld [vmem:[%s503_s1 + $0x38] sm:$0xff]   ;;  %v341_v10 = vld [vmem:[%s504_s0 + $0x8] sm:$0xff]   ;;  %v267_v12 = vld [vmem:[%s505_s2] ss:$0 sm:$0xff] }
   0x5   :  { %308 = vmatprep.mubr.bf16.mxu0 %v340_v4  ;;  %312 = vmatprep.mubr.bf16.mxu1 %v342_v5  ;;  %v343_v11 = vld [vmem:[%s504_s0 + $0x18] ss:$0 sps:$4 sm:$0xff]  }
   0x7   :  { %295 = vmatpush3.bf16.msra.mxu0 %v333_v1  ;;  %325 = vmatpush3.bf16.msra.mxu1 %v333_v1 }
   0x8   :  { %296 = vmatprep.subr.bf16.mxu0 %v334_v2  ;;  %318 = vmatprep.subr.bf16.mxu1 %v334_v2 }
   0xb   :  { %297 = vmatpush3.bf16.msra.mxu0 %v334_v2  ;;  %326 = vmatpush3.bf16.msra.mxu1 %v334_v2 }
   0xc   :  { %298 = vmatprep.subr.bf16.mxu0 %v335_v3  ;;  %319 = vmatprep.subr.bf16.mxu1 %v335_v3 }
   0xf   :  { %299 = vmatpush3.bf16.msra.mxu0 %v335_v3  ;;  %327 = vmatpush3.bf16.msra.mxu1 %v335_v3 }
  0x10   :  { %300 = vmatprep.subr.bf16.mxu0 %v336_v6  ;;  %320 = vmatprep.subr.bf16.mxu1 %v336_v6 }
  0x13   :  { %301 = vmatpush3.bf16.msra.mxu0 %v336_v6  ;;  %328 = vmatpush3.bf16.msra.mxu1 %v336_v6 }
  0x14   :  { %302 = vmatprep.subr.bf16.mxu0 %v337_v7  ;;  %321 = vmatprep.subr.bf16.mxu1 %v337_v7 }
  0x17   :  { %303 = vmatpush3.bf16.msra.mxu0 %v337_v7  ;;  %329 = vmatpush3.bf16.msra.mxu1 %v337_v7 }
  0x18   :  { %304 = vmatprep.subr.bf16.mxu0 %v338_v8  ;;  %322 = vmatprep.subr.bf16.mxu1 %v338_v8 }
  0x1b   :  { %305 = vmatpush3.bf16.msra.mxu0 %v338_v8  ;;  %330 = vmatpush3.bf16.msra.mxu1 %v338_v8 }
  0x1c   :  { %306 = vmatprep.subr.bf16.mxu0 %v339_v9  ;;  %323 = vmatprep.subr.bf16.mxu1 %v339_v9 }
  0x1f   :  { %307 = vmatpush3.bf16.msra.mxu0 %v339_v9  ;;  %331 = vmatpush3.bf16.msra.mxu1 %v339_v9 }
  0x22   :  { %309 = vmatmul.mubr.bf16.vlgmr.msra.gmra.mrb[0].mxu0 %v341_v10  ;;  %313 = vmatmul.mubr.bf16.vlgmr.msra.gmra.mrb[0].mxu1 %v343_v11 }
  0xf5   :  { %v310_v13 = vpop.f32.mrb[0].mxu0  ;;  %v314_v14 = vpop.f32.mrb[0].mxu1 }
  0xf6   :  { %v431_v15 = vadd.f32 %v310_v13, %v267_v12  ;;  %v149_v16 = vpop.f32.mrb[1].mxu0  ;;  %v165_v17 = vpop.f32.mrb[1].mxu1  ;;  %v449_v27 = vadd.f32 %v314_v14, %v267_v12 }
  0xf7   :  { %v433_v18 = vadd.f32 %v267_v12, %v149_v16  ;;  %v311_v19 = vpop.f32.mrb[2].mxu0  ;;  %v315_v20 = vpop.f32.mrb[2].mxu1  ;;  %v436_v23 = vadd.f32 %v267_v12, %v165_v17 }
  0xf8   :  { %183 = vmax.xlane.f32.xlu1 %v431_v15  ;;  %v152_v21 = vpop.f32.mrb[3].mxu0  ;;  %v168_v22 = vpop.f32.mrb[3].mxu1  ;;  %v439_v24 = vadd.f32 %v311_v19, %v267_v12 }
  0xf9   :  { %179 = vmax.xlane.f32.xlu0 %v433_v18  ;;  %v443_v25 = vadd.f32 %v267_v12, %v168_v22  ;;  %v445_v26 = vadd.f32 %v267_v12, %v152_v21 }
  0xfc   :  { %185 = vmax.xlane.f32.xlu1 %v439_v24 }
  0xfd   :  { %187 = vmax.xlane.f32.xlu0 %v436_v23 }
 0x100   :  { %189 = vmax.xlane.f32.xlu1 %v443_v25 }
 0x101   :  { %181 = vmax.xlane.f32.xlu0 %v445_v26 }
 0x105   :  { %191 = vmax.xlane.f32.xlu0 %v449_v27 }
 0x185   :  { %v184_v28 = vpop.xlane.xlu1 %183 }
 0x186   :  { %v195_v29 = vsub.f32 %v431_v15, %v184_v28  ;;  %v453_v30 = vpop.xlane.xlu0 %179 }
 0x187   :  { %v193_v31 = vsub.f32 %v433_v18, %v453_v30 }
 0x188   :  { %v204_v32 = vmul.f32 1.442695, %v195_v29 }
 0x189   :  { %v200_v33 = vmul.f32 1.442695, %v193_v31  ;;  %v186_v34 = vpop.xlane.xlu1 %185 }
 0x18a   :  { %344 = vpow2.f32 %v204_v32  ;;  %v196_v35 = vsub.f32 %v439_v24, %v186_v34  ;;  %v458_v36 = vpop.xlane.xlu0 %187 }
 0x18b   :  { %v197_v37 = vsub.f32 %v436_v23, %v458_v36  ;;  %346 = vpow2.f32 %v200_v33 }
 0x18c   :  { %v206_v38 = vmul.f32 1.442695, %v196_v35 }
 0x18d   :  { %v462_v39 = vpop.xlane.xlu1 %189  ;;  %v208_v40 = vmul.f32 1.442695, %v197_v37 }
 0x18e   :  { %348 = vpow2.f32 %v206_v38  ;;  %v198_v41 = vsub.f32 %v443_v25, %v462_v39  ;;  %v182_v42 = vpop.xlane.xlu0 %181 }
 0x18f   :  { %v194_v43 = vsub.f32 %v445_v26, %v182_v42  ;;  %350 = vpow2.f32 %v208_v40 }
 0x190   :  { %v210_v45 = vmul.f32 1.442695, %v198_v41 }
 0x191   :  { %v202_v44 = vmul.f32 1.442695, %v194_v43 }
 0x192   :  { %v467_v46 = vpop.xlane.xlu0 %191 }
 0x193   :  { %352 = vpow2.f32 %v202_v44  ;;  %v199_v47 = vsub.f32 %v449_v27, %v467_v46 }
 0x194   :  { %v345_v48 = vpop.eup %344  ;;  %354 = vpow2.f32 %v210_v45 }
 0x195   :  { %v212_v49 = vmul.f32 1.442695, %v199_v47  ;;  %218 = vadd.xlane.f32.xlu1 %v345_v48  ;;  %v347_v50 = vpop.eup %346 }
 0x197   :  { %356 = vpow2.f32 %v212_v49 }
 0x198   :  { %v349_v51 = vpop.eup %348 }
 0x199   :  { %220 = vadd.xlane.f32.xlu0 %v349_v51  ;;  %214 = vadd.xlane.f32.xlu1 %v347_v50  ;;  %v351_v52 = vpop.eup %350 }
 0x19d   :  { %v353_v53 = vpop.eup %352  ;;  %222 = vadd.xlane.f32.xlu1 %v351_v52 }
 0x19e   :  { %216 = vadd.xlane.f32.xlu0 %v353_v53  ;;  %v355_v54 = vpop.eup %354 }
 0x1a1   :  { %v357_v55 = vpop.eup %356 }
 0x1a2   :  { %224 = vadd.xlane.f32.xlu0 %v355_v54  ;;  %226 = vadd.xlane.f32.xlu1 %v357_v55 }
 0x222   :  { %v219_v56 = vpop.xlane.xlu1 %218 }
 0x223   :  { %358 = vlog2.f32 %v219_v56 }
 0x226   :  { %v215_v57 = vpop.xlane.xlu1 %214  ;;  %v221_v58 = vpop.xlane.xlu0 %220 }
 0x227   :  { %360 = vlog2.f32 %v215_v57 }
 0x228   :  { %362 = vlog2.f32 %v221_v58 }
 0x22a   :  { %v223_v59 = vpop.xlane.xlu1 %222 }
 0x22b   :  { %364 = vlog2.f32 %v223_v59  ;;  %v217_v60 = vpop.xlane.xlu0 %216 }
 0x22c   :  { %366 = vlog2.f32 %v217_v60 }
 0x22d   :  { %v359_v61 = vpop.eup %358 }
 0x22e   :  { %v233_v62 = vmul.f32 0.6931472, %v359_v61 }
 0x22f   :  { %v227_v63 = vpop.xlane.xlu1 %226  ;;  %v225_v0 = vpop.xlane.xlu0 %224 }
 0x230   :  { %v244_v1 = vadd.f32 %v233_v62, %v184_v28  ;;  %368 = vlog2.f32 %v227_v63 }
 0x231   :  { %v361_v2 = vpop.eup %360  ;;  %370 = vlog2.f32 %v225_v0 }
 0x232   :  { %v363_v3 = vpop.eup %362  ;;  %v251_v4 = vsub.f32 %v431_v15, %v244_v1  ;;  %v229_v5 = vmul.f32 0.6931472, %v361_v2 }
 0x233   :  { %v235_v6 = vmul.f32 0.6931472, %v363_v3 }
 0x234   :  { %258 = vst [vmem:[%s506_s3 + $0x10] sm:$0xff] %v251_v4  ;;  %v242_v7 = vadd.f32 %v229_v5, %v453_v30 }
 0x235   :  { %v365_v8 = vpop.eup %364  ;;  %v245_v9 = vadd.f32 %v235_v6, %v186_v34 }
 0x236   :  { %v367_v10 = vpop.eup %366  ;;  %v249_v11 = vsub.f32 %v433_v18, %v242_v7  ;;  %v237_v12 = vmul.f32 0.6931472, %v365_v8 }
 0x237   :  { %v252_v13 = vsub.f32 %v439_v24, %v245_v9  ;;  %v231_v14 = vmul.f32 0.6931472, %v367_v10 }
 0x238   :  { %256 = vst [vmem:[%s506_s3] sm:$0xff] %v249_v11  ;;  %v246_v15 = vadd.f32 %v237_v12, %v458_v36 }
 0x239   :  { %259 = vst [vmem:[%s506_s3 + $0x18] sm:$0xff] %v252_v13  ;;  %v243_v16 = vadd.f32 %v231_v14, %v182_v42 }
 0x23a   :  { %v369_v17 = vpop.eup %368  ;;  %v253_v19 = vsub.f32 %v436_v23, %v246_v15 }
 0x23b   :  { %v371_v20 = vpop.eup %370  ;;  %v250_v18 = vsub.f32 %v445_v26, %v243_v16  ;;  %v241_v21 = vmul.f32 0.6931472, %v369_v17 }
 0x23c   :  { %260 = vst [vmem:[%s506_s3 + $0x20] sm:$0xff] %v253_v19  ;;  %v239_v22 = vmul.f32 0.6931472, %v371_v20 }
 0x23d   :  { %257 = vst [vmem:[%s506_s3 + $0x8] sm:$0xff] %v250_v18  ;;  %v248_v24 = vadd.f32 %v241_v21, %v467_v46 }
 0x23e   :  { %v247_v28 = vadd.f32 %v239_v22, %v462_v39 }
 0x23f   :  { %v255_v29 = vsub.f32 %v449_v27, %v248_v24 }
 0x240   :  { %v254_v23 = vsub.f32 %v443_v25, %v247_v28 }
 0x241   :  { %262 = vst [vmem:[%s506_s3 + $0x30] sm:$0xff] %v255_v29 }
 0x242   :  { %261 = vst [vmem:[%s506_s3 + $0x28] sm:$0xff] %v254_v23 }

// kernel: forward_xe.4
= control target key start
LH: loop header
LB: loop body
LE: loop exit
PB: predicated region body
PF: predicated region fallthrough
CT: control target
= control target key end

     0   :  { %v2753_v1 = vmov 0   ;;  %s3473_s2 = inlined_call_operand.vmem [shape: bf16[128,512], index: 2, kind: input, shape index: {}]   ;;  %s3474_s0 = inlined_call_operand.vmem [shape: f32[8,512], index: 0, kind: input, shape index: {}]   ;;  %s3475_s1 = inlined_call_operand.vmem [shape: f32[7,8,512], index: 1, kind: input, shape index: {}]   ;;  %s3476_s3 = inlined_call_operand.vmem [shape: bf16[7,8,128], index: 3, kind: output, shape index: {}]  }
   0x1   :  { %v2777_v0 = vld [vmem:[%s3473_s2 + $0x4] ss:$16 sps:$4 sm:$0xff]   ;;  %279 = vmatprep.mubr.bf16.mxu0 %v2753_v1  ;;  %320 = vmatprep.mubr.bf16.mxu1 %v2753_v1  ;;  %v2784_v2 = vld [vmem:[%s3473_s2] ss:$16 sps:$4 sm:$0xff]   ;;  %v2807_v6 = vld [vmem:[%s3473_s2 + $0xc] ss:$16 sps:$4 sm:$0xff]  }
   0x2   :  { %247 = vmatprep.subr.bf16.mxu0 %v2777_v0  ;;  %v2790_v3 = vld [vmem:[%s3473_s2 + $0x24] ss:$16 sps:$4 sm:$0xff]   ;;  %v2796_v4 = vld [vmem:[%s3473_s2 + $0x20] ss:$16 sps:$4 sm:$0xff]   ;;  %v2812_v7 = vld [vmem:[%s3473_s2 + $0x8] ss:$16 sps:$4 sm:$0xff]   ;;  %288 = vmatprep.subr.bf16.mxu1 %v2807_v6 }
   0x3   :  { %248 = vmatpush1.bf16.msra.mxu0 %v2784_v2  ;;  %v2802_v5 = vld [vmem:[%s3473_s2 + $0x44] ss:$16 sps:$4 sm:$0xff]   ;;  %v2818_v8 = vld [vmem:[%s3473_s2 + $0x40] ss:$16 sps:$4 sm:$0xff]   ;;  %289 = vmatpush1.bf16.msra.mxu1 %v2812_v7  ;;  %v2831_v10 = vld [vmem:[%s3473_s2 + $0x2c] ss:$16 sps:$4 sm:$0xff]  }
   0x4   :  { %249 = vmatprep.subr.bf16.mxu0 %v2790_v3  ;;  %v2825_v9 = vld [vmem:[%s3473_s2 + $0x64] ss:$16 sps:$4 sm:$0xff]   ;;  %v2836_v11 = vld [vmem:[%s3473_s2 + $0x28] ss:$16 sps:$4 sm:$0xff]   ;;  %290 = vmatprep.subr.bf16.mxu1 %v2831_v10  ;;  %v2843_v12 = vld [vmem:[%s3473_s2 + $0x60] ss:$16 sps:$4 sm:$0xff]  }
   0x5   :  { %v2848_v13 = vld [vmem:[%s3473_s2 + $0x84] ss:$16 sps:$4 sm:$0xff]   ;;  %v2853_v14 = vld [vmem:[%s3473_s2 + $0x4c] ss:$16 sps:$4 sm:$0xff]   ;;  %v2860_v15 = vld [vmem:[%s3473_s2 + $0x48] ss:$16 sps:$4 sm:$0xff]  }
   0x6   :  { %v2866_v16 = vld [vmem:[%s3473_s2 + $0x6c] ss:$16 sps:$4 sm:$0xff]   ;;  %v2872_v17 = vld [vmem:[%s3473_s2 + $0x80] ss:$16 sps:$4 sm:$0xff]   ;;  %v2878_v18 = vld [vmem:[%s3473_s2 + $0xa4] ss:$16 sps:$4 sm:$0xff]  }
   0x7   :  { %250 = vmatpush1.bf16.msra.mxu0 %v2796_v4  ;;  %291 = vmatpush1.bf16.msra.mxu1 %v2836_v11  ;;  %v2884_v19 = vld [vmem:[%s3473_s2 + $0x68] ss:$16 sps:$4 sm:$0xff]   ;;  %v2890_v20 = vld [vmem:[%s3473_s2 + $0x8c] ss:$16 sps:$4 sm:$0xff]   ;;  %v19_v21 = vld [vmem:[%s3474_s0] sm:$0xff] }
   0x8   :  { %251 = vmatprep.subr.bf16.mxu0 %v2802_v5  ;;  %292 = vmatprep.subr.bf16.mxu1 %v2853_v14  ;;  %v20_v22 = vld [vmem:[%s3474_s0 + $0x8] sm:$0xff]  ;;  %v2901_v23 = vld [vmem:[%s3473_s2 + $0xa0] ss:$16 sps:$4 sm:$0xff]   ;;  %v2250_v24 = vmul.f32 -1.442695, %v19_v21  ;;  %v22_v31 = vld [vmem:[%s3474_s0 + $0x18] sm:$0xff] }
   0x9   :  { %v2251_v25 = vmul.f32 -1.442695, %v20_v22  ;;  %v2907_v26 = vld [vmem:[%s3473_s2 + $0xc4] ss:$16 sps:$4 sm:$0xff]   ;;  %v2914_v27 = vld [vmem:[%s3473_s2 + $0x88] ss:$16 sps:$4 sm:$0xff]  }
   0xa   :  { %2625 = vpow2.f32 %v2250_v24  ;;  %v2919_v28 = vld [vmem:[%s3473_s2 + $0xc0] ss:$16 sps:$4 sm:$0xff]   ;;  %v2925_v29 = vld [vmem:[%s3473_s2 + $0xac] ss:$16 sps:$4 sm:$0xff]   ;;  %v2930_v30 = vld [vmem:[%s3473_s2 + $0xe4] ss:$16 sps:$4 sm:$0xff]  }
   0xb   :  { %252 = vmatpush1.bf16.msra.mxu0 %v2818_v8  ;;  %293 = vmatpush1.bf16.msra.mxu1 %v2860_v15  ;;  %2627 = vpow2.f32 %v2251_v25  ;;  %v2938_v32 = vld [vmem:[%s3473_s2 + $0xa8] ss:$16 sps:$4 sm:$0xff]   ;;  %v2944_v33 = vld [vmem:[%s3473_s2 + $0xcc] ss:$16 sps:$4 sm:$0xff]   ;;  %v2951_v34 = vld [vmem:[%s3473_s2 + $0xe0] ss:$16 sps:$4 sm:$0xff]  }
   0xc   :  { %253 = vmatprep.subr.bf16.mxu0 %v2825_v9  ;;  %294 = vmatprep.subr.bf16.mxu1 %v2866_v16  ;;  %v21_v35 = vld [vmem:[%s3474_s0 + $0x10] sm:$0xff]  ;;  %v2252_v36 = vmul.f32 -1.442695, %v22_v31  ;;  %v2960_v37 = vld [vmem:[%s3473_s2 + $0xc8] ss:$16 sps:$4 sm:$0xff]   ;;  %v50_v57 = vld [vmem:[%s3475_s1] sm:$0xff] }
   0xd   :  { %v2966_v38 = vld [vmem:[%s3473_s2 + $0xec] ss:$16 sps:$4 sm:$0xff]   ;;  %v2974_v40 = vld [vmem:[%s3473_s2 + $0xe8] ss:$16 sps:$4 sm:$0xff]  }
   0xe   :  { %2629 = vpow2.f32 %v2252_v36  ;;  %v51_v58 = vld [vmem:[%s3475_s1 + $0x8] sm:$0xff] }
   0xf   :  { %254 = vmatpush1.bf16.msra.mxu0 %v2843_v12  ;;  %295 = vmatpush1.bf16.msra.mxu1 %v2884_v19  ;;  %2631 = vtanh.f32 %v21_v35 }
  0x10   :  { %255 = vmatprep.subr.bf16.mxu0 %v2848_v13  ;;  %296 = vmatprep.subr.bf16.mxu1 %v2890_v20 }
  0x13   :  { %256 = vmatpush1.bf16.msra.mxu0 %v2872_v17  ;;  %297 = vmatpush1.bf16.msra.mxu1 %v2914_v27 }
  0x14   :  { %257 = vmatprep.subr.bf16.mxu0 %v2878_v18  ;;  %298 = vmatprep.subr.bf16.mxu1 %v2925_v29  ;;  %v2626_v39 = vpop.eup %2625 }
  0x15   :  { %v2628_v41 = vpop.eup %2627  ;;  %v26_v42 = vadd.f32 1.0, %v2626_v39  ;;  %v53_v39 = vld [vmem:[%s3475_s1 + $0x18] sm:$0xff] }
  0x16   :  { %v32_v43 = vadd.f32 1.0, %v2628_v41 }
  0x17   :  { %258 = vmatpush1.bf16.msra.mxu0 %v2901_v23  ;;  %299 = vmatpush1.bf16.msra.mxu1 %v2938_v32  ;;  %2633 = vrcp.f32 %v26_v42  ;;  %v52_v42 = vld [vmem:[%s3475_s1 + $0x10] sm:$0xff] }
  0x18   :  { %259 = vmatprep.subr.bf16.mxu0 %v2907_v26  ;;  %300 = vmatprep.subr.bf16.mxu1 %v2944_v33  ;;  %2635 = vrcp.f32 %v32_v43  ;;  %v2630_v44 = vpop.eup %2629 }
  0x19   :  { %v2632_v45 = vpop.eup %2631  ;;  %v39_v47 = vadd.f32 1.0, %v2630_v44 }
  0x1b   :  { %260 = vmatpush1.bf16.msra.mxu0 %v2919_v28  ;;  %301 = vmatpush1.bf16.msra.mxu1 %v2960_v37  ;;  %2637 = vrcp.f32 %v39_v47 }
  0x1c   :  { %261 = vmatprep.subr.bf16.mxu0 %v2930_v30  ;;  %302 = vmatprep.subr.bf16.mxu1 %v2966_v38 }
  0x1f   :  { %262 = vmatpush1.bf16.msra.mxu0 %v2951_v34  ;;  %303 = vmatpush1.bf16.msra.mxu1 %v2974_v40 }
  0x20   :  { %560 = vmatprep.subr.bf16.mxu0 %v2777_v0  ;;  %601 = vmatprep.subr.bf16.mxu1 %v2807_v6 }
  0x21   :  { %v2634_v46 = vpop.eup %2633 }
  0x22   :  { %v2636_v48 = vpop.eup %2635  ;;  %v43_v49 = vmul.f32 %v2634_v46, %v2632_v45 }
  0x23   :  { %v42_v50 = vmul.f32 0.0, %v2636_v48 }
  0x25   :  { %v2982_v51 = vadd.f32 %v43_v49, %v42_v50  ;;  %v2638_v52 = vpop.eup %2637 }
  0x27   :  { %2639 = vtanh.f32 %v2982_v51 }
  0x31   :  { %v2640_v53 = vpop.eup %2639 }
  0x32   :  { %v46_v54 = vmul.f32 %v2640_v53, %v2638_v52 }
  0x34   :  { %v47_v55 = vpack.c.bf16 %v46_v54, %v46_v54 }
  0x36   :  { %48 = vst [vmem:[#allocation2] sm:$0xf] %v47_v55 }
  0x3d   :  { %v54_v56 = vld [vmem:[#allocation2] sm:$0xf] }
  0x3e   :  { %280 = vmatmul.mubr.bf16.vlgmr.msra.gmra.mrb[0].mxu0 %v54_v56  ;;  %321 = vmatmul.mubr.bf16.vlgmr.msra.gmra.mrb[0].mxu1 %v54_v56 }
  0x3f   :  { %561 = vmatpush1.bf16.msra.mxu0 %v2784_v2  ;;  %602 = vmatpush1.bf16.msra.mxu1 %v2812_v7 }
  0x40   :  { %562 = vmatprep.subr.bf16.mxu0 %v2790_v3  ;;  %603 = vmatprep.subr.bf16.mxu1 %v2831_v10 }
  0x41   :  { %592 = vmatprep.mubr.bf16.mxu0 %v2753_v1  ;;  %633 = vmatprep.mubr.bf16.mxu1 %v2753_v1 }
  0x43   :  { %563 = vmatpush1.bf16.msra.mxu0 %v2796_v4  ;;  %604 = vmatpush1.bf16.msra.mxu1 %v2836_v11 }
  0x44   :  { %564 = vmatprep.subr.bf16.mxu0 %v2802_v5  ;;  %605 = vmatprep.subr.bf16.mxu1 %v2853_v14 }
  0x47   :  { %565 = vmatpush1.bf16.msra.mxu0 %v2818_v8  ;;  %606 = vmatpush1.bf16.msra.mxu1 %v2860_v15 }
  0x48   :  { %566 = vmatprep.subr.bf16.mxu0 %v2825_v9  ;;  %607 = vmatprep.subr.bf16.mxu1 %v2866_v16 }
  0x4b   :  { %567 = vmatpush1.bf16.msra.mxu0 %v2843_v12  ;;  %608 = vmatpush1.bf16.msra.mxu1 %v2884_v19 }
  0x4c   :  { %568 = vmatprep.subr.bf16.mxu0 %v2848_v13  ;;  %609 = vmatprep.subr.bf16.mxu1 %v2890_v20 }
  0x4f   :  { %569 = vmatpush1.bf16.msra.mxu0 %v2872_v17  ;;  %610 = vmatpush1.bf16.msra.mxu1 %v2914_v27 }
  0x50   :  { %570 = vmatprep.subr.bf16.mxu0 %v2878_v18  ;;  %611 = vmatprep.subr.bf16.mxu1 %v2925_v29 }
  0x53   :  { %571 = vmatpush1.bf16.msra.mxu0 %v2901_v23  ;;  %612 = vmatpush1.bf16.msra.mxu1 %v2938_v32 }
  0x54   :  { %572 = vmatprep.subr.bf16.mxu0 %v2907_v26  ;;  %613 = vmatprep.subr.bf16.mxu1 %v2944_v33 }
  0x57   :  { %573 = vmatpush1.bf16.msra.mxu0 %v2919_v28  ;;  %614 = vmatpush1.bf16.msra.mxu1 %v2960_v37 }
  0x58   :  { %574 = vmatprep.subr.bf16.mxu0 %v2930_v30  ;;  %615 = vmatprep.subr.bf16.mxu1 %v2966_v38 }
  0x5b   :  { %575 = vmatpush1.bf16.msra.mxu0 %v2951_v34  ;;  %616 = vmatpush1.bf16.msra.mxu1 %v2974_v40 }
  0x5c   :  { %874 = vmatprep.subr.bf16.mxu0 %v2777_v0  ;;  %915 = vmatprep.subr.bf16.mxu1 %v2807_v6 }
 0x111   :  { %v281_v59 = vpop.f32.mrb[0].mxu0  ;;  %v322_v60 = vpop.f32.mrb[0].mxu1 }
 0x112   :  { %v329_v61 = vadd.f32 %v281_v59, %v50_v57  ;;  %v283_v62 = vpop.f32.mrb[1].mxu0  ;;  %v324_v63 = vpop.f32.mrb[1].mxu1  ;;  %v331_v44 = vadd.f32 %v322_v60, %v52_v42 }
 0x113   :  { %v330_v21 = vadd.f32 %v283_v62, %v51_v58  ;;  %v285_v22 = vpop.f32.mrb[2].mxu0  ;;  %v326_v24 = vpop.f32.mrb[2].mxu1  ;;  %v332_v41 = vadd.f32 %v324_v63, %v53_v39  ;;  %v2289_v63 = vld [vmem:[%s3475_s1 + $0x28] sm:$0xff] }
 0x114   :  { %v2285_v25 = vmul.f32 -1.442695, %v329_v61  ;;  %v286_v31 = vpop.f32.mrb[3].mxu0  ;;  %v327_v35 = vpop.f32.mrb[3].mxu1 }
 0x115   :  { %v2286_v36 = vmul.f32 -1.442695, %v330_v21  ;;  %v2287_v43 = vmul.f32 -1.442695, %v332_v41 }
 0x116   :  { %2641 = vpow2.f32 %v2285_v25 }
 0x117   :  { %2643 = vpow2.f32 %v2286_v36 }
 0x118   :  { %2645 = vpow2.f32 %v2287_v43  ;;  %v2291_v43 = vld [vmem:[%s3475_s1 + $0x38] sm:$0xff] }
 0x119   :  { %2647 = vtanh.f32 %v331_v44 }
 0x120   :  { %v2642_v45 = vpop.eup %2641 }
 0x121   :  { %v2644_v46 = vpop.eup %2643  ;;  %v337_v47 = vadd.f32 1.0, %v2642_v45  ;;  %v2290_v45 = vld [vmem:[%s3475_s1 + $0x30] sm:$0xff] }
 0x122   :  { %v343_v48 = vadd.f32 1.0, %v2644_v46  ;;  %v2646_v49 = vpop.eup %2645 }
 0x123   :  { %2649 = vrcp.f32 %v337_v47  ;;  %v2648_v50 = vpop.eup %2647  ;;  %v350_v53 = vadd.f32 1.0, %v2646_v49 }
 0x124   :  { %2651 = vrcp.f32 %v343_v48 }
 0x125   :  { %2653 = vrcp.f32 %v350_v53 }
 0x12d   :  { %v2650_v52 = vpop.eup %2649 }
 0x12e   :  { %v2652_v54 = vpop.eup %2651  ;;  %v354_v55 = vmul.f32 %v2650_v52, %v2648_v50 }
 0x12f   :  { %v353_v56 = vmul.f32 %v2652_v54, %v2982_v51  ;;  %v2654_v58 = vpop.eup %2653  ;;  %v2288_v51 = vld [vmem:[%s3475_s1 + $0x20] sm:$0xff] }
 0x131   :  { %v3032_v57 = vadd.f32 %v354_v55, %v353_v56 }
 0x133   :  { %2655 = vtanh.f32 %v3032_v57 }
 0x13d   :  { %v2656_v59 = vpop.eup %2655 }
 0x13e   :  { %v357_v60 = vmul.f32 %v2656_v59, %v2654_v58 }
 0x140   :  { %v358_v61 = vpack.c.bf16 %v357_v60, %v357_v60 }
 0x142   :  { %359 = vst [vmem:[#allocation2] sm:$0xf] %v358_v61  ;;  %361 = vst [vmem:[%s3476_s3] sm:$0xf] %v358_v61 }
 0x149   :  { %v367_v62 = vld [vmem:[#allocation2] sm:$0xf] }
 0x14a   :  { %593 = vmatmul.mubr.bf16.vlgmr.msra.gmra.mrb[4].mxu0 %v367_v62  ;;  %634 = vmatmul.mubr.bf16.vlgmr.msra.gmra.mrb[4].mxu1 %v367_v62 }
 0x14b   :  { %875 = vmatpush1.bf16.msra.mxu0 %v2784_v2  ;;  %916 = vmatpush1.bf16.msra.mxu1 %v2812_v7 }
 0x14c   :  { %876 = vmatprep.subr.bf16.mxu0 %v2790_v3  ;;  %917 = vmatprep.subr.bf16.mxu1 %v2831_v10 }
 0x14d   :  { %906 = vmatprep.mubr.bf16.mxu0 %v2753_v1  ;;  %947 = vmatprep.mubr.bf16.mxu1 %v2753_v1 }
 0x14f   :  { %877 = vmatpush1.bf16.msra.mxu0 %v2796_v4  ;;  %918 = vmatpush1.bf16.msra.mxu1 %v2836_v11 }
 0x150   :  { %878 = vmatprep.subr.bf16.mxu0 %v2802_v5  ;;  %919 = vmatprep.subr.bf16.mxu1 %v2853_v14 }
 0x153   :  { %879 = vmatpush1.bf16.msra.mxu0 %v2818_v8  ;;  %920 = vmatpush1.bf16.msra.mxu1 %v2860_v15 }
 0x154   :  { %880 = vmatprep.subr.bf16.mxu0 %v2825_v9  ;;  %921 = vmatprep.subr.bf16.mxu1 %v2866_v16 }
 0x157   :  { %881 = vmatpush1.bf16.msra.mxu0 %v2843_v12  ;;  %922 = vmatpush1.bf16.msra.mxu1 %v2884_v19 }
 0x158   :  { %882 = vmatprep.subr.bf16.mxu0 %v2848_v13  ;;  %923 = vmatprep.subr.bf16.mxu1 %v2890_v20 }
 0x15b   :  { %883 = vmatpush1.bf16.msra.mxu0 %v2872_v17  ;;  %924 = vmatpush1.bf16.msra.mxu1 %v2914_v27 }
 0x15c   :  { %884 = vmatprep.subr.bf16.mxu0 %v2878_v18  ;;  %925 = vmatprep.subr.bf16.mxu1 %v2925_v29 }
 0x15f   :  { %885 = vmatpush1.bf16.msra.mxu0 %v2901_v23  ;;  %926 = vmatpush1.bf16.msra.mxu1 %v2938_v32 }
 0x160   :  { %886 = vmatprep.subr.bf16.mxu0 %v2907_v26  ;;  %927 = vmatprep.subr.bf16.mxu1 %v2944_v33 }
 0x163   :  { %887 = vmatpush1.bf16.msra.mxu0 %v2919_v28  ;;  %928 = vmatpush1.bf16.msra.mxu1 %v2960_v37 }
 0x164   :  { %888 = vmatprep.subr.bf16.mxu0 %v2930_v30  ;;  %929 = vmatprep.subr.bf16.mxu1 %v2966_v38 }
 0x167   :  { %889 = vmatpush1.bf16.msra.mxu0 %v2951_v34  ;;  %930 = vmatpush1.bf16.msra.mxu1 %v2974_v40 }
 0x168   :  { %1188 = vmatprep.subr.bf16.mxu0 %v2777_v0  ;;  %1229 = vmatprep.subr.bf16.mxu1 %v2807_v6 }
 0x21d   :  { %v594_v21 = vpop.f32.mrb[4].mxu0  ;;  %v635_v22 = vpop.f32.mrb[4].mxu1 }
 0x21e   :  { %v642_v24 = vadd.f32 %v2288_v51, %v594_v21  ;;  %v596_v25 = vpop.f32.mrb[5].mxu0  ;;  %v637_v31 = vpop.f32.mrb[5].mxu1  ;;  %v644_v47 = vadd.f32 %v2290_v45, %v635_v22  ;;  %v3186_v45 = vld [vmem:[%s3473_s2 + $0x28] ss:$16 sps:$4 sm:$0xff]  }
 0x21f   :  { %v643_v35 = vadd.f32 %v2289_v63, %v596_v25  ;;  %v598_v36 = vpop.f32.mrb[6].mxu0  ;;  %v639_v39 = vpop.f32.mrb[6].mxu1  ;;  %v645_v44 = vadd.f32 %v2291_v43, %v637_v31  ;;  %v3176_v43 = vld [vmem:[%s3473_s2 + $0x2c] ss:$16 sps:$4 sm:$0xff]  }
 0x220   :  { %v2324_v41 = vmul.f32 -1.442695, %v642_v24  ;;  %v599_v0 = vpop.f32.mrb[7].mxu0  ;;  %v640_v42 = vpop.f32.mrb[7].mxu1  ;;  %v3147_v39 = vld [vmem:[%s3473_s2 + $0x4] ss:$16 sps:$4 sm:$0xff]  }
 0x221   :  { %v2325_v6 = vmul.f32 -1.442695, %v643_v35  ;;  %v2326_v46 = vmul.f32 -1.442695, %v645_v44  ;;  %v3157_v0 = vld [vmem:[%s3473_s2] ss:$16 sps:$4 sm:$0xff]  }
 0x222   :  { %2657 = vpow2.f32 %v2324_v41  ;;  %v3152_v41 = vld [vmem:[%s3473_s2 + $0xc] ss:$16 sps:$4 sm:$0xff]   ;;  %v3162_v42 = vld [vmem:[%s3473_s2 + $0x8] ss:$16 sps:$4 sm:$0xff]   ;;  %v3181_v44 = vld [vmem:[%s3473_s2 + $0x20] ss:$16 sps:$4 sm:$0xff]  }
 0x223   :  { %2659 = vpow2.f32 %v2325_v6  ;;  %v3171_v6 = vld [vmem:[%s3473_s2 + $0x24] ss:$16 sps:$4 sm:$0xff]  }
 0x224   :  { %2661 = vpow2.f32 %v2326_v46  ;;  %v3195_v46 = vld [vmem:[%s3473_s2 + $0x44] ss:$16 sps:$4 sm:$0xff]  }
 0x225   :  { %2663 = vtanh.f32 %v644_v47  ;;  %v3200_v47 = vld [vmem:[%s3473_s2 + $0x4c] ss:$16 sps:$4 sm:$0xff]  }
 0x22c   :  { %v2658_v48 = vpop.eup %2657 }
 0x22d   :  { %v2660_v49 = vpop.eup %2659  ;;  %v650_v50 = vadd.f32 1.0, %v2658_v48  ;;  %v3205_v48 = vld [vmem:[%s3473_s2 + $0x40] ss:$16 sps:$4 sm:$0xff]  }
 0x22e   :  { %v656_v52 = vadd.f32 1.0, %v2660_v49  ;;  %v2662_v53 = vpop.eup %2661  ;;  %v3210_v49 = vld [vmem:[%s3473_s2 + $0x48] ss:$16 sps:$4 sm:$0xff]  }
 0x22f   :  { %2665 = vrcp.f32 %v650_v50  ;;  %v2664_v54 = vpop.eup %2663  ;;  %v663_v59 = vadd.f32 1.0, %v2662_v53  ;;  %v3219_v50 = vld [vmem:[%s3473_s2 + $0x64] ss:$16 sps:$4 sm:$0xff]   ;;  %v3229_v53 = vld [vmem:[%s3473_s2 + $0x60] ss:$16 sps:$4 sm:$0xff]  }
 0x230   :  { %2667 = vrcp.f32 %v656_v52  ;;  %v3224_v52 = vld [vmem:[%s3473_s2 + $0x6c] ss:$16 sps:$4 sm:$0xff]  }
 0x231   :  { %2669 = vrcp.f32 %v663_v59  ;;  %v3258_v59 = vld [vmem:[%s3473_s2 + $0x88] ss:$16 sps:$4 sm:$0xff]  }
 0x239   :  { %v2666_v55 = vpop.eup %2665 }
 0x23a   :  { %v2668_v56 = vpop.eup %2667  ;;  %v667_v58 = vmul.f32 %v2666_v55, %v2664_v54  ;;  %v3234_v54 = vld [vmem:[%s3473_s2 + $0x68] ss:$16 sps:$4 sm:$0xff]   ;;  %v3243_v55 = vld [vmem:[%s3473_s2 + $0x84] ss:$16 sps:$4 sm:$0xff]  }
 0x23b   :  { %v666_v60 = vmul.f32 %v2668_v56, %v3032_v57  ;;  %v2670_v62 = vpop.eup %2669  ;;  %v3248_v56 = vld [vmem:[%s3473_s2 + $0x8c] ss:$16 sps:$4 sm:$0xff]  }
 0x23d   :  { %v3085_v61 = vadd.f32 %v667_v58, %v666_v60  ;;  %v3253_v58 = vld [vmem:[%s3473_s2 + $0x80] ss:$16 sps:$4 sm:$0xff]   ;;  %v3267_v60 = vld [vmem:[%s3473_s2 + $0xa4] ss:$16 sps:$4 sm:$0xff]  }
 0x23f   :  { %2671 = vtanh.f32 %v3085_v61 }
 0x249   :  { %v2672_v51 = vpop.eup %2671 }
 0x24a   :  { %v670_v63 = vmul.f32 %v2672_v51, %v2670_v62  ;;  %v3277_v62 = vld [vmem:[%s3473_s2 + $0xa0] ss:$16 sps:$4 sm:$0xff]   ;;  %v3282_v51 = vld [vmem:[%s3473_s2 + $0xa8] ss:$16 sps:$4 sm:$0xff]  }
 0x24c   :  { %v671_v21 = vpack.c.bf16 %v670_v63, %v670_v63  ;;  %v3291_v63 = vld [vmem:[%s3473_s2 + $0xc4] ss:$16 sps:$4 sm:$0xff]  }
 0x24e   :  { %672 = vst [vmem:[#allocation2] sm:$0xf] %v671_v21  ;;  %2327 = vst [vmem:[%s3476_s3 + $0x4] sm:$0xf] %v671_v21  ;;  %v3296_v21 = vld [vmem:[%s3473_s2 + $0xcc] ss:$16 sps:$4 sm:$0xff]  }
 0x255   :  { %v681_v22 = vld [vmem:[#allocation2] sm:$0xf] }
 0x256   :  { %907 = vmatmul.mubr.bf16.vlgmr.msra.gmra.mrb[8].mxu0 %v681_v22  ;;  %948 = vmatmul.mubr.bf16.vlgmr.msra.gmra.mrb[8].mxu1 %v681_v22  ;;  %v3301_v22 = vld [vmem:[%s3473_s2 + $0xc0] ss:$16 sps:$4 sm:$0xff]  }
 0x257   :  { %1189 = vmatpush1.bf16.msra.mxu0 %v2784_v2  ;;  %1230 = vmatpush1.bf16.msra.mxu1 %v2812_v7  ;;  %v2328_v2 = vld [vmem:[%s3475_s1 + $0x40] sm:$0xff] }
 0x258   :  { %1190 = vmatprep.subr.bf16.mxu0 %v2790_v3  ;;  %1231 = vmatprep.subr.bf16.mxu1 %v2831_v10  ;;  %v2329_v3 = vld [vmem:[%s3475_s1 + $0x48] sm:$0xff] }
 0x259   :  { %1220 = vmatprep.mubr.bf16.mxu0 %v2753_v1  ;;  %1261 = vmatprep.mubr.bf16.mxu1 %v2753_v1 }
 0x25b   :  { %1191 = vmatpush1.bf16.msra.mxu0 %v2796_v4  ;;  %1232 = vmatpush1.bf16.msra.mxu1 %v2836_v11 }
 0x25c   :  { %1192 = vmatprep.subr.bf16.mxu0 %v2802_v5  ;;  %1233 = vmatprep.subr.bf16.mxu1 %v2853_v14 }
 0x25f   :  { %1193 = vmatpush1.bf16.msra.mxu0 %v2818_v8  ;;  %1234 = vmatpush1.bf16.msra.mxu1 %v2860_v15 }
 0x260   :  { %1194 = vmatprep.subr.bf16.mxu0 %v2825_v9  ;;  %1235 = vmatprep.subr.bf16.mxu1 %v2866_v16 }
 0x263   :  { %1195 = vmatpush1.bf16.msra.mxu0 %v2843_v12  ;;  %1236 = vmatpush1.bf16.msra.mxu1 %v2884_v19  ;;  %v2330_v19 = vld [vmem:[%s3475_s1 + $0x50] sm:$0xff] }
 0x264   :  { %1196 = vmatprep.subr.bf16.mxu0 %v2848_v13  ;;  %1237 = vmatprep.subr.bf16.mxu1 %v2890_v20 }
 0x267   :  { %1197 = vmatpush1.bf16.msra.mxu0 %v2872_v17  ;;  %1238 = vmatpush1.bf16.msra.mxu1 %v2914_v27  ;;  %v2331_v17 = vld [vmem:[%s3475_s1 + $0x58] sm:$0xff] }
 0x268   :  { %1198 = vmatprep.subr.bf16.mxu0 %v2878_v18  ;;  %1239 = vmatprep.subr.bf16.mxu1 %v2925_v29 }
 0x26b   :  { %1199 = vmatpush1.bf16.msra.mxu0 %v2901_v23  ;;  %1240 = vmatpush1.bf16.msra.mxu1 %v2938_v32 }
 0x26c   :  { %1200 = vmatprep.subr.bf16.mxu0 %v2907_v26  ;;  %1241 = vmatprep.subr.bf16.mxu1 %v2944_v33 }
 0x26f   :  { %1201 = vmatpush1.bf16.msra.mxu0 %v2919_v28  ;;  %1242 = vmatpush1.bf16.msra.mxu1 %v2960_v37 }
 0x270   :  { %1202 = vmatprep.subr.bf16.mxu0 %v2930_v30  ;;  %1243 = vmatprep.subr.bf16.mxu1 %v2966_v38 }
 0x273   :  { %1203 = vmatpush1.bf16.msra.mxu0 %v2951_v34  ;;  %1244 = vmatpush1.bf16.msra.mxu1 %v2974_v40 }
 0x274   :  { %1502 = vmatprep.subr.bf16.mxu0 %v3147_v39  ;;  %1543 = vmatprep.subr.bf16.mxu1 %v3152_v41 }
 0x329   :  { %v908_v4 = vpop.f32.mrb[8].mxu0  ;;  %v949_v5 = vpop.f32.mrb[8].mxu1 }
 0x32a   :  { %v956_v7 = vadd.f32 %v2328_v2, %v908_v4  ;;  %v910_v8 = vpop.f32.mrb[9].mxu0  ;;  %v951_v9 = vpop.f32.mrb[9].mxu1  ;;  %v958_v23 = vadd.f32 %v2330_v19, %v949_v5  ;;  %v3306_v2 = vld [vmem:[%s3473_s2 + $0xc8] ss:$16 sps:$4 sm:$0xff]   ;;  %v3318_v4 = vld [vmem:[%s3473_s2 + $0xec] ss:$16 sps:$4 sm:$0xff]  }
 0x32b   :  { %v957_v10 = vadd.f32 %v2329_v3, %v910_v8  ;;  %v912_v11 = vpop.f32.mrb[10].mxu0  ;;  %v953_v12 = vpop.f32.mrb[10].mxu1  ;;  %v959_v18 = vadd.f32 %v2331_v17, %v951_v9  ;;  %v3313_v3 = vld [vmem:[%s3473_s2 + $0xe4] ss:$16 sps:$4 sm:$0xff]   ;;  %v3325_v5 = vld [vmem:[%s3473_s2 + $0xe0] ss:$16 sps:$4 sm:$0xff]  }
 0x32c   :  { %v2364_v13 = vmul.f32 -1.442695, %v956_v7  ;;  %v913_v14 = vpop.f32.mrb[11].mxu0  ;;  %v954_v15 = vpop.f32.mrb[11].mxu1  ;;  %v3330_v7 = vld [vmem:[%s3473_s2 + $0xe8] ss:$16 sps:$4 sm:$0xff]  }
 0x32d   :  { %v2365_v16 = vmul.f32 -1.442695, %v957_v10  ;;  %v2366_v20 = vmul.f32 -1.442695, %v959_v18  ;;  %v2368_v8 = vld [vmem:[%s3475_s1 + $0x60] sm:$0xff]  ;;  %v2369_v9 = vld [vmem:[%s3475_s1 + $0x68] sm:$0xff] }
 0x32e   :  { %2673 = vpow2.f32 %v2364_v13 }
 0x32f   :  { %2675 = vpow2.f32 %v2365_v16 }
 0x330   :  { %2677 = vpow2.f32 %v2366_v20 }
 0x331   :  { %2679 = vtanh.f32 %v958_v23 }
 0x338   :  { %v2674_v26 = vpop.eup %2673 }
 0x339   :  { %v2676_v27 = vpop.eup %2675  ;;  %v964_v28 = vadd.f32 1.0, %v2674_v26  ;;  %v2371_v26 = vld [vmem:[%s3475_s1 + $0x78] sm:$0xff] }
 0x33a   :  { %v970_v29 = vadd.f32 1.0, %v2676_v27  ;;  %v2678_v30 = vpop.eup %2677 }
 0x33b   :  { %2681 = vrcp.f32 %v964_v28  ;;  %v2680_v32 = vpop.eup %2679  ;;  %v977_v38 = vadd.f32 1.0, %v2678_v30  ;;  %v2370_v28 = vld [vmem:[%s3475_s1 + $0x70] sm:$0xff] }
 0x33c   :  { %2683 = vrcp.f32 %v970_v29 }
 0x33d   :  { %2685 = vrcp.f32 %v977_v38 }
 0x345   :  { %v2682_v33 = vpop.eup %2681 }
 0x346   :  { %v2684_v34 = vpop.eup %2683  ;;  %v981_v37 = vmul.f32 %v2682_v33, %v2680_v32 }
 0x347   :  { %v980_v40 = vmul.f32 %v2684_v34, %v3085_v61  ;;  %v2686_v24 = vpop.eup %2685  ;;  %v3272_v61 = vld [vmem:[%s3473_s2 + $0xac] ss:$16 sps:$4 sm:$0xff]  }
 0x349   :  { %v3136_v57 = vadd.f32 %v981_v37, %v980_v40 }
 0x34b   :  { %2687 = vtanh.f32 %v3136_v57 }
 0x355   :  { %v2688_v25 = vpop.eup %2687 }
 0x356   :  { %v984_v31 = vmul.f32 %v2688_v25, %v2686_v24 }
 0x358   :  { %v985_v35 = vpack.c.bf16 %v984_v31, %v984_v31 }
 0x35a   :  { %986 = vst [vmem:[#allocation2] sm:$0xf] %v985_v35  ;;  %2367 = vst [vmem:[%s3476_s3 + $0x8] sm:$0xf] %v985_v35 }
 0x361   :  { %v995_v36 = vld [vmem:[#allocation2] sm:$0xf] }
 0x362   :  { %1221 = vmatmul.mubr.bf16.vlgmr.msra.gmra.mrb[12].mxu0 %v995_v36  ;;  %1262 = vmatmul.mubr.bf16.vlgmr.msra.gmra.mrb[12].mxu1 %v995_v36 }
 0x363   :  { %1534 = vmatprep.mubr.bf16.mxu0 %v2753_v1  ;;  %1575 = vmatprep.mubr.bf16.mxu1 %v2753_v1 }
 0x364   :  { %1503 = vmatpush1.bf16.msra.mxu0 %v3157_v0  ;;  %1544 = vmatpush1.bf16.msra.mxu1 %v3162_v42 }
 0x365   :  { %1504 = vmatprep.subr.bf16.mxu0 %v3171_v6  ;;  %1545 = vmatprep.subr.bf16.mxu1 %v3176_v43 }
 0x368   :  { %1505 = vmatpush1.bf16.msra.mxu0 %v3181_v44  ;;  %1546 = vmatpush1.bf16.msra.mxu1 %v3186_v45 }
 0x369   :  { %1506 = vmatprep.subr.bf16.mxu0 %v3195_v46  ;;  %1547 = vmatprep.subr.bf16.mxu1 %v3200_v47 }
 0x36c   :  { %1507 = vmatpush1.bf16.msra.mxu0 %v3205_v48  ;;  %1548 = vmatpush1.bf16.msra.mxu1 %v3210_v49 }
 0x36d   :  { %1508 = vmatprep.subr.bf16.mxu0 %v3219_v50  ;;  %1549 = vmatprep.subr.bf16.mxu1 %v3224_v52 }
 0x370   :  { %1509 = vmatpush1.bf16.msra.mxu0 %v3229_v53  ;;  %1550 = vmatpush1.bf16.msra.mxu1 %v3234_v54 }
 0x371   :  { %1510 = vmatprep.subr.bf16.mxu0 %v3243_v55  ;;  %1551 = vmatprep.subr.bf16.mxu1 %v3248_v56 }
 0x374   :  { %1511 = vmatpush1.bf16.msra.mxu0 %v3253_v58  ;;  %1552 = vmatpush1.bf16.msra.mxu1 %v3258_v59 }
 0x375   :  { %1512 = vmatprep.subr.bf16.mxu0 %v3267_v60  ;;  %1553 = vmatprep.subr.bf16.mxu1 %v3272_v61 }
 0x378   :  { %1513 = vmatpush1.bf16.msra.mxu0 %v3277_v62  ;;  %1554 = vmatpush1.bf16.msra.mxu1 %v3282_v51 }
 0x379   :  { %1514 = vmatprep.subr.bf16.mxu0 %v3291_v63  ;;  %1555 = vmatprep.subr.bf16.mxu1 %v3296_v21 }
 0x37c   :  { %1515 = vmatpush1.bf16.msra.mxu0 %v3301_v22  ;;  %1556 = vmatpush1.bf16.msra.mxu1 %v3306_v2 }
 0x37d   :  { %1516 = vmatprep.subr.bf16.mxu0 %v3313_v3  ;;  %1557 = vmatprep.subr.bf16.mxu1 %v3318_v4 }
 0x380   :  { %1517 = vmatpush1.bf16.msra.mxu0 %v3325_v5  ;;  %1558 = vmatpush1.bf16.msra.mxu1 %v3330_v7 }
 0x381   :  { %1816 = vmatprep.subr.bf16.mxu0 %v3147_v39  ;;  %1857 = vmatprep.subr.bf16.mxu1 %v3152_v41 }
 0x435   :  { %v1222_v10 = vpop.f32.mrb[12].mxu0  ;;  %v1263_v11 = vpop.f32.mrb[12].mxu1 }
 0x436   :  { %v1270_v12 = vadd.f32 %v2368_v8, %v1222_v10  ;;  %v1224_v13 = vpop.f32.mrb[13].mxu0  ;;  %v1265_v14 = vpop.f32.mrb[13].mxu1  ;;  %v1272_v30 = vadd.f32 %v2370_v28, %v1263_v11 }
 0x437   :  { %v1271_v15 = vadd.f32 %v2369_v9, %v1224_v13  ;;  %v1226_v16 = vpop.f32.mrb[14].mxu0  ;;  %v1267_v17 = vpop.f32.mrb[14].mxu1  ;;  %v1273_v27 = vadd.f32 %v2371_v26, %v1265_v14  ;;  %v2409_v14 = vld [vmem:[%s3475_s1 + $0x88] sm:$0xff] }
 0x438   :  { %v2404_v18 = vmul.f32 -1.442695, %v1270_v12  ;;  %v1227_v19 = vpop.f32.mrb[15].mxu0  ;;  %v1268_v20 = vpop.f32.mrb[15].mxu1 }
 0x439   :  { %v2405_v23 = vmul.f32 -1.442695, %v1271_v15  ;;  %v2406_v29 = vmul.f32 -1.442695, %v1273_v27 }
 0x43a   :  { %2689 = vpow2.f32 %v2404_v18 }
 0x43b   :  { %2691 = vpow2.f32 %v2405_v23 }
 0x43c   :  { %2693 = vpow2.f32 %v2406_v29  ;;  %v2411_v29 = vld [vmem:[%s3475_s1 + $0x98] sm:$0xff] }
 0x43d   :  { %2695 = vtanh.f32 %v1272_v30 }
 0x444   :  { %v2690_v32 = vpop.eup %2689 }
 0x445   :  { %v2692_v33 = vpop.eup %2691  ;;  %v1278_v34 = vadd.f32 1.0, %v2690_v32  ;;  %v2410_v32 = vld [vmem:[%s3475_s1 + $0x90] sm:$0xff] }
 0x446   :  { %v1284_v37 = vadd.f32 1.0, %v2692_v33  ;;  %v2694_v38 = vpop.eup %2693 }
 0x447   :  { %2697 = vrcp.f32 %v1278_v34  ;;  %v2696_v40 = vpop.eup %2695  ;;  %v1291_v35 = vadd.f32 1.0, %v2694_v38 }
 0x448   :  { %2699 = vrcp.f32 %v1284_v37 }
 0x449   :  { %2701 = vrcp.f32 %v1291_v35 }
 0x451   :  { %v2698_v24 = vpop.eup %2697 }
 0x452   :  { %v2700_v25 = vpop.eup %2699  ;;  %v1295_v31 = vmul.f32 %v2698_v24, %v2696_v40 }
 0x453   :  { %v1294_v36 = vmul.f32 %v2700_v25, %v3136_v57  ;;  %v2702_v9 = vpop.eup %2701  ;;  %v2408_v57 = vld [vmem:[%s3475_s1 + $0x80] sm:$0xff] }
 0x455   :  { %v3351_v8 = vadd.f32 %v1295_v31, %v1294_v36 }
 0x457   :  { %2703 = vtanh.f32 %v3351_v8 }
 0x461   :  { %v2704_v10 = vpop.eup %2703 }
 0x462   :  { %v1298_v11 = vmul.f32 %v2704_v10, %v2702_v9 }
 0x464   :  { %v1299_v12 = vpack.c.bf16 %v1298_v11, %v1298_v11 }
 0x466   :  { %1300 = vst [vmem:[#allocation2] sm:$0xf] %v1299_v12  ;;  %2407 = vst [vmem:[%s3476_s3 + $0xc] sm:$0xf] %v1299_v12 }
 0x46d   :  { %v1309_v13 = vld [vmem:[#allocation2] sm:$0xf] }
 0x46e   :  { %1535 = vmatmul.mubr.bf16.vlgmr.msra.gmra.mrb[16].mxu0 %v1309_v13  ;;  %1576 = vmatmul.mubr.bf16.vlgmr.msra.gmra.mrb[16].mxu1 %v1309_v13 }
 0x46f   :  { %1817 = vmatpush1.bf16.msra.mxu0 %v3157_v0  ;;  %1858 = vmatpush1.bf16.msra.mxu1 %v3162_v42 }
 0x470   :  { %1818 = vmatprep.subr.bf16.mxu0 %v3171_v6  ;;  %1859 = vmatprep.subr.bf16.mxu1 %v3176_v43 }
 0x471   :  { %1848 = vmatprep.mubr.bf16.mxu0 %v2753_v1  ;;  %1889 = vmatprep.mubr.bf16.mxu1 %v2753_v1 }
 0x473   :  { %1819 = vmatpush1.bf16.msra.mxu0 %v3181_v44  ;;  %1860 = vmatpush1.bf16.msra.mxu1 %v3186_v45 }
 0x474   :  { %1820 = vmatprep.subr.bf16.mxu0 %v3195_v46  ;;  %1861 = vmatprep.subr.bf16.mxu1 %v3200_v47 }
 0x477   :  { %1821 = vmatpush1.bf16.msra.mxu0 %v3205_v48  ;;  %1862 = vmatpush1.bf16.msra.mxu1 %v3210_v49 }
 0x478   :  { %1822 = vmatprep.subr.bf16.mxu0 %v3219_v50  ;;  %1863 = vmatprep.subr.bf16.mxu1 %v3224_v52 }
 0x47b   :  { %1823 = vmatpush1.bf16.msra.mxu0 %v3229_v53  ;;  %1864 = vmatpush1.bf16.msra.mxu1 %v3234_v54 }
 0x47c   :  { %1824 = vmatprep.subr.bf16.mxu0 %v3243_v55  ;;  %1865 = vmatprep.subr.bf16.mxu1 %v3248_v56 }
 0x47f   :  { %1825 = vmatpush1.bf16.msra.mxu0 %v3253_v58  ;;  %1866 = vmatpush1.bf16.msra.mxu1 %v3258_v59 }
 0x480   :  { %1826 = vmatprep.subr.bf16.mxu0 %v3267_v60  ;;  %1867 = vmatprep.subr.bf16.mxu1 %v3272_v61 }
 0x483   :  { %1827 = vmatpush1.bf16.msra.mxu0 %v3277_v62  ;;  %1868 = vmatpush1.bf16.msra.mxu1 %v3282_v51 }
 0x484   :  { %1828 = vmatprep.subr.bf16.mxu0 %v3291_v63  ;;  %1869 = vmatprep.subr.bf16.mxu1 %v3296_v21 }
 0x487   :  { %1829 = vmatpush1.bf16.msra.mxu0 %v3301_v22  ;;  %1870 = vmatpush1.bf16.msra.mxu1 %v3306_v2 }
 0x488   :  { %1830 = vmatprep.subr.bf16.mxu0 %v3313_v3  ;;  %1871 = vmatprep.subr.bf16.mxu1 %v3318_v4 }
 0x48b   :  { %1831 = vmatpush1.bf16.msra.mxu0 %v3325_v5  ;;  %1872 = vmatpush1.bf16.msra.mxu1 %v3330_v7 }
 0x48c   :  { %2130 = vmatprep.subr.bf16.mxu0 %v3147_v39  ;;  %2171 = vmatprep.subr.bf16.mxu1 %v3152_v41 }
 0x541   :  { %v1536_v15 = vpop.f32.mrb[16].mxu0  ;;  %v1577_v16 = vpop.f32.mrb[16].mxu1 }
 0x542   :  { %v1584_v17 = vadd.f32 %v2408_v57, %v1536_v15  ;;  %v1538_v18 = vpop.f32.mrb[17].mxu0  ;;  %v1579_v19 = vpop.f32.mrb[17].mxu1  ;;  %v1586_v34 = vadd.f32 %v2410_v32, %v1577_v16 }
 0x543   :  { %v1585_v20 = vadd.f32 %v2409_v14, %v1538_v18  ;;  %v1540_v23 = vpop.f32.mrb[18].mxu0  ;;  %v1581_v26 = vpop.f32.mrb[18].mxu1  ;;  %v1587_v30 = vadd.f32 %v2411_v29, %v1579_v19 }
 0x544   :  { %v2444_v27 = vmul.f32 -1.442695, %v1584_v17  ;;  %v1541_v39 = vpop.f32.mrb[19].mxu0  ;;  %v1582_v28 = vpop.f32.mrb[19].mxu1  ;;  %v2488_v23 = vld [vmem:[%s3475_s1 + $0xc0] sm:$0xff]  ;;  %v2489_v26 = vld [vmem:[%s3475_s1 + $0xc8] sm:$0xff] }
 0x545   :  { %v2445_v41 = vmul.f32 -1.442695, %v1585_v20  ;;  %v2446_v33 = vmul.f32 -1.442695, %v1587_v30 }
 0x546   :  { %2705 = vpow2.f32 %v2444_v27 }
 0x547   :  { %2707 = vpow2.f32 %v2445_v41 }
 0x548   :  { %2709 = vpow2.f32 %v2446_v33 }
 0x549   :  { %2711 = vtanh.f32 %v1586_v34 }
 0x550   :  { %v2706_v37 = vpop.eup %2705 }
 0x551   :  { %v2708_v38 = vpop.eup %2707  ;;  %v1592_v40 = vadd.f32 1.0, %v2706_v37 }
 0x552   :  { %v1598_v24 = vadd.f32 1.0, %v2708_v38  ;;  %v2710_v25 = vpop.eup %2709 }
 0x553   :  { %2713 = vrcp.f32 %v1592_v40  ;;  %v2712_v31 = vpop.eup %2711  ;;  %v1605_v10 = vadd.f32 1.0, %v2710_v25 }
 0x554   :  { %2715 = vrcp.f32 %v1598_v24  ;;  %v2491_v24 = vld [vmem:[%s3475_s1 + $0xd8] sm:$0xff] }
 0x555   :  { %2717 = vrcp.f32 %v1605_v10 }
 0x55d   :  { %v2714_v35 = vpop.eup %2713 }
 0x55e   :  { %v2716_v36 = vpop.eup %2715  ;;  %v1609_v9 = vmul.f32 %v2714_v35, %v2712_v31  ;;  %v2490_v31 = vld [vmem:[%s3475_s1 + $0xd0] sm:$0xff] }
 0x55f   :  { %v1608_v11 = vmul.f32 %v2716_v36, %v3351_v8  ;;  %v2718_v13 = vpop.eup %2717 }
 0x561   :  { %v3404_v12 = vadd.f32 %v1609_v9, %v1608_v11 }
 0x563   :  { %2719 = vtanh.f32 %v3404_v12 }
 0x56d   :  { %v2720_v57 = vpop.eup %2719 }
 0x56e   :  { %v1612_v14 = vmul.f32 %v2720_v57, %v2718_v13 }
 0x570   :  { %v1613_v15 = vpack.c.bf16 %v1612_v14, %v1612_v14 }
 0x572   :  { %2447 = vst [vmem:[%s3476_s3 + $0x10] sm:$0xf] %v1613_v15  ;;  %1614 = vst [vmem:[#allocation2] sm:$0xf] %v1613_v15 }
 0x579   :  { %v1623_v16 = vld [vmem:[#allocation2] sm:$0xf] }
 0x57a   :  { %1849 = vmatmul.mubr.bf16.vlgmr.msra.gmra.mrb[20].mxu0 %v1623_v16  ;;  %1890 = vmatmul.mubr.bf16.vlgmr.msra.gmra.mrb[20].mxu1 %v1623_v16 }
 0x57b   :  { %2131 = vmatpush1.bf16.msra.mxu0 %v3157_v0  ;;  %2172 = vmatpush1.bf16.msra.mxu1 %v3162_v42  ;;  %v2449_v0 = vld [vmem:[%s3475_s1 + $0xa8] sm:$0xff] }
 0x57c   :  { %2132 = vmatprep.subr.bf16.mxu0 %v3171_v6  ;;  %2173 = vmatprep.subr.bf16.mxu1 %v3176_v43 }
 0x57d   :  { %2162 = vmatprep.mubr.bf16.mxu0 %v2753_v1  ;;  %2203 = vmatprep.mubr.bf16.mxu1 %v2753_v1  ;;  %v2448_v1 = vld [vmem:[%s3475_s1 + $0xa0] sm:$0xff] }
 0x57f   :  { %2133 = vmatpush1.bf16.msra.mxu0 %v3181_v44  ;;  %2174 = vmatpush1.bf16.msra.mxu1 %v3186_v45 }
 0x580   :  { %2134 = vmatprep.subr.bf16.mxu0 %v3195_v46  ;;  %2175 = vmatprep.subr.bf16.mxu1 %v3200_v47 }
 0x583   :  { %2135 = vmatpush1.bf16.msra.mxu0 %v3205_v48  ;;  %2176 = vmatpush1.bf16.msra.mxu1 %v3210_v49 }
 0x584   :  { %2136 = vmatprep.subr.bf16.mxu0 %v3219_v50  ;;  %2177 = vmatprep.subr.bf16.mxu1 %v3224_v52 }
 0x587   :  { %2137 = vmatpush1.bf16.msra.mxu0 %v3229_v53  ;;  %2178 = vmatpush1.bf16.msra.mxu1 %v3234_v54  ;;  %v2451_v54 = vld [vmem:[%s3475_s1 + $0xb8] sm:$0xff] }
 0x588   :  { %2138 = vmatprep.subr.bf16.mxu0 %v3243_v55  ;;  %2179 = vmatprep.subr.bf16.mxu1 %v3248_v56  ;;  %v2450_v56 = vld [vmem:[%s3475_s1 + $0xb0] sm:$0xff] }
 0x58b   :  { %2139 = vmatpush1.bf16.msra.mxu0 %v3253_v58  ;;  %2180 = vmatpush1.bf16.msra.mxu1 %v3258_v59 }
 0x58c   :  { %2140 = vmatprep.subr.bf16.mxu0 %v3267_v60  ;;  %2181 = vmatprep.subr.bf16.mxu1 %v3272_v61 }
 0x58f   :  { %2141 = vmatpush1.bf16.msra.mxu0 %v3277_v62  ;;  %2182 = vmatpush1.bf16.msra.mxu1 %v3282_v51 }
 0x590   :  { %2142 = vmatprep.subr.bf16.mxu0 %v3291_v63  ;;  %2183 = vmatprep.subr.bf16.mxu1 %v3296_v21 }
 0x593   :  { %2143 = vmatpush1.bf16.msra.mxu0 %v3301_v22  ;;  %2184 = vmatpush1.bf16.msra.mxu1 %v3306_v2 }
 0x594   :  { %2144 = vmatprep.subr.bf16.mxu0 %v3313_v3  ;;  %2185 = vmatprep.subr.bf16.mxu1 %v3318_v4 }
 0x597   :  { %2145 = vmatpush1.bf16.msra.mxu0 %v3325_v5  ;;  %2186 = vmatpush1.bf16.msra.mxu1 %v3330_v7 }
 0x64d   :  { %v1850_v42 = vpop.f32.mrb[20].mxu0  ;;  %v1891_v6 = vpop.f32.mrb[20].mxu1 }
 0x64e   :  { %v1898_v43 = vadd.f32 %v2448_v1, %v1850_v42  ;;  %v1852_v44 = vpop.f32.mrb[21].mxu0  ;;  %v1893_v45 = vpop.f32.mrb[21].mxu1  ;;  %v1900_v59 = vadd.f32 %v2450_v56, %v1891_v6 }
 0x64f   :  { %v1899_v46 = vadd.f32 %v2449_v0, %v1852_v44  ;;  %v1854_v47 = vpop.f32.mrb[22].mxu0  ;;  %v1895_v48 = vpop.f32.mrb[22].mxu1  ;;  %v1901_v55 = vadd.f32 %v2451_v54, %v1893_v45 }
 0x650   :  { %v2484_v49 = vmul.f32 -1.442695, %v1898_v43  ;;  %v1855_v50 = vpop.f32.mrb[23].mxu0  ;;  %v1896_v52 = vpop.f32.mrb[23].mxu1 }
 0x651   :  { %v2485_v53 = vmul.f32 -1.442695, %v1899_v46  ;;  %v2486_v58 = vmul.f32 -1.442695, %v1901_v55 }
 0x652   :  { %2721 = vpow2.f32 %v2484_v49 }
 0x653   :  { %2723 = vpow2.f32 %v2485_v53 }
 0x654   :  { %2725 = vpow2.f32 %v2486_v58 }
 0x655   :  { %2727 = vtanh.f32 %v1900_v59 }
 0x65c   :  { %v2722_v60 = vpop.eup %2721 }
 0x65d   :  { %v2724_v61 = vpop.eup %2723  ;;  %v1906_v62 = vadd.f32 1.0, %v2722_v60 }
 0x65e   :  { %v1912_v51 = vadd.f32 1.0, %v2724_v61  ;;  %v2726_v63 = vpop.eup %2725 }
 0x65f   :  { %2729 = vrcp.f32 %v1906_v62  ;;  %v2728_v21 = vpop.eup %2727  ;;  %v1919_v4 = vadd.f32 1.0, %v2726_v63 }
 0x660   :  { %2731 = vrcp.f32 %v1912_v51 }
 0x661   :  { %2733 = vrcp.f32 %v1919_v4 }
 0x669   :  { %v2730_v22 = vpop.eup %2729 }
 0x66a   :  { %v2732_v2 = vpop.eup %2731  ;;  %v1923_v3 = vmul.f32 %v2730_v22, %v2728_v21 }
 0x66b   :  { %v1922_v5 = vmul.f32 %v2732_v2, %v3404_v12  ;;  %v2734_v8 = vpop.eup %2733 }
 0x66d   :  { %v1924_v7 = vadd.f32 %v1923_v3, %v1922_v5 }
 0x66f   :  { %2735 = vtanh.f32 %v1924_v7 }
 0x679   :  { %v2736_v17 = vpop.eup %2735 }
 0x67a   :  { %v1926_v18 = vmul.f32 %v2736_v17, %v2734_v8 }
 0x67c   :  { %v1927_v19 = vpack.c.bf16 %v1926_v18, %v1926_v18 }
 0x67e   :  { %2487 = vst [vmem:[%s3476_s3 + $0x14] sm:$0xf] %v1927_v19  ;;  %1928 = vst [vmem:[#allocation2] sm:$0xf] %v1927_v19 }
 0x685   :  { %v1937_v20 = vld [vmem:[#allocation2] sm:$0xf] }
 0x686   :  { %2163 = vmatmul.mubr.bf16.vlgmr.msra.gmra.mrb[24].mxu0 %v1937_v20  ;;  %2204 = vmatmul.mubr.bf16.vlgmr.msra.gmra.mrb[24].mxu1 %v1937_v20 }
 0x759   :  { %v2164_v27 = vpop.f32.mrb[24].mxu0  ;;  %v2205_v39 = vpop.f32.mrb[24].mxu1 }
 0x75a   :  { %v2212_v28 = vadd.f32 %v2488_v23, %v2164_v27  ;;  %v2166_v41 = vpop.f32.mrb[25].mxu0  ;;  %v2207_v29 = vpop.f32.mrb[25].mxu1  ;;  %v2214_v36 = vadd.f32 %v2490_v31, %v2205_v39 }
 0x75b   :  { %v2213_v30 = vadd.f32 %v2489_v26, %v2166_v41  ;;  %v2168_v32 = vpop.f32.mrb[26].mxu0  ;;  %v2209_v33 = vpop.f32.mrb[26].mxu1  ;;  %v2215_v25 = vadd.f32 %v2491_v24, %v2207_v29 }
 0x75c   :  { %v2524_v34 = vmul.f32 -1.442695, %v2212_v28  ;;  %v2169_v37 = vpop.f32.mrb[27].mxu0  ;;  %v2210_v38 = vpop.f32.mrb[27].mxu1 }
 0x75d   :  { %v2525_v40 = vmul.f32 -1.442695, %v2213_v30  ;;  %v2526_v35 = vmul.f32 -1.442695, %v2215_v25 }
 0x75e   :  { %2737 = vpow2.f32 %v2524_v34 }
 0x75f   :  { %2739 = vpow2.f32 %v2525_v40 }
 0x760   :  { %2741 = vpow2.f32 %v2526_v35 }
 0x761   :  { %2743 = vtanh.f32 %v2214_v36 }
 0x768   :  { %v2738_v9 = vpop.eup %2737 }
 0x769   :  { %v2740_v10 = vpop.eup %2739  ;;  %v2220_v11 = vadd.f32 1.0, %v2738_v9 }
 0x76a   :  { %v2226_v12 = vadd.f32 1.0, %v2740_v10  ;;  %v2742_v13 = vpop.eup %2741 }
 0x76b   :  { %2745 = vrcp.f32 %v2220_v11  ;;  %v2744_v57 = vpop.eup %2743  ;;  %v2233_v1 = vadd.f32 1.0, %v2742_v13 }
 0x76c   :  { %2747 = vrcp.f32 %v2226_v12 }
 0x76d   :  { %2749 = vrcp.f32 %v2233_v1 }
 0x775   :  { %v2746_v14 = vpop.eup %2745 }
 0x776   :  { %v2748_v15 = vpop.eup %2747  ;;  %v2237_v16 = vmul.f32 %v2746_v14, %v2744_v57 }
 0x777   :  { %v2236_v0 = vmul.f32 %v2748_v15, %v1924_v7  ;;  %v2750_v6 = vpop.eup %2749 }
 0x779   :  { %v2238_v42 = vadd.f32 %v2237_v16, %v2236_v0 }
 0x77b   :  { %2751 = vtanh.f32 %v2238_v42 }
 0x785   :  { %v2752_v43 = vpop.eup %2751 }
 0x786   :  { %v2240_v44 = vmul.f32 %v2752_v43, %v2750_v6 }
 0x788   :  { %v2241_v45 = vpack.c.bf16 %v2240_v44, %v2240_v44 }
 0x78a   :  { %2242 = vst [vmem:[#allocation2] sm:$0xf] %v2241_v45  ;;  %2527 = vst [vmem:[%s3476_s3 + $0x18] sm:$0xf] %v2241_v45 }

</bundles_post_ra>
